<compile_context>
chip_gen: v5e
topology: v5e:2x2
jax: 0.10.0
libtpu: 0.0.40
codegen_flags: <defaults>
</compile_context>

<pallas_src>
import math

import jax
import jax.numpy as jnp
from jax import lax
from jax.experimental import pallas as pl
from jax.experimental.pallas import tpu as pltpu


GEN_STEPS = 179  # matches the module's `for _ in range(179)` loop


# ---------------------------------------------------------------------------
# In-kernel helpers (pure functions on values)
# ---------------------------------------------------------------------------
def _row_argmax(x):
    """First-occurrence argmax over the last dim. x: (B, N) f32 -> (B, 1) i32."""
    n = x.shape[-1]
    m = jnp.max(x, axis=-1, keepdims=True)                       # (B, 1)
    idx = lax.broadcasted_iota(jnp.int32, x.shape, 1)            # (B, N)
    cand = jnp.where(x == m, idx, n)                             # non-max -> N
    return jnp.min(cand, axis=-1, keepdims=True)                 # first max idx


def _gather_rows(tok_idx, table):
    """table[tok_idx] via one-hot matmul (stays on MXU, no scalar extraction).

    tok_idx: (B, 1) int32, table: (R, C) f32 -> (B, C) f32.
    """
    rows = table.shape[0]
    b = tok_idx.shape[0]
    iota = lax.broadcasted_iota(jnp.int32, (b, rows), 1)          # (B, R)
    onehot = (iota == tok_idx).astype(jnp.float32)                # exact one-hot
    return jnp.dot(onehot, table, preferred_element_type=jnp.float32)


# ---------------------------------------------------------------------------
# Fused forward kernel
# ---------------------------------------------------------------------------
def _make_fused_kernel(num_layers, seq_len, hidden_dim, gen_steps):
    H = hidden_dim

    def kernel(*refs):
        # ---- unpack refs ---------------------------------------------------
        emb_ref, xseq_ref = refs[0], refs[1]
        layers = []
        p = 2
        for _ in range(num_layers):
            layers.append(tuple(refs[p:p + 4]))   # (w_ih, w_hh, b_fold, b_hn)
            p += 4
        fcw_ref, fcb_ref = refs[p], refs[p + 1]
        out_ref = refs[p + 2]                      # (1+gen_steps, B, V)
        h_ref = refs[p + 3]                        # VMEM scratch (L, B, H)
        xin_ref = refs[p + 4]                      # VMEM scratch (B, E)

        def gru_cell(x, h, layer):
            """PyTorch GRU cell with merged (In, 3H) gate weights, gates r,z,n."""
            w_ih, w_hh, b_fold, b_hn = layer
            gi = jnp.dot(x, w_ih[...], preferred_element_type=jnp.float32) + b_fold[...]
            gh = jnp.dot(h, w_hh[...], preferred_element_type=jnp.float32)
            r = jax.nn.sigmoid(gi[:, 0 * H:1 * H] + gh[:, 0 * H:1 * H])
            z = jax.nn.sigmoid(gi[:, 1 * H:2 * H] + gh[:, 1 * H:2 * H])
            n = jnp.tanh(gi[:, 2 * H:3 * H] + r * (gh[:, 2 * H:3 * H] + b_hn[...]))
            return (1.0 - z) * n + z * h

        def stack_step(x):
            """One time step through all layers; hidden state lives in h_ref."""
            for l in range(num_layers):
                h_new = gru_cell(x, h_ref[l], layers[l])
                h_ref[l] = h_new
                x = h_new
            return x

        def head(x):
            return jnp.dot(x, fcw_ref[...],
                           preferred_element_type=jnp.float32) + fcb_ref[...]

        # ---- prefix pass over the input sequence (hidden starts at zero) ---
        h_ref[...] = jnp.zeros_like(h_ref)
        for t in range(seq_len):                  # static, small -> unrolled
            stack_step(xseq_ref[t])

        # ---- first prediction; first "token id" = argmax of hidden ---------
        last = h_ref[num_layers - 1]                                   # (B, H)
        out_ref[0] = head(last)
        tok0 = _row_argmax(last)   # faithful to the module (argmax over hidden)
        xin_ref[...] = _gather_rows(tok0, emb_ref[...])

        # ---- greedy autoregressive generation loop, fully on-chip ----------
        @pl.loop(1, 1 + gen_steps)
        def _(step):
            x = stack_step(xin_ref[...])
            logits = head(x)
            out_ref[step] = logits
            tok = _row_argmax(logits)
            xin_ref[...] = _gather_rows(tok, emb_ref[...])

    return kernel


def fused_forward(emb_table, xseq, gru_params, fc_w, fc_b, gen_steps=GEN_STEPS):
    """xseq: (T, B, E) time-major embedded inputs -> (1+gen_steps, B, V) logits."""
    T, B, E = xseq.shape
    V = emb_table.shape[0]
    H = fc_w.shape[0]
    L = len(gru_params)

    kernel = _make_fused_kernel(L, T, H, gen_steps)

    flat_weights = []
    for (w_ih, w_hh, b_fold, b_hn) in gru_params:
        flat_weights += [w_ih, w_hh, b_fold, b_hn]

    vmem = pl.BlockSpec(memory_space=pltpu.MemorySpace.VMEM)
    n_in = 2 + 4 * L + 2

    return pl.pallas_call(
        kernel,
        out_shape=jax.ShapeDtypeStruct((1 + gen_steps, B, V), jnp.float32),
        in_specs=[vmem] * n_in,
        out_specs=vmem,
        scratch_shapes=[
            pltpu.VMEM((L, B, H), jnp.float32),   # hidden state, all layers
            pltpu.VMEM((B, E), jnp.float32),      # current embedded token
        ],
        compiler_params=pltpu.CompilerParams(
            vmem_limit_bytes=32 * 1024 * 1024),
    )(emb_table, xseq, *flat_weights, fc_w, fc_b)


# ---------------------------------------------------------------------------
# Model glue (plain JAX around the single fused kernel)
# ---------------------------------------------------------------------------
def _fold_gru_biases(gru_params, hidden_dim):
    """Fold b_ih[r,z]+b_hh[r,z]; keep b_hn separate (needed inside the n gate)."""
    H = hidden_dim
    folded = []
    for (w_ih, w_hh, b_ih, b_hh) in gru_params:
        b_fold = jnp.concatenate(
            [b_ih[:, :2 * H] + b_hh[:, :2 * H], b_ih[:, 2 * H:]], axis=-1)
        b_hn = b_hh[:, 2 * H:]
        folded.append((w_ih, w_hh, b_fold, b_hn))
    return folded


def model_forward(params, x_tokens):
    """x_tokens: (B, T) int32 -> predictions (B, 180, vocab)."""
    emb_table = params["embedding"]                                # (V, E)
    fc_w, fc_b = params["fc_w"], params["fc_b"]
    H = fc_w.shape[0]

    gru_folded = _fold_gru_biases(params["gru"], H)

    embedded = jnp.take(emb_table, x_tokens, axis=0)               # (B, T, E)
    xseq = jnp.transpose(embedded, (1, 0, 2))                      # (T, B, E)

    out = fused_forward(emb_table, xseq, gru_folded, fc_w, fc_b)   # (180, B, V)
    return jnp.transpose(out, (1, 0, 2))                           # (B, 180, V)


# ---------------------------------------------------------------------------
# Deterministic parameter init (shapes follow GRUModel.__init__; GRU gate
# weights stored merged & pre-transposed as (In, 3H) / (H, 3H), gate order r,z,n)
# ---------------------------------------------------------------------------
def init_params(key, vocab_size, embedding_dim, hidden_dim, num_layers):
    n_keys = 2 + 4 * num_layers + 2
    keys = list(jax.random.split(key, n_keys))
    k = iter(keys)

    params = {}
    params["embedding"] = (
        jax.random.normal(next(k), (vocab_size, embedding_dim), jnp.float32) * 0.1
    )

    bound = 1.0 / math.sqrt(hidden_dim)
    gru_params = []
    for layer in range(num_layers):
        in_dim = embedding_dim if layer == 0 else hidden_dim
        w_ih = jax.random.uniform(
            next(k), (in_dim, 3 * hidden_dim), jnp.float32, -bound, bound)
        w_hh = jax.random.uniform(
            next(k), (hidden_dim, 3 * hidden_dim), jnp.float32, -bound, bound)
        b_ih = jax.random.uniform(
            next(k), (1, 3 * hidden_dim), jnp.float32, -bound, bound)
        b_hh = jax.random.uniform(
            next(k), (1, 3 * hidden_dim), jnp.float32, -bound, bound)
        gru_params.append((w_ih, w_hh, b_ih, b_hh))
    params["gru"] = gru_params

    params["fc_w"] = jax.random.uniform(
        next(k), (hidden_dim, vocab_size), jnp.float32, -bound, bound)
    params["fc_b"] = jax.random.uniform(
        next(k), (1, vocab_size), jnp.float32, -bound, bound)
    return params


# ---------------------------------------------------------------------------
if __name__ == "__main__":
    vocab_size = 64
    embedding_dim = 32
    hidden_dim = 32     # must be <= vocab_size (module uses hidden argmax as token id)
    num_layers = 2
    batch = 2
    seq_len = 8

    root = jax.random.PRNGKey(0)
    k_params, k_tokens = jax.random.split(root)

    params = init_params(k_params, vocab_size, embedding_dim, hidden_dim, num_layers)
    x_tokens = jax.random.randint(k_tokens, (batch, seq_len), 0, vocab_size, jnp.int32)

    forward = jax.jit(model_forward)
    preds = jax.block_until_ready(forward(params, x_tokens))

    assert preds.shape == (batch, 1 + GEN_STEPS, vocab_size), preds.shape
    assert preds.dtype == jnp.float32
    assert bool(jnp.all(jnp.isfinite(preds)))

    print("KERNEL_OK")
</pallas_src>

<mosaic_0001>
module attributes {stable_mosaic.version = 11 : i64} {
  func.func @kernel(%arg0: memref<64x32xf32, #tpu.memory_space<vmem>>, %arg1: memref<8x2x32xf32, #tpu.memory_space<vmem>>, %arg2: memref<32x96xf32, #tpu.memory_space<vmem>>, %arg3: memref<32x96xf32, #tpu.memory_space<vmem>>, %arg4: memref<1x96xf32, #tpu.memory_space<vmem>>, %arg5: memref<1x32xf32, #tpu.memory_space<vmem>>, %arg6: memref<32x96xf32, #tpu.memory_space<vmem>>, %arg7: memref<32x96xf32, #tpu.memory_space<vmem>>, %arg8: memref<1x96xf32, #tpu.memory_space<vmem>>, %arg9: memref<1x32xf32, #tpu.memory_space<vmem>>, %arg10: memref<32x64xf32, #tpu.memory_space<vmem>>, %arg11: memref<1x64xf32, #tpu.memory_space<vmem>>, %arg12: memref<180x2x64xf32, #tpu.memory_space<vmem>>, %arg13: memref<2x2x32xf32, #tpu.memory_space<vmem>>, %arg14: memref<2x32xf32, #tpu.memory_space<vmem>>) attributes {dimension_semantics = [], scalar_prefetch = 0 : i64, scratch_operands = 2 : i64, tpu.core_type = #tpu.core_type<tc>} {
    %cst = arith.constant 0.000000e+00 : f32
    %0 = vector.broadcast %cst : f32 to vector<2x2x32xf32>
    %c0 = arith.constant 0 : index
    %c0_0 = arith.constant 0 : index
    %c0_1 = arith.constant 0 : index
    %1 = vector.load %arg13[%c0, %c0_0, %c0_1] : memref<2x2x32xf32, #tpu.memory_space<vmem>>, vector<2x2x32xf32>
    tpu.vector_store %arg13[%c0, %c0_0, %c0_1], %0 {strides = array<i32>} : memref<2x2x32xf32, #tpu.memory_space<vmem>>, vector<2x2x32xf32>,
    %c0_2 = arith.constant 0 : index
    %c0_3 = arith.constant 0 : index
    %c0_4 = arith.constant 0 : index
    %2 = vector.load %arg1[%c0_2, %c0_3, %c0_4] : memref<8x2x32xf32, #tpu.memory_space<vmem>>, vector<1x2x32xf32>
    %3 = vector.shape_cast %2 : vector<1x2x32xf32> to vector<2x32xf32>
    %c0_5 = arith.constant 0 : index
    %c0_6 = arith.constant 0 : index
    %c0_7 = arith.constant 0 : index
    %4 = vector.load %arg13[%c0_5, %c0_6, %c0_7] : memref<2x2x32xf32, #tpu.memory_space<vmem>>, vector<1x2x32xf32>
    %5 = vector.shape_cast %4 : vector<1x2x32xf32> to vector<2x32xf32>
    %c0_8 = arith.constant 0 : index
    %c0_9 = arith.constant 0 : index
    %6 = vector.load %arg2[%c0_8, %c0_9] : memref<32x96xf32, #tpu.memory_space<vmem>>, vector<32x96xf32>
    %cst_10 = arith.constant dense<0.000000e+00> : vector<2x96xf32>
    %7 = tpu.matmul %3, %6, %cst_10 {dimension_numbers = #tpu.dot_dimension_numbers<[1], [0], [0], [1], [0, 0, 1, 1], [], []>} : vector<2x32xf32>, vector<32x96xf32>, vector<2x96xf32> -> vector<2x96xf32>
    %c0_11 = arith.constant 0 : index
    %c0_12 = arith.constant 0 : index
    %8 = vector.load %arg4[%c0_11, %c0_12] : memref<1x96xf32, #tpu.memory_space<vmem>>, vector<1x96xf32>
    %9 = vector.broadcast %8 : vector<1x96xf32> to vector<2x96xf32>
    %10 = arith.addf %7, %9 : vector<2x96xf32>
    %c0_13 = arith.constant 0 : index
    %c0_14 = arith.constant 0 : index
    %11 = vector.load %arg3[%c0_13, %c0_14] : memref<32x96xf32, #tpu.memory_space<vmem>>, vector<32x96xf32>
    %cst_15 = arith.constant dense<0.000000e+00> : vector<2x96xf32>
    %12 = tpu.matmul %5, %11, %cst_15 {dimension_numbers = #tpu.dot_dimension_numbers<[1], [0], [0], [1], [0, 0, 1, 1], [], []>} : vector<2x32xf32>, vector<32x96xf32>, vector<2x96xf32> -> vector<2x96xf32>
    %13 = vector.extract_strided_slice %10 {offsets = [0, 0], sizes = [2, 32], strides = [1, 1]} : vector<2x96xf32> to vector<2x32xf32>
    %14 = vector.extract_strided_slice %12 {offsets = [0, 0], sizes = [2, 32], strides = [1, 1]} : vector<2x96xf32> to vector<2x32xf32>
    %15 = arith.addf %13, %14 : vector<2x32xf32>
    %16 = arith.negf %15 : vector<2x32xf32>
    %17 = math.exp %16 : vector<2x32xf32>
    %cst_16 = arith.constant 1.000000e+00 : f32
    %18 = vector.broadcast %cst_16 : f32 to vector<2x32xf32>
    %19 = arith.addf %18, %17 : vector<2x32xf32>
    %20 = arith.divf %18, %19 : vector<2x32xf32>
    %21 = vector.extract_strided_slice %10 {offsets = [0, 32], sizes = [2, 32], strides = [1, 1]} : vector<2x96xf32> to vector<2x32xf32>
    %22 = vector.extract_strided_slice %12 {offsets = [0, 32], sizes = [2, 32], strides = [1, 1]} : vector<2x96xf32> to vector<2x32xf32>
    %23 = arith.addf %21, %22 : vector<2x32xf32>
    %24 = arith.negf %23 : vector<2x32xf32>
    %25 = math.exp %24 : vector<2x32xf32>
    %cst_17 = arith.constant 1.000000e+00 : f32
    %26 = vector.broadcast %cst_17 : f32 to vector<2x32xf32>
    %27 = arith.addf %26, %25 : vector<2x32xf32>
    %28 = arith.divf %26, %27 : vector<2x32xf32>
    %29 = vector.extract_strided_slice %10 {offsets = [0, 64], sizes = [2, 32], strides = [1, 1]} : vector<2x96xf32> to vector<2x32xf32>
    %30 = vector.extract_strided_slice %12 {offsets = [0, 64], sizes = [2, 32], strides = [1, 1]} : vector<2x96xf32> to vector<2x32xf32>
    %c0_18 = arith.constant 0 : index
    %c0_19 = arith.constant 0 : index
    %31 = vector.load %arg5[%c0_18, %c0_19] : memref<1x32xf32, #tpu.memory_space<vmem>>, vector<1x32xf32>
    %32 = vector.broadcast %31 : vector<1x32xf32> to vector<2x32xf32>
    %33 = arith.addf %30, %32 : vector<2x32xf32>
    %34 = arith.mulf %20, %33 : vector<2x32xf32>
    %35 = arith.addf %29, %34 : vector<2x32xf32>
    %36 = math.tanh %35 : vector<2x32xf32>
    %cst_20 = arith.constant 1.000000e+00 : f32
    %37 = vector.broadcast %cst_20 : f32 to vector<2x32xf32>
    %38 = arith.subf %37, %28 : vector<2x32xf32>
    %39 = arith.mulf %38, %36 : vector<2x32xf32>
    %40 = arith.mulf %28, %5 : vector<2x32xf32>
    %41 = arith.addf %39, %40 : vector<2x32xf32>
    %c0_21 = arith.constant 0 : index
    %c0_22 = arith.constant 0 : index
    %c0_23 = arith.constant 0 : index
    %42 = vector.load %arg13[%c0_21, %c0_22, %c0_23] : memref<2x2x32xf32, #tpu.memory_space<vmem>>, vector<1x2x32xf32>
    %43 = vector.shape_cast %42 : vector<1x2x32xf32> to vector<2x32xf32>
    %44 = vector.shape_cast %41 : vector<2x32xf32> to vector<1x2x32xf32>
    tpu.vector_store %arg13[%c0_21, %c0_22, %c0_23], %44 {strides = array<i32>} : memref<2x2x32xf32, #tpu.memory_space<vmem>>, vector<1x2x32xf32>,
    %c1 = arith.constant 1 : index
    %c0_24 = arith.constant 0 : index
    %c0_25 = arith.constant 0 : index
    %45 = vector.load %arg13[%c1, %c0_24, %c0_25] : memref<2x2x32xf32, #tpu.memory_space<vmem>>, vector<1x2x32xf32>
    %46 = vector.shape_cast %45 : vector<1x2x32xf32> to vector<2x32xf32>
    %c0_26 = arith.constant 0 : index
    %c0_27 = arith.constant 0 : index
    %47 = vector.load %arg6[%c0_26, %c0_27] : memref<32x96xf32, #tpu.memory_space<vmem>>, vector<32x96xf32>
    %cst_28 = arith.constant dense<0.000000e+00> : vector<2x96xf32>
    %48 = tpu.matmul %41, %47, %cst_28 {dimension_numbers = #tpu.dot_dimension_numbers<[1], [0], [0], [1], [0, 0, 1, 1], [], []>} : vector<2x32xf32>, vector<32x96xf32>, vector<2x96xf32> -> vector<2x96xf32>
    %c0_29 = arith.constant 0 : index
    %c0_30 = arith.constant 0 : index
    %49 = vector.load %arg8[%c0_29, %c0_30] : memref<1x96xf32, #tpu.memory_space<vmem>>, vector<1x96xf32>
    %50 = vector.broadcast %49 : vector<1x96xf32> to vector<2x96xf32>
    %51 = arith.addf %48, %50 : vector<2x96xf32>
    %c0_31 = arith.constant 0 : index
    %c0_32 = arith.constant 0 : index
    %52 = vector.load %arg7[%c0_31, %c0_32] : memref<32x96xf32, #tpu.memory_space<vmem>>, vector<32x96xf32>
    %cst_33 = arith.constant dense<0.000000e+00> : vector<2x96xf32>
    %53 = tpu.matmul %46, %52, %cst_33 {dimension_numbers = #tpu.dot_dimension_numbers<[1], [0], [0], [1], [0, 0, 1, 1], [], []>} : vector<2x32xf32>, vector<32x96xf32>, vector<2x96xf32> -> vector<2x96xf32>
    %54 = vector.extract_strided_slice %51 {offsets = [0, 0], sizes = [2, 32], strides = [1, 1]} : vector<2x96xf32> to vector<2x32xf32>
    %55 = vector.extract_strided_slice %53 {offsets = [0, 0], sizes = [2, 32], strides = [1, 1]} : vector<2x96xf32> to vector<2x32xf32>
    %56 = arith.addf %54, %55 : vector<2x32xf32>
    %57 = arith.negf %56 : vector<2x32xf32>
    %58 = math.exp %57 : vector<2x32xf32>
    %cst_34 = arith.constant 1.000000e+00 : f32
    %59 = vector.broadcast %cst_34 : f32 to vector<2x32xf32>
    %60 = arith.addf %59, %58 : vector<2x32xf32>
    %61 = arith.divf %59, %60 : vector<2x32xf32>
    %62 = vector.extract_strided_slice %51 {offsets = [0, 32], sizes = [2, 32], strides = [1, 1]} : vector<2x96xf32> to vector<2x32xf32>
    %63 = vector.extract_strided_slice %53 {offsets = [0, 32], sizes = [2, 32], strides = [1, 1]} : vector<2x96xf32> to vector<2x32xf32>
    %64 = arith.addf %62, %63 : vector<2x32xf32>
    %65 = arith.negf %64 : vector<2x32xf32>
    %66 = math.exp %65 : vector<2x32xf32>
    %cst_35 = arith.constant 1.000000e+00 : f32
    %67 = vector.broadcast %cst_35 : f32 to vector<2x32xf32>
    %68 = arith.addf %67, %66 : vector<2x32xf32>
    %69 = arith.divf %67, %68 : vector<2x32xf32>
    %70 = vector.extract_strided_slice %51 {offsets = [0, 64], sizes = [2, 32], strides = [1, 1]} : vector<2x96xf32> to vector<2x32xf32>
    %71 = vector.extract_strided_slice %53 {offsets = [0, 64], sizes = [2, 32], strides = [1, 1]} : vector<2x96xf32> to vector<2x32xf32>
    %c0_36 = arith.constant 0 : index
    %c0_37 = arith.constant 0 : index
    %72 = vector.load %arg9[%c0_36, %c0_37] : memref<1x32xf32, #tpu.memory_space<vmem>>, vector<1x32xf32>
    %73 = vector.broadcast %72 : vector<1x32xf32> to vector<2x32xf32>
    %74 = arith.addf %71, %73 : vector<2x32xf32>
    %75 = arith.mulf %61, %74 : vector<2x32xf32>
    %76 = arith.addf %70, %75 : vector<2x32xf32>
    %77 = math.tanh %76 : vector<2x32xf32>
    %cst_38 = arith.constant 1.000000e+00 : f32
    %78 = vector.broadcast %cst_38 : f32 to vector<2x32xf32>
    %79 = arith.subf %78, %69 : vector<2x32xf32>
    %80 = arith.mulf %79, %77 : vector<2x32xf32>
    %81 = arith.mulf %69, %46 : vector<2x32xf32>
    %82 = arith.addf %80, %81 : vector<2x32xf32>
    %c1_39 = arith.constant 1 : index
    %c0_40 = arith.constant 0 : index
    %c0_41 = arith.constant 0 : index
    %83 = vector.load %arg13[%c1_39, %c0_40, %c0_41] : memref<2x2x32xf32, #tpu.memory_space<vmem>>, vector<1x2x32xf32>
    %84 = vector.shape_cast %83 : vector<1x2x32xf32> to vector<2x32xf32>
    %85 = vector.shape_cast %82 : vector<2x32xf32> to vector<1x2x32xf32>
    tpu.vector_store %arg13[%c1_39, %c0_40, %c0_41], %85 {strides = array<i32>} : memref<2x2x32xf32, #tpu.memory_space<vmem>>, vector<1x2x32xf32>,
    %c1_42 = arith.constant 1 : index
    %c0_43 = arith.constant 0 : index
    %c0_44 = arith.constant 0 : index
    %86 = vector.load %arg1[%c1_42, %c0_43, %c0_44] : memref<8x2x32xf32, #tpu.memory_space<vmem>>, vector<1x2x32xf32>
    %87 = vector.shape_cast %86 : vector<1x2x32xf32> to vector<2x32xf32>
    %c0_45 = arith.constant 0 : index
    %c0_46 = arith.constant 0 : index
    %c0_47 = arith.constant 0 : index
    %88 = vector.load %arg13[%c0_45, %c0_46, %c0_47] : memref<2x2x32xf32, #tpu.memory_space<vmem>>, vector<1x2x32xf32>
    %89 = vector.shape_cast %88 : vector<1x2x32xf32> to vector<2x32xf32>
    %c0_48 = arith.constant 0 : index
    %c0_49 = arith.constant 0 : index
    %90 = vector.load %arg2[%c0_48, %c0_49] : memref<32x96xf32, #tpu.memory_space<vmem>>, vector<32x96xf32>
    %cst_50 = arith.constant dense<0.000000e+00> : vector<2x96xf32>
    %91 = tpu.matmul %87, %90, %cst_50 {dimension_numbers = #tpu.dot_dimension_numbers<[1], [0], [0], [1], [0, 0, 1, 1], [], []>} : vector<2x32xf32>, vector<32x96xf32>, vector<2x96xf32> -> vector<2x96xf32>
    %c0_51 = arith.constant 0 : index
    %c0_52 = arith.constant 0 : index
    %92 = vector.load %arg4[%c0_51, %c0_52] : memref<1x96xf32, #tpu.memory_space<vmem>>, vector<1x96xf32>
    %93 = vector.broadcast %92 : vector<1x96xf32> to vector<2x96xf32>
    %94 = arith.addf %91, %93 : vector<2x96xf32>
    %c0_53 = arith.constant 0 : index
    %c0_54 = arith.constant 0 : index
    %95 = vector.load %arg3[%c0_53, %c0_54] : memref<32x96xf32, #tpu.memory_space<vmem>>, vector<32x96xf32>
    %cst_55 = arith.constant dense<0.000000e+00> : vector<2x96xf32>
    %96 = tpu.matmul %89, %95, %cst_55 {dimension_numbers = #tpu.dot_dimension_numbers<[1], [0], [0], [1], [0, 0, 1, 1], [], []>} : vector<2x32xf32>, vector<32x96xf32>, vector<2x96xf32> -> vector<2x96xf32>
    %97 = vector.extract_strided_slice %94 {offsets = [0, 0], sizes = [2, 32], strides = [1, 1]} : vector<2x96xf32> to vector<2x32xf32>
    %98 = vector.extract_strided_slice %96 {offsets = [0, 0], sizes = [2, 32], strides = [1, 1]} : vector<2x96xf32> to vector<2x32xf32>
    %99 = arith.addf %97, %98 : vector<2x32xf32>
    %100 = arith.negf %99 : vector<2x32xf32>
    %101 = math.exp %100 : vector<2x32xf32>
    %cst_56 = arith.constant 1.000000e+00 : f32
    %102 = vector.broadcast %cst_56 : f32 to vector<2x32xf32>
    %103 = arith.addf %102, %101 : vector<2x32xf32>
    %104 = arith.divf %102, %103 : vector<2x32xf32>
    %105 = vector.extract_strided_slice %94 {offsets = [0, 32], sizes = [2, 32], strides = [1, 1]} : vector<2x96xf32> to vector<2x32xf32>
    %106 = vector.extract_strided_slice %96 {offsets = [0, 32], sizes = [2, 32], strides = [1, 1]} : vector<2x96xf32> to vector<2x32xf32>
    %107 = arith.addf %105, %106 : vector<2x32xf32>
    %108 = arith.negf %107 : vector<2x32xf32>
    %109 = math.exp %108 : vector<2x32xf32>
    %cst_57 = arith.constant 1.000000e+00 : f32
    %110 = vector.broadcast %cst_57 : f32 to vector<2x32xf32>
    %111 = arith.addf %110, %109 : vector<2x32xf32>
    %112 = arith.divf %110, %111 : vector<2x32xf32>
    %113 = vector.extract_strided_slice %94 {offsets = [0, 64], sizes = [2, 32], strides = [1, 1]} : vector<2x96xf32> to vector<2x32xf32>
    %114 = vector.extract_strided_slice %96 {offsets = [0, 64], sizes = [2, 32], strides = [1, 1]} : vector<2x96xf32> to vector<2x32xf32>
    %c0_58 = arith.constant 0 : index
    %c0_59 = arith.constant 0 : index
    %115 = vector.load %arg5[%c0_58, %c0_59] : memref<1x32xf32, #tpu.memory_space<vmem>>, vector<1x32xf32>
    %116 = vector.broadcast %115 : vector<1x32xf32> to vector<2x32xf32>
    %117 = arith.addf %114, %116 : vector<2x32xf32>
    %118 = arith.mulf %104, %117 : vector<2x32xf32>
    %119 = arith.addf %113, %118 : vector<2x32xf32>
    %120 = math.tanh %119 : vector<2x32xf32>
    %cst_60 = arith.constant 1.000000e+00 : f32
    %121 = vector.broadcast %cst_60 : f32 to vector<2x32xf32>
    %122 = arith.subf %121, %112 : vector<2x32xf32>
    %123 = arith.mulf %122, %120 : vector<2x32xf32>
    %124 = arith.mulf %112, %89 : vector<2x32xf32>
    %125 = arith.addf %123, %124 : vector<2x32xf32>
    %c0_61 = arith.constant 0 : index
    %c0_62 = arith.constant 0 : index
    %c0_63 = arith.constant 0 : index
    %126 = vector.load %arg13[%c0_61, %c0_62, %c0_63] : memref<2x2x32xf32, #tpu.memory_space<vmem>>, vector<1x2x32xf32>
    %127 = vector.shape_cast %126 : vector<1x2x32xf32> to vector<2x32xf32>
    %128 = vector.shape_cast %125 : vector<2x32xf32> to vector<1x2x32xf32>
    tpu.vector_store %arg13[%c0_61, %c0_62, %c0_63], %128 {strides = array<i32>} : memref<2x2x32xf32, #tpu.memory_space<vmem>>, vector<1x2x32xf32>,
    %c1_64 = arith.constant 1 : index
    %c0_65 = arith.constant 0 : index
    %c0_66 = arith.constant 0 : index
    %129 = vector.load %arg13[%c1_64, %c0_65, %c0_66] : memref<2x2x32xf32, #tpu.memory_space<vmem>>, vector<1x2x32xf32>
    %130 = vector.shape_cast %129 : vector<1x2x32xf32> to vector<2x32xf32>
    %c0_67 = arith.constant 0 : index
    %c0_68 = arith.constant 0 : index
    %131 = vector.load %arg6[%c0_67, %c0_68] : memref<32x96xf32, #tpu.memory_space<vmem>>, vector<32x96xf32>
    %cst_69 = arith.constant dense<0.000000e+00> : vector<2x96xf32>
    %132 = tpu.matmul %125, %131, %cst_69 {dimension_numbers = #tpu.dot_dimension_numbers<[1], [0], [0], [1], [0, 0, 1, 1], [], []>} : vector<2x32xf32>, vector<32x96xf32>, vector<2x96xf32> -> vector<2x96xf32>
    %c0_70 = arith.constant 0 : index
    %c0_71 = arith.constant 0 : index
    %133 = vector.load %arg8[%c0_70, %c0_71] : memref<1x96xf32, #tpu.memory_space<vmem>>, vector<1x96xf32>
    %134 = vector.broadcast %133 : vector<1x96xf32> to vector<2x96xf32>
    %135 = arith.addf %132, %134 : vector<2x96xf32>
    %c0_72 = arith.constant 0 : index
    %c0_73 = arith.constant 0 : index
    %136 = vector.load %arg7[%c0_72, %c0_73] : memref<32x96xf32, #tpu.memory_space<vmem>>, vector<32x96xf32>
    %cst_74 = arith.constant dense<0.000000e+00> : vector<2x96xf32>
    %137 = tpu.matmul %130, %136, %cst_74 {dimension_numbers = #tpu.dot_dimension_numbers<[1], [0], [0], [1], [0, 0, 1, 1], [], []>} : vector<2x32xf32>, vector<32x96xf32>, vector<2x96xf32> -> vector<2x96xf32>
    %138 = vector.extract_strided_slice %135 {offsets = [0, 0], sizes = [2, 32], strides = [1, 1]} : vector<2x96xf32> to vector<2x32xf32>
    %139 = vector.extract_strided_slice %137 {offsets = [0, 0], sizes = [2, 32], strides = [1, 1]} : vector<2x96xf32> to vector<2x32xf32>
    %140 = arith.addf %138, %139 : vector<2x32xf32>
    %141 = arith.negf %140 : vector<2x32xf32>
    %142 = math.exp %141 : vector<2x32xf32>
    %cst_75 = arith.constant 1.000000e+00 : f32
    %143 = vector.broadcast %cst_75 : f32 to vector<2x32xf32>
    %144 = arith.addf %143, %142 : vector<2x32xf32>
    %145 = arith.divf %143, %144 : vector<2x32xf32>
    %146 = vector.extract_strided_slice %135 {offsets = [0, 32], sizes = [2, 32], strides = [1, 1]} : vector<2x96xf32> to vector<2x32xf32>
    %147 = vector.extract_strided_slice %137 {offsets = [0, 32], sizes = [2, 32], strides = [1, 1]} : vector<2x96xf32> to vector<2x32xf32>
    %148 = arith.addf %146, %147 : vector<2x32xf32>
    %149 = arith.negf %148 : vector<2x32xf32>
    %150 = math.exp %149 : vector<2x32xf32>
    %cst_76 = arith.constant 1.000000e+00 : f32
    %151 = vector.broadcast %cst_76 : f32 to vector<2x32xf32>
    %152 = arith.addf %151, %150 : vector<2x32xf32>
    %153 = arith.divf %151, %152 : vector<2x32xf32>
    %154 = vector.extract_strided_slice %135 {offsets = [0, 64], sizes = [2, 32], strides = [1, 1]} : vector<2x96xf32> to vector<2x32xf32>
    %155 = vector.extract_strided_slice %137 {offsets = [0, 64], sizes = [2, 32], strides = [1, 1]} : vector<2x96xf32> to vector<2x32xf32>
    %c0_77 = arith.constant 0 : index
    %c0_78 = arith.constant 0 : index
    %156 = vector.load %arg9[%c0_77, %c0_78] : memref<1x32xf32, #tpu.memory_space<vmem>>, vector<1x32xf32>
    %157 = vector.broadcast %156 : vector<1x32xf32> to vector<2x32xf32>
    %158 = arith.addf %155, %157 : vector<2x32xf32>
    %159 = arith.mulf %145, %158 : vector<2x32xf32>
    %160 = arith.addf %154, %159 : vector<2x32xf32>
    %161 = math.tanh %160 : vector<2x32xf32>
    %cst_79 = arith.constant 1.000000e+00 : f32
    %162 = vector.broadcast %cst_79 : f32 to vector<2x32xf32>
    %163 = arith.subf %162, %153 : vector<2x32xf32>
    %164 = arith.mulf %163, %161 : vector<2x32xf32>
    %165 = arith.mulf %153, %130 : vector<2x32xf32>
    %166 = arith.addf %164, %165 : vector<2x32xf32>
    %c1_80 = arith.constant 1 : index
    %c0_81 = arith.constant 0 : index
    %c0_82 = arith.constant 0 : index
    %167 = vector.load %arg13[%c1_80, %c0_81, %c0_82] : memref<2x2x32xf32, #tpu.memory_space<vmem>>, vector<1x2x32xf32>
    %168 = vector.shape_cast %167 : vector<1x2x32xf32> to vector<2x32xf32>
    %169 = vector.shape_cast %166 : vector<2x32xf32> to vector<1x2x32xf32>
    tpu.vector_store %arg13[%c1_80, %c0_81, %c0_82], %169 {strides = array<i32>} : memref<2x2x32xf32, #tpu.memory_space<vmem>>, vector<1x2x32xf32>,
    %c2 = arith.constant 2 : index
    %c0_83 = arith.constant 0 : index
    %c0_84 = arith.constant 0 : index
    %170 = vector.load %arg1[%c2, %c0_83, %c0_84] : memref<8x2x32xf32, #tpu.memory_space<vmem>>, vector<1x2x32xf32>
    %171 = vector.shape_cast %170 : vector<1x2x32xf32> to vector<2x32xf32>
    %c0_85 = arith.constant 0 : index
    %c0_86 = arith.constant 0 : index
    %c0_87 = arith.constant 0 : index
    %172 = vector.load %arg13[%c0_85, %c0_86, %c0_87] : memref<2x2x32xf32, #tpu.memory_space<vmem>>, vector<1x2x32xf32>
    %173 = vector.shape_cast %172 : vector<1x2x32xf32> to vector<2x32xf32>
    %c0_88 = arith.constant 0 : index
    %c0_89 = arith.constant 0 : index
    %174 = vector.load %arg2[%c0_88, %c0_89] : memref<32x96xf32, #tpu.memory_space<vmem>>, vector<32x96xf32>
    %cst_90 = arith.constant dense<0.000000e+00> : vector<2x96xf32>
    %175 = tpu.matmul %171, %174, %cst_90 {dimension_numbers = #tpu.dot_dimension_numbers<[1], [0], [0], [1], [0, 0, 1, 1], [], []>} : vector<2x32xf32>, vector<32x96xf32>, vector<2x96xf32> -> vector<2x96xf32>
    %c0_91 = arith.constant 0 : index
    %c0_92 = arith.constant 0 : index
    %176 = vector.load %arg4[%c0_91, %c0_92] : memref<1x96xf32, #tpu.memory_space<vmem>>, vector<1x96xf32>
    %177 = vector.broadcast %176 : vector<1x96xf32> to vector<2x96xf32>
    %178 = arith.addf %175, %177 : vector<2x96xf32>
    %c0_93 = arith.constant 0 : index
    %c0_94 = arith.constant 0 : index
    %179 = vector.load %arg3[%c0_93, %c0_94] : memref<32x96xf32, #tpu.memory_space<vmem>>, vector<32x96xf32>
    %cst_95 = arith.constant dense<0.000000e+00> : vector<2x96xf32>
    %180 = tpu.matmul %173, %179, %cst_95 {dimension_numbers = #tpu.dot_dimension_numbers<[1], [0], [0], [1], [0, 0, 1, 1], [], []>} : vector<2x32xf32>, vector<32x96xf32>, vector<2x96xf32> -> vector<2x96xf32>
    %181 = vector.extract_strided_slice %178 {offsets = [0, 0], sizes = [2, 32], strides = [1, 1]} : vector<2x96xf32> to vector<2x32xf32>
    %182 = vector.extract_strided_slice %180 {offsets = [0, 0], sizes = [2, 32], strides = [1, 1]} : vector<2x96xf32> to vector<2x32xf32>
    %183 = arith.addf %181, %182 : vector<2x32xf32>
    %184 = arith.negf %183 : vector<2x32xf32>
    %185 = math.exp %184 : vector<2x32xf32>
    %cst_96 = arith.constant 1.000000e+00 : f32
    %186 = vector.broadcast %cst_96 : f32 to vector<2x32xf32>
    %187 = arith.addf %186, %185 : vector<2x32xf32>
    %188 = arith.divf %186, %187 : vector<2x32xf32>
    %189 = vector.extract_strided_slice %178 {offsets = [0, 32], sizes = [2, 32], strides = [1, 1]} : vector<2x96xf32> to vector<2x32xf32>
    %190 = vector.extract_strided_slice %180 {offsets = [0, 32], sizes = [2, 32], strides = [1, 1]} : vector<2x96xf32> to vector<2x32xf32>
    %191 = arith.addf %189, %190 : vector<2x32xf32>
    %192 = arith.negf %191 : vector<2x32xf32>
    %193 = math.exp %192 : vector<2x32xf32>
    %cst_97 = arith.constant 1.000000e+00 : f32
    %194 = vector.broadcast %cst_97 : f32 to vector<2x32xf32>
    %195 = arith.addf %194, %193 : vector<2x32xf32>
    %196 = arith.divf %194, %195 : vector<2x32xf32>
    %197 = vector.extract_strided_slice %178 {offsets = [0, 64], sizes = [2, 32], strides = [1, 1]} : vector<2x96xf32> to vector<2x32xf32>
    %198 = vector.extract_strided_slice %180 {offsets = [0, 64], sizes = [2, 32], strides = [1, 1]} : vector<2x96xf32> to vector<2x32xf32>
    %c0_98 = arith.constant 0 : index
    %c0_99 = arith.constant 0 : index
    %199 = vector.load %arg5[%c0_98, %c0_99] : memref<1x32xf32, #tpu.memory_space<vmem>>, vector<1x32xf32>
    %200 = vector.broadcast %199 : vector<1x32xf32> to vector<2x32xf32>
    %201 = arith.addf %198, %200 : vector<2x32xf32>
    %202 = arith.mulf %188, %201 : vector<2x32xf32>
    %203 = arith.addf %197, %202 : vector<2x32xf32>
    %204 = math.tanh %203 : vector<2x32xf32>
    %cst_100 = arith.constant 1.000000e+00 : f32
    %205 = vector.broadcast %cst_100 : f32 to vector<2x32xf32>
    %206 = arith.subf %205, %196 : vector<2x32xf32>
    %207 = arith.mulf %206, %204 : vector<2x32xf32>
    %208 = arith.mulf %196, %173 : vector<2x32xf32>
    %209 = arith.addf %207, %208 : vector<2x32xf32>
    %c0_101 = arith.constant 0 : index
    %c0_102 = arith.constant 0 : index
    %c0_103 = arith.constant 0 : index
    %210 = vector.load %arg13[%c0_101, %c0_102, %c0_103] : memref<2x2x32xf32, #tpu.memory_space<vmem>>, vector<1x2x32xf32>
    %211 = vector.shape_cast %210 : vector<1x2x32xf32> to vector<2x32xf32>
    %212 = vector.shape_cast %209 : vector<2x32xf32> to vector<1x2x32xf32>
    tpu.vector_store %arg13[%c0_101, %c0_102, %c0_103], %212 {strides = array<i32>} : memref<2x2x32xf32, #tpu.memory_space<vmem>>, vector<1x2x32xf32>,
    %c1_104 = arith.constant 1 : index
    %c0_105 = arith.constant 0 : index
    %c0_106 = arith.constant 0 : index
    %213 = vector.load %arg13[%c1_104, %c0_105, %c0_106] : memref<2x2x32xf32, #tpu.memory_space<vmem>>, vector<1x2x32xf32>
    %214 = vector.shape_cast %213 : vector<1x2x32xf32> to vector<2x32xf32>
    %c0_107 = arith.constant 0 : index
    %c0_108 = arith.constant 0 : index
    %215 = vector.load %arg6[%c0_107, %c0_108] : memref<32x96xf32, #tpu.memory_space<vmem>>, vector<32x96xf32>
    %cst_109 = arith.constant dense<0.000000e+00> : vector<2x96xf32>
    %216 = tpu.matmul %209, %215, %cst_109 {dimension_numbers = #tpu.dot_dimension_numbers<[1], [0], [0], [1], [0, 0, 1, 1], [], []>} : vector<2x32xf32>, vector<32x96xf32>, vector<2x96xf32> -> vector<2x96xf32>
    %c0_110 = arith.constant 0 : index
    %c0_111 = arith.constant 0 : index
    %217 = vector.load %arg8[%c0_110, %c0_111] : memref<1x96xf32, #tpu.memory_space<vmem>>, vector<1x96xf32>
    %218 = vector.broadcast %217 : vector<1x96xf32> to vector<2x96xf32>
    %219 = arith.addf %216, %218 : vector<2x96xf32>
    %c0_112 = arith.constant 0 : index
    %c0_113 = arith.constant 0 : index
    %220 = vector.load %arg7[%c0_112, %c0_113] : memref<32x96xf32, #tpu.memory_space<vmem>>, vector<32x96xf32>
    %cst_114 = arith.constant dense<0.000000e+00> : vector<2x96xf32>
    %221 = tpu.matmul %214, %220, %cst_114 {dimension_numbers = #tpu.dot_dimension_numbers<[1], [0], [0], [1], [0, 0, 1, 1], [], []>} : vector<2x32xf32>, vector<32x96xf32>, vector<2x96xf32> -> vector<2x96xf32>
    %222 = vector.extract_strided_slice %219 {offsets = [0, 0], sizes = [2, 32], strides = [1, 1]} : vector<2x96xf32> to vector<2x32xf32>
    %223 = vector.extract_strided_slice %221 {offsets = [0, 0], sizes = [2, 32], strides = [1, 1]} : vector<2x96xf32> to vector<2x32xf32>
    %224 = arith.addf %222, %223 : vector<2x32xf32>
    %225 = arith.negf %224 : vector<2x32xf32>
    %226 = math.exp %225 : vector<2x32xf32>
    %cst_115 = arith.constant 1.000000e+00 : f32
    %227 = vector.broadcast %cst_115 : f32 to vector<2x32xf32>
    %228 = arith.addf %227, %226 : vector<2x32xf32>
    %229 = arith.divf %227, %228 : vector<2x32xf32>
    %230 = vector.extract_strided_slice %219 {offsets = [0, 32], sizes = [2, 32], strides = [1, 1]} : vector<2x96xf32> to vector<2x32xf32>
    %231 = vector.extract_strided_slice %221 {offsets = [0, 32], sizes = [2, 32], strides = [1, 1]} : vector<2x96xf32> to vector<2x32xf32>
    %232 = arith.addf %230, %231 : vector<2x32xf32>
    %233 = arith.negf %232 : vector<2x32xf32>
    %234 = math.exp %233 : vector<2x32xf32>
    %cst_116 = arith.constant 1.000000e+00 : f32
    %235 = vector.broadcast %cst_116 : f32 to vector<2x32xf32>
    %236 = arith.addf %235, %234 : vector<2x32xf32>
    %237 = arith.divf %235, %236 : vector<2x32xf32>
    %238 = vector.extract_strided_slice %219 {offsets = [0, 64], sizes = [2, 32], strides = [1, 1]} : vector<2x96xf32> to vector<2x32xf32>
    %239 = vector.extract_strided_slice %221 {offsets = [0, 64], sizes = [2, 32], strides = [1, 1]} : vector<2x96xf32> to vector<2x32xf32>
    %c0_117 = arith.constant 0 : index
    %c0_118 = arith.constant 0 : index
    %240 = vector.load %arg9[%c0_117, %c0_118] : memref<1x32xf32, #tpu.memory_space<vmem>>, vector<1x32xf32>
    %241 = vector.broadcast %240 : vector<1x32xf32> to vector<2x32xf32>
    %242 = arith.addf %239, %241 : vector<2x32xf32>
    %243 = arith.mulf %229, %242 : vector<2x32xf32>
    %244 = arith.addf %238, %243 : vector<2x32xf32>
    %245 = math.tanh %244 : vector<2x32xf32>
    %cst_119 = arith.constant 1.000000e+00 : f32
    %246 = vector.broadcast %cst_119 : f32 to vector<2x32xf32>
    %247 = arith.subf %246, %237 : vector<2x32xf32>
    %248 = arith.mulf %247, %245 : vector<2x32xf32>
    %249 = arith.mulf %237, %214 : vector<2x32xf32>
    %250 = arith.addf %248, %249 : vector<2x32xf32>
    %c1_120 = arith.constant 1 : index
    %c0_121 = arith.constant 0 : index
    %c0_122 = arith.constant 0 : index
    %251 = vector.load %arg13[%c1_120, %c0_121, %c0_122] : memref<2x2x32xf32, #tpu.memory_space<vmem>>, vector<1x2x32xf32>
    %252 = vector.shape_cast %251 : vector<1x2x32xf32> to vector<2x32xf32>
    %253 = vector.shape_cast %250 : vector<2x32xf32> to vector<1x2x32xf32>
    tpu.vector_store %arg13[%c1_120, %c0_121, %c0_122], %253 {strides = array<i32>} : memref<2x2x32xf32, #tpu.memory_space<vmem>>, vector<1x2x32xf32>,
    %c3 = arith.constant 3 : index
    %c0_123 = arith.constant 0 : index
    %c0_124 = arith.constant 0 : index
    %254 = vector.load %arg1[%c3, %c0_123, %c0_124] : memref<8x2x32xf32, #tpu.memory_space<vmem>>, vector<1x2x32xf32>
    %255 = vector.shape_cast %254 : vector<1x2x32xf32> to vector<2x32xf32>
    %c0_125 = arith.constant 0 : index
    %c0_126 = arith.constant 0 : index
    %c0_127 = arith.constant 0 : index
    %256 = vector.load %arg13[%c0_125, %c0_126, %c0_127] : memref<2x2x32xf32, #tpu.memory_space<vmem>>, vector<1x2x32xf32>
    %257 = vector.shape_cast %256 : vector<1x2x32xf32> to vector<2x32xf32>
    %c0_128 = arith.constant 0 : index
    %c0_129 = arith.constant 0 : index
    %258 = vector.load %arg2[%c0_128, %c0_129] : memref<32x96xf32, #tpu.memory_space<vmem>>, vector<32x96xf32>
    %cst_130 = arith.constant dense<0.000000e+00> : vector<2x96xf32>
    %259 = tpu.matmul %255, %258, %cst_130 {dimension_numbers = #tpu.dot_dimension_numbers<[1], [0], [0], [1], [0, 0, 1, 1], [], []>} : vector<2x32xf32>, vector<32x96xf32>, vector<2x96xf32> -> vector<2x96xf32>
    %c0_131 = arith.constant 0 : index
    %c0_132 = arith.constant 0 : index
    %260 = vector.load %arg4[%c0_131, %c0_132] : memref<1x96xf32, #tpu.memory_space<vmem>>, vector<1x96xf32>
    %261 = vector.broadcast %260 : vector<1x96xf32> to vector<2x96xf32>
    %262 = arith.addf %259, %261 : vector<2x96xf32>
    %c0_133 = arith.constant 0 : index
    %c0_134 = arith.constant 0 : index
    %263 = vector.load %arg3[%c0_133, %c0_134] : memref<32x96xf32, #tpu.memory_space<vmem>>, vector<32x96xf32>
    %cst_135 = arith.constant dense<0.000000e+00> : vector<2x96xf32>
    %264 = tpu.matmul %257, %263, %cst_135 {dimension_numbers = #tpu.dot_dimension_numbers<[1], [0], [0], [1], [0, 0, 1, 1], [], []>} : vector<2x32xf32>, vector<32x96xf32>, vector<2x96xf32> -> vector<2x96xf32>
    %265 = vector.extract_strided_slice %262 {offsets = [0, 0], sizes = [2, 32], strides = [1, 1]} : vector<2x96xf32> to vector<2x32xf32>
    %266 = vector.extract_strided_slice %264 {offsets = [0, 0], sizes = [2, 32], strides = [1, 1]} : vector<2x96xf32> to vector<2x32xf32>
    %267 = arith.addf %265, %266 : vector<2x32xf32>
    %268 = arith.negf %267 : vector<2x32xf32>
    %269 = math.exp %268 : vector<2x32xf32>
    %cst_136 = arith.constant 1.000000e+00 : f32
    %270 = vector.broadcast %cst_136 : f32 to vector<2x32xf32>
    %271 = arith.addf %270, %269 : vector<2x32xf32>
    %272 = arith.divf %270, %271 : vector<2x32xf32>
    %273 = vector.extract_strided_slice %262 {offsets = [0, 32], sizes = [2, 32], strides = [1, 1]} : vector<2x96xf32> to vector<2x32xf32>
    %274 = vector.extract_strided_slice %264 {offsets = [0, 32], sizes = [2, 32], strides = [1, 1]} : vector<2x96xf32> to vector<2x32xf32>
    %275 = arith.addf %273, %274 : vector<2x32xf32>
    %276 = arith.negf %275 : vector<2x32xf32>
    %277 = math.exp %276 : vector<2x32xf32>
    %cst_137 = arith.constant 1.000000e+00 : f32
    %278 = vector.broadcast %cst_137 : f32 to vector<2x32xf32>
    %279 = arith.addf %278, %277 : vector<2x32xf32>
    %280 = arith.divf %278, %279 : vector<2x32xf32>
    %281 = vector.extract_strided_slice %262 {offsets = [0, 64], sizes = [2, 32], strides = [1, 1]} : vector<2x96xf32> to vector<2x32xf32>
    %282 = vector.extract_strided_slice %264 {offsets = [0, 64], sizes = [2, 32], strides = [1, 1]} : vector<2x96xf32> to vector<2x32xf32>
    %c0_138 = arith.constant 0 : index
    %c0_139 = arith.constant 0 : index
    %283 = vector.load %arg5[%c0_138, %c0_139] : memref<1x32xf32, #tpu.memory_space<vmem>>, vector<1x32xf32>
    %284 = vector.broadcast %283 : vector<1x32xf32> to vector<2x32xf32>
    %285 = arith.addf %282, %284 : vector<2x32xf32>
    %286 = arith.mulf %272, %285 : vector<2x32xf32>
    %287 = arith.addf %281, %286 : vector<2x32xf32>
    %288 = math.tanh %287 : vector<2x32xf32>
    %cst_140 = arith.constant 1.000000e+00 : f32
    %289 = vector.broadcast %cst_140 : f32 to vector<2x32xf32>
    %290 = arith.subf %289, %280 : vector<2x32xf32>
    %291 = arith.mulf %290, %288 : vector<2x32xf32>
    %292 = arith.mulf %280, %257 : vector<2x32xf32>
    %293 = arith.addf %291, %292 : vector<2x32xf32>
    %c0_141 = arith.constant 0 : index
    %c0_142 = arith.constant 0 : index
    %c0_143 = arith.constant 0 : index
    %294 = vector.load %arg13[%c0_141, %c0_142, %c0_143] : memref<2x2x32xf32, #tpu.memory_space<vmem>>, vector<1x2x32xf32>
    %295 = vector.shape_cast %294 : vector<1x2x32xf32> to vector<2x32xf32>
    %296 = vector.shape_cast %293 : vector<2x32xf32> to vector<1x2x32xf32>
    tpu.vector_store %arg13[%c0_141, %c0_142, %c0_143], %296 {strides = array<i32>} : memref<2x2x32xf32, #tpu.memory_space<vmem>>, vector<1x2x32xf32>,
    %c1_144 = arith.constant 1 : index
    %c0_145 = arith.constant 0 : index
    %c0_146 = arith.constant 0 : index
    %297 = vector.load %arg13[%c1_144, %c0_145, %c0_146] : memref<2x2x32xf32, #tpu.memory_space<vmem>>, vector<1x2x32xf32>
    %298 = vector.shape_cast %297 : vector<1x2x32xf32> to vector<2x32xf32>
    %c0_147 = arith.constant 0 : index
    %c0_148 = arith.constant 0 : index
    %299 = vector.load %arg6[%c0_147, %c0_148] : memref<32x96xf32, #tpu.memory_space<vmem>>, vector<32x96xf32>
    %cst_149 = arith.constant dense<0.000000e+00> : vector<2x96xf32>
    %300 = tpu.matmul %293, %299, %cst_149 {dimension_numbers = #tpu.dot_dimension_numbers<[1], [0], [0], [1], [0, 0, 1, 1], [], []>} : vector<2x32xf32>, vector<32x96xf32>, vector<2x96xf32> -> vector<2x96xf32>
    %c0_150 = arith.constant 0 : index
    %c0_151 = arith.constant 0 : index
    %301 = vector.load %arg8[%c0_150, %c0_151] : memref<1x96xf32, #tpu.memory_space<vmem>>, vector<1x96xf32>
    %302 = vector.broadcast %301 : vector<1x96xf32> to vector<2x96xf32>
    %303 = arith.addf %300, %302 : vector<2x96xf32>
    %c0_152 = arith.constant 0 : index
    %c0_153 = arith.constant 0 : index
    %304 = vector.load %arg7[%c0_152, %c0_153] : memref<32x96xf32, #tpu.memory_space<vmem>>, vector<32x96xf32>
    %cst_154 = arith.constant dense<0.000000e+00> : vector<2x96xf32>
    %305 = tpu.matmul %298, %304, %cst_154 {dimension_numbers = #tpu.dot_dimension_numbers<[1], [0], [0], [1], [0, 0, 1, 1], [], []>} : vector<2x32xf32>, vector<32x96xf32>, vector<2x96xf32> -> vector<2x96xf32>
    %306 = vector.extract_strided_slice %303 {offsets = [0, 0], sizes = [2, 32], strides = [1, 1]} : vector<2x96xf32> to vector<2x32xf32>
    %307 = vector.extract_strided_slice %305 {offsets = [0, 0], sizes = [2, 32], strides = [1, 1]} : vector<2x96xf32> to vector<2x32xf32>
    %308 = arith.addf %306, %307 : vector<2x32xf32>
    %309 = arith.negf %308 : vector<2x32xf32>
    %310 = math.exp %309 : vector<2x32xf32>
    %cst_155 = arith.constant 1.000000e+00 : f32
    %311 = vector.broadcast %cst_155 : f32 to vector<2x32xf32>
    %312 = arith.addf %311, %310 : vector<2x32xf32>
    %313 = arith.divf %311, %312 : vector<2x32xf32>
    %314 = vector.extract_strided_slice %303 {offsets = [0, 32], sizes = [2, 32], strides = [1, 1]} : vector<2x96xf32> to vector<2x32xf32>
    %315 = vector.extract_strided_slice %305 {offsets = [0, 32], sizes = [2, 32], strides = [1, 1]} : vector<2x96xf32> to vector<2x32xf32>
    %316 = arith.addf %314, %315 : vector<2x32xf32>
    %317 = arith.negf %316 : vector<2x32xf32>
    %318 = math.exp %317 : vector<2x32xf32>
    %cst_156 = arith.constant 1.000000e+00 : f32
    %319 = vector.broadcast %cst_156 : f32 to vector<2x32xf32>
    %320 = arith.addf %319, %318 : vector<2x32xf32>
    %321 = arith.divf %319, %320 : vector<2x32xf32>
    %322 = vector.extract_strided_slice %303 {offsets = [0, 64], sizes = [2, 32], strides = [1, 1]} : vector<2x96xf32> to vector<2x32xf32>
    %323 = vector.extract_strided_slice %305 {offsets = [0, 64], sizes = [2, 32], strides = [1, 1]} : vector<2x96xf32> to vector<2x32xf32>
    %c0_157 = arith.constant 0 : index
    %c0_158 = arith.constant 0 : index
    %324 = vector.load %arg9[%c0_157, %c0_158] : memref<1x32xf32, #tpu.memory_space<vmem>>, vector<1x32xf32>
    %325 = vector.broadcast %324 : vector<1x32xf32> to vector<2x32xf32>
    %326 = arith.addf %323, %325 : vector<2x32xf32>
    %327 = arith.mulf %313, %326 : vector<2x32xf32>
    %328 = arith.addf %322, %327 : vector<2x32xf32>
    %329 = math.tanh %328 : vector<2x32xf32>
    %cst_159 = arith.constant 1.000000e+00 : f32
    %330 = vector.broadcast %cst_159 : f32 to vector<2x32xf32>
    %331 = arith.subf %330, %321 : vector<2x32xf32>
    %332 = arith.mulf %331, %329 : vector<2x32xf32>
    %333 = arith.mulf %321, %298 : vector<2x32xf32>
    %334 = arith.addf %332, %333 : vector<2x32xf32>
    %c1_160 = arith.constant 1 : index
    %c0_161 = arith.constant 0 : index
    %c0_162 = arith.constant 0 : index
    %335 = vector.load %arg13[%c1_160, %c0_161, %c0_162] : memref<2x2x32xf32, #tpu.memory_space<vmem>>, vector<1x2x32xf32>
    %336 = vector.shape_cast %335 : vector<1x2x32xf32> to vector<2x32xf32>
    %337 = vector.shape_cast %334 : vector<2x32xf32> to vector<1x2x32xf32>
    tpu.vector_store %arg13[%c1_160, %c0_161, %c0_162], %337 {strides = array<i32>} : memref<2x2x32xf32, #tpu.memory_space<vmem>>, vector<1x2x32xf32>,
    %c4 = arith.constant 4 : index
    %c0_163 = arith.constant 0 : index
    %c0_164 = arith.constant 0 : index
    %338 = vector.load %arg1[%c4, %c0_163, %c0_164] : memref<8x2x32xf32, #tpu.memory_space<vmem>>, vector<1x2x32xf32>
    %339 = vector.shape_cast %338 : vector<1x2x32xf32> to vector<2x32xf32>
    %c0_165 = arith.constant 0 : index
    %c0_166 = arith.constant 0 : index
    %c0_167 = arith.constant 0 : index
    %340 = vector.load %arg13[%c0_165, %c0_166, %c0_167] : memref<2x2x32xf32, #tpu.memory_space<vmem>>, vector<1x2x32xf32>
    %341 = vector.shape_cast %340 : vector<1x2x32xf32> to vector<2x32xf32>
    %c0_168 = arith.constant 0 : index
    %c0_169 = arith.constant 0 : index
    %342 = vector.load %arg2[%c0_168, %c0_169] : memref<32x96xf32, #tpu.memory_space<vmem>>, vector<32x96xf32>
    %cst_170 = arith.constant dense<0.000000e+00> : vector<2x96xf32>
    %343 = tpu.matmul %339, %342, %cst_170 {dimension_numbers = #tpu.dot_dimension_numbers<[1], [0], [0], [1], [0, 0, 1, 1], [], []>} : vector<2x32xf32>, vector<32x96xf32>, vector<2x96xf32> -> vector<2x96xf32>
    %c0_171 = arith.constant 0 : index
    %c0_172 = arith.constant 0 : index
    %344 = vector.load %arg4[%c0_171, %c0_172] : memref<1x96xf32, #tpu.memory_space<vmem>>, vector<1x96xf32>
    %345 = vector.broadcast %344 : vector<1x96xf32> to vector<2x96xf32>
    %346 = arith.addf %343, %345 : vector<2x96xf32>
    %c0_173 = arith.constant 0 : index
    %c0_174 = arith.constant 0 : index
    %347 = vector.load %arg3[%c0_173, %c0_174] : memref<32x96xf32, #tpu.memory_space<vmem>>, vector<32x96xf32>
    %cst_175 = arith.constant dense<0.000000e+00> : vector<2x96xf32>
    %348 = tpu.matmul %341, %347, %cst_175 {dimension_numbers = #tpu.dot_dimension_numbers<[1], [0], [0], [1], [0, 0, 1, 1], [], []>} : vector<2x32xf32>, vector<32x96xf32>, vector<2x96xf32> -> vector<2x96xf32>
    %349 = vector.extract_strided_slice %346 {offsets = [0, 0], sizes = [2, 32], strides = [1, 1]} : vector<2x96xf32> to vector<2x32xf32>
    %350 = vector.extract_strided_slice %348 {offsets = [0, 0], sizes = [2, 32], strides = [1, 1]} : vector<2x96xf32> to vector<2x32xf32>
    %351 = arith.addf %349, %350 : vector<2x32xf32>
    %352 = arith.negf %351 : vector<2x32xf32>
    %353 = math.exp %352 : vector<2x32xf32>
    %cst_176 = arith.constant 1.000000e+00 : f32
    %354 = vector.broadcast %cst_176 : f32 to vector<2x32xf32>
    %355 = arith.addf %354, %353 : vector<2x32xf32>
    %356 = arith.divf %354, %355 : vector<2x32xf32>
    %357 = vector.extract_strided_slice %346 {offsets = [0, 32], sizes = [2, 32], strides = [1, 1]} : vector<2x96xf32> to vector<2x32xf32>
    %358 = vector.extract_strided_slice %348 {offsets = [0, 32], sizes = [2, 32], strides = [1, 1]} : vector<2x96xf32> to vector<2x32xf32>
    %359 = arith.addf %357, %358 : vector<2x32xf32>
    %360 = arith.negf %359 : vector<2x32xf32>
    %361 = math.exp %360 : vector<2x32xf32>
    %cst_177 = arith.constant 1.000000e+00 : f32
    %362 = vector.broadcast %cst_177 : f32 to vector<2x32xf32>
    %363 = arith.addf %362, %361 : vector<2x32xf32>
    %364 = arith.divf %362, %363 : vector<2x32xf32>
    %365 = vector.extract_strided_slice %346 {offsets = [0, 64], sizes = [2, 32], strides = [1, 1]} : vector<2x96xf32> to vector<2x32xf32>
    %366 = vector.extract_strided_slice %348 {offsets = [0, 64], sizes = [2, 32], strides = [1, 1]} : vector<2x96xf32> to vector<2x32xf32>
    %c0_178 = arith.constant 0 : index
    %c0_179 = arith.constant 0 : index
    %367 = vector.load %arg5[%c0_178, %c0_179] : memref<1x32xf32, #tpu.memory_space<vmem>>, vector<1x32xf32>
    %368 = vector.broadcast %367 : vector<1x32xf32> to vector<2x32xf32>
    %369 = arith.addf %366, %368 : vector<2x32xf32>
    %370 = arith.mulf %356, %369 : vector<2x32xf32>
    %371 = arith.addf %365, %370 : vector<2x32xf32>
    %372 = math.tanh %371 : vector<2x32xf32>
    %cst_180 = arith.constant 1.000000e+00 : f32
    %373 = vector.broadcast %cst_180 : f32 to vector<2x32xf32>
    %374 = arith.subf %373, %364 : vector<2x32xf32>
    %375 = arith.mulf %374, %372 : vector<2x32xf32>
    %376 = arith.mulf %364, %341 : vector<2x32xf32>
    %377 = arith.addf %375, %376 : vector<2x32xf32>
    %c0_181 = arith.constant 0 : index
    %c0_182 = arith.constant 0 : index
    %c0_183 = arith.constant 0 : index
    %378 = vector.load %arg13[%c0_181, %c0_182, %c0_183] : memref<2x2x32xf32, #tpu.memory_space<vmem>>, vector<1x2x32xf32>
    %379 = vector.shape_cast %378 : vector<1x2x32xf32> to vector<2x32xf32>
    %380 = vector.shape_cast %377 : vector<2x32xf32> to vector<1x2x32xf32>
    tpu.vector_store %arg13[%c0_181, %c0_182, %c0_183], %380 {strides = array<i32>} : memref<2x2x32xf32, #tpu.memory_space<vmem>>, vector<1x2x32xf32>,
    %c1_184 = arith.constant 1 : index
    %c0_185 = arith.constant 0 : index
    %c0_186 = arith.constant 0 : index
    %381 = vector.load %arg13[%c1_184, %c0_185, %c0_186] : memref<2x2x32xf32, #tpu.memory_space<vmem>>, vector<1x2x32xf32>
    %382 = vector.shape_cast %381 : vector<1x2x32xf32> to vector<2x32xf32>
    %c0_187 = arith.constant 0 : index
    %c0_188 = arith.constant 0 : index
    %383 = vector.load %arg6[%c0_187, %c0_188] : memref<32x96xf32, #tpu.memory_space<vmem>>, vector<32x96xf32>
    %cst_189 = arith.constant dense<0.000000e+00> : vector<2x96xf32>
    %384 = tpu.matmul %377, %383, %cst_189 {dimension_numbers = #tpu.dot_dimension_numbers<[1], [0], [0], [1], [0, 0, 1, 1], [], []>} : vector<2x32xf32>, vector<32x96xf32>, vector<2x96xf32> -> vector<2x96xf32>
    %c0_190 = arith.constant 0 : index
    %c0_191 = arith.constant 0 : index
    %385 = vector.load %arg8[%c0_190, %c0_191] : memref<1x96xf32, #tpu.memory_space<vmem>>, vector<1x96xf32>
    %386 = vector.broadcast %385 : vector<1x96xf32> to vector<2x96xf32>
    %387 = arith.addf %384, %386 : vector<2x96xf32>
    %c0_192 = arith.constant 0 : index
    %c0_193 = arith.constant 0 : index
    %388 = vector.load %arg7[%c0_192, %c0_193] : memref<32x96xf32, #tpu.memory_space<vmem>>, vector<32x96xf32>
    %cst_194 = arith.constant dense<0.000000e+00> : vector<2x96xf32>
    %389 = tpu.matmul %382, %388, %cst_194 {dimension_numbers = #tpu.dot_dimension_numbers<[1], [0], [0], [1], [0, 0, 1, 1], [], []>} : vector<2x32xf32>, vector<32x96xf32>, vector<2x96xf32> -> vector<2x96xf32>
    %390 = vector.extract_strided_slice %387 {offsets = [0, 0], sizes = [2, 32], strides = [1, 1]} : vector<2x96xf32> to vector<2x32xf32>
    %391 = vector.extract_strided_slice %389 {offsets = [0, 0], sizes = [2, 32], strides = [1, 1]} : vector<2x96xf32> to vector<2x32xf32>
    %392 = arith.addf %390, %391 : vector<2x32xf32>
    %393 = arith.negf %392 : vector<2x32xf32>
    %394 = math.exp %393 : vector<2x32xf32>
    %cst_195 = arith.constant 1.000000e+00 : f32
    %395 = vector.broadcast %cst_195 : f32 to vector<2x32xf32>
    %396 = arith.addf %395, %394 : vector<2x32xf32>
    %397 = arith.divf %395, %396 : vector<2x32xf32>
    %398 = vector.extract_strided_slice %387 {offsets = [0, 32], sizes = [2, 32], strides = [1, 1]} : vector<2x96xf32> to vector<2x32xf32>
    %399 = vector.extract_strided_slice %389 {offsets = [0, 32], sizes = [2, 32], strides = [1, 1]} : vector<2x96xf32> to vector<2x32xf32>
    %400 = arith.addf %398, %399 : vector<2x32xf32>
    %401 = arith.negf %400 : vector<2x32xf32>
    %402 = math.exp %401 : vector<2x32xf32>
    %cst_196 = arith.constant 1.000000e+00 : f32
    %403 = vector.broadcast %cst_196 : f32 to vector<2x32xf32>
    %404 = arith.addf %403, %402 : vector<2x32xf32>
    %405 = arith.divf %403, %404 : vector<2x32xf32>
    %406 = vector.extract_strided_slice %387 {offsets = [0, 64], sizes = [2, 32], strides = [1, 1]} : vector<2x96xf32> to vector<2x32xf32>
    %407 = vector.extract_strided_slice %389 {offsets = [0, 64], sizes = [2, 32], strides = [1, 1]} : vector<2x96xf32> to vector<2x32xf32>
    %c0_197 = arith.constant 0 : index
    %c0_198 = arith.constant 0 : index
    %408 = vector.load %arg9[%c0_197, %c0_198] : memref<1x32xf32, #tpu.memory_space<vmem>>, vector<1x32xf32>
    %409 = vector.broadcast %408 : vector<1x32xf32> to vector<2x32xf32>
    %410 = arith.addf %407, %409 : vector<2x32xf32>
    %411 = arith.mulf %397, %410 : vector<2x32xf32>
    %412 = arith.addf %406, %411 : vector<2x32xf32>
    %413 = math.tanh %412 : vector<2x32xf32>
    %cst_199 = arith.constant 1.000000e+00 : f32
    %414 = vector.broadcast %cst_199 : f32 to vector<2x32xf32>
    %415 = arith.subf %414, %405 : vector<2x32xf32>
    %416 = arith.mulf %415, %413 : vector<2x32xf32>
    %417 = arith.mulf %405, %382 : vector<2x32xf32>
    %418 = arith.addf %416, %417 : vector<2x32xf32>
    %c1_200 = arith.constant 1 : index
    %c0_201 = arith.constant 0 : index
    %c0_202 = arith.constant 0 : index
    %419 = vector.load %arg13[%c1_200, %c0_201, %c0_202] : memref<2x2x32xf32, #tpu.memory_space<vmem>>, vector<1x2x32xf32>
    %420 = vector.shape_cast %419 : vector<1x2x32xf32> to vector<2x32xf32>
    %421 = vector.shape_cast %418 : vector<2x32xf32> to vector<1x2x32xf32>
    tpu.vector_store %arg13[%c1_200, %c0_201, %c0_202], %421 {strides = array<i32>} : memref<2x2x32xf32, #tpu.memory_space<vmem>>, vector<1x2x32xf32>,
    %c5 = arith.constant 5 : index
    %c0_203 = arith.constant 0 : index
    %c0_204 = arith.constant 0 : index
    %422 = vector.load %arg1[%c5, %c0_203, %c0_204] : memref<8x2x32xf32, #tpu.memory_space<vmem>>, vector<1x2x32xf32>
    %423 = vector.shape_cast %422 : vector<1x2x32xf32> to vector<2x32xf32>
    %c0_205 = arith.constant 0 : index
    %c0_206 = arith.constant 0 : index
    %c0_207 = arith.constant 0 : index
    %424 = vector.load %arg13[%c0_205, %c0_206, %c0_207] : memref<2x2x32xf32, #tpu.memory_space<vmem>>, vector<1x2x32xf32>
    %425 = vector.shape_cast %424 : vector<1x2x32xf32> to vector<2x32xf32>
    %c0_208 = arith.constant 0 : index
    %c0_209 = arith.constant 0 : index
    %426 = vector.load %arg2[%c0_208, %c0_209] : memref<32x96xf32, #tpu.memory_space<vmem>>, vector<32x96xf32>
    %cst_210 = arith.constant dense<0.000000e+00> : vector<2x96xf32>
    %427 = tpu.matmul %423, %426, %cst_210 {dimension_numbers = #tpu.dot_dimension_numbers<[1], [0], [0], [1], [0, 0, 1, 1], [], []>} : vector<2x32xf32>, vector<32x96xf32>, vector<2x96xf32> -> vector<2x96xf32>
    %c0_211 = arith.constant 0 : index
    %c0_212 = arith.constant 0 : index
    %428 = vector.load %arg4[%c0_211, %c0_212] : memref<1x96xf32, #tpu.memory_space<vmem>>, vector<1x96xf32>
    %429 = vector.broadcast %428 : vector<1x96xf32> to vector<2x96xf32>
    %430 = arith.addf %427, %429 : vector<2x96xf32>
    %c0_213 = arith.constant 0 : index
    %c0_214 = arith.constant 0 : index
    %431 = vector.load %arg3[%c0_213, %c0_214] : memref<32x96xf32, #tpu.memory_space<vmem>>, vector<32x96xf32>
    %cst_215 = arith.constant dense<0.000000e+00> : vector<2x96xf32>
    %432 = tpu.matmul %425, %431, %cst_215 {dimension_numbers = #tpu.dot_dimension_numbers<[1], [0], [0], [1], [0, 0, 1, 1], [], []>} : vector<2x32xf32>, vector<32x96xf32>, vector<2x96xf32> -> vector<2x96xf32>
    %433 = vector.extract_strided_slice %430 {offsets = [0, 0], sizes = [2, 32], strides = [1, 1]} : vector<2x96xf32> to vector<2x32xf32>
    %434 = vector.extract_strided_slice %432 {offsets = [0, 0], sizes = [2, 32], strides = [1, 1]} : vector<2x96xf32> to vector<2x32xf32>
    %435 = arith.addf %433, %434 : vector<2x32xf32>
    %436 = arith.negf %435 : vector<2x32xf32>
    %437 = math.exp %436 : vector<2x32xf32>
    %cst_216 = arith.constant 1.000000e+00 : f32
    %438 = vector.broadcast %cst_216 : f32 to vector<2x32xf32>
    %439 = arith.addf %438, %437 : vector<2x32xf32>
    %440 = arith.divf %438, %439 : vector<2x32xf32>
    %441 = vector.extract_strided_slice %430 {offsets = [0, 32], sizes = [2, 32], strides = [1, 1]} : vector<2x96xf32> to vector<2x32xf32>
    %442 = vector.extract_strided_slice %432 {offsets = [0, 32], sizes = [2, 32], strides = [1, 1]} : vector<2x96xf32> to vector<2x32xf32>
    %443 = arith.addf %441, %442 : vector<2x32xf32>
    %444 = arith.negf %443 : vector<2x32xf32>
    %445 = math.exp %444 : vector<2x32xf32>
    %cst_217 = arith.constant 1.000000e+00 : f32
    %446 = vector.broadcast %cst_217 : f32 to vector<2x32xf32>
    %447 = arith.addf %446, %445 : vector<2x32xf32>
    %448 = arith.divf %446, %447 : vector<2x32xf32>
    %449 = vector.extract_strided_slice %430 {offsets = [0, 64], sizes = [2, 32], strides = [1, 1]} : vector<2x96xf32> to vector<2x32xf32>
    %450 = vector.extract_strided_slice %432 {offsets = [0, 64], sizes = [2, 32], strides = [1, 1]} : vector<2x96xf32> to vector<2x32xf32>
    %c0_218 = arith.constant 0 : index
    %c0_219 = arith.constant 0 : index
    %451 = vector.load %arg5[%c0_218, %c0_219] : memref<1x32xf32, #tpu.memory_space<vmem>>, vector<1x32xf32>
    %452 = vector.broadcast %451 : vector<1x32xf32> to vector<2x32xf32>
    %453 = arith.addf %450, %452 : vector<2x32xf32>
    %454 = arith.mulf %440, %453 : vector<2x32xf32>
    %455 = arith.addf %449, %454 : vector<2x32xf32>
    %456 = math.tanh %455 : vector<2x32xf32>
    %cst_220 = arith.constant 1.000000e+00 : f32
    %457 = vector.broadcast %cst_220 : f32 to vector<2x32xf32>
    %458 = arith.subf %457, %448 : vector<2x32xf32>
    %459 = arith.mulf %458, %456 : vector<2x32xf32>
    %460 = arith.mulf %448, %425 : vector<2x32xf32>
    %461 = arith.addf %459, %460 : vector<2x32xf32>
    %c0_221 = arith.constant 0 : index
    %c0_222 = arith.constant 0 : index
    %c0_223 = arith.constant 0 : index
    %462 = vector.load %arg13[%c0_221, %c0_222, %c0_223] : memref<2x2x32xf32, #tpu.memory_space<vmem>>, vector<1x2x32xf32>
    %463 = vector.shape_cast %462 : vector<1x2x32xf32> to vector<2x32xf32>
    %464 = vector.shape_cast %461 : vector<2x32xf32> to vector<1x2x32xf32>
    tpu.vector_store %arg13[%c0_221, %c0_222, %c0_223], %464 {strides = array<i32>} : memref<2x2x32xf32, #tpu.memory_space<vmem>>, vector<1x2x32xf32>,
    %c1_224 = arith.constant 1 : index
    %c0_225 = arith.constant 0 : index
    %c0_226 = arith.constant 0 : index
    %465 = vector.load %arg13[%c1_224, %c0_225, %c0_226] : memref<2x2x32xf32, #tpu.memory_space<vmem>>, vector<1x2x32xf32>
    %466 = vector.shape_cast %465 : vector<1x2x32xf32> to vector<2x32xf32>
    %c0_227 = arith.constant 0 : index
    %c0_228 = arith.constant 0 : index
    %467 = vector.load %arg6[%c0_227, %c0_228] : memref<32x96xf32, #tpu.memory_space<vmem>>, vector<32x96xf32>
    %cst_229 = arith.constant dense<0.000000e+00> : vector<2x96xf32>
    %468 = tpu.matmul %461, %467, %cst_229 {dimension_numbers = #tpu.dot_dimension_numbers<[1], [0], [0], [1], [0, 0, 1, 1], [], []>} : vector<2x32xf32>, vector<32x96xf32>, vector<2x96xf32> -> vector<2x96xf32>
    %c0_230 = arith.constant 0 : index
    %c0_231 = arith.constant 0 : index
    %469 = vector.load %arg8[%c0_230, %c0_231] : memref<1x96xf32, #tpu.memory_space<vmem>>, vector<1x96xf32>
    %470 = vector.broadcast %469 : vector<1x96xf32> to vector<2x96xf32>
    %471 = arith.addf %468, %470 : vector<2x96xf32>
    %c0_232 = arith.constant 0 : index
    %c0_233 = arith.constant 0 : index
    %472 = vector.load %arg7[%c0_232, %c0_233] : memref<32x96xf32, #tpu.memory_space<vmem>>, vector<32x96xf32>
    %cst_234 = arith.constant dense<0.000000e+00> : vector<2x96xf32>
    %473 = tpu.matmul %466, %472, %cst_234 {dimension_numbers = #tpu.dot_dimension_numbers<[1], [0], [0], [1], [0, 0, 1, 1], [], []>} : vector<2x32xf32>, vector<32x96xf32>, vector<2x96xf32> -> vector<2x96xf32>
    %474 = vector.extract_strided_slice %471 {offsets = [0, 0], sizes = [2, 32], strides = [1, 1]} : vector<2x96xf32> to vector<2x32xf32>
    %475 = vector.extract_strided_slice %473 {offsets = [0, 0], sizes = [2, 32], strides = [1, 1]} : vector<2x96xf32> to vector<2x32xf32>
    %476 = arith.addf %474, %475 : vector<2x32xf32>
    %477 = arith.negf %476 : vector<2x32xf32>
    %478 = math.exp %477 : vector<2x32xf32>
    %cst_235 = arith.constant 1.000000e+00 : f32
    %479 = vector.broadcast %cst_235 : f32 to vector<2x32xf32>
    %480 = arith.addf %479, %478 : vector<2x32xf32>
    %481 = arith.divf %479, %480 : vector<2x32xf32>
    %482 = vector.extract_strided_slice %471 {offsets = [0, 32], sizes = [2, 32], strides = [1, 1]} : vector<2x96xf32> to vector<2x32xf32>
    %483 = vector.extract_strided_slice %473 {offsets = [0, 32], sizes = [2, 32], strides = [1, 1]} : vector<2x96xf32> to vector<2x32xf32>
    %484 = arith.addf %482, %483 : vector<2x32xf32>
    %485 = arith.negf %484 : vector<2x32xf32>
    %486 = math.exp %485 : vector<2x32xf32>
    %cst_236 = arith.constant 1.000000e+00 : f32
    %487 = vector.broadcast %cst_236 : f32 to vector<2x32xf32>
    %488 = arith.addf %487, %486 : vector<2x32xf32>
    %489 = arith.divf %487, %488 : vector<2x32xf32>
    %490 = vector.extract_strided_slice %471 {offsets = [0, 64], sizes = [2, 32], strides = [1, 1]} : vector<2x96xf32> to vector<2x32xf32>
    %491 = vector.extract_strided_slice %473 {offsets = [0, 64], sizes = [2, 32], strides = [1, 1]} : vector<2x96xf32> to vector<2x32xf32>
    %c0_237 = arith.constant 0 : index
    %c0_238 = arith.constant 0 : index
    %492 = vector.load %arg9[%c0_237, %c0_238] : memref<1x32xf32, #tpu.memory_space<vmem>>, vector<1x32xf32>
    %493 = vector.broadcast %492 : vector<1x32xf32> to vector<2x32xf32>
    %494 = arith.addf %491, %493 : vector<2x32xf32>
    %495 = arith.mulf %481, %494 : vector<2x32xf32>
    %496 = arith.addf %490, %495 : vector<2x32xf32>
    %497 = math.tanh %496 : vector<2x32xf32>
    %cst_239 = arith.constant 1.000000e+00 : f32
    %498 = vector.broadcast %cst_239 : f32 to vector<2x32xf32>
    %499 = arith.subf %498, %489 : vector<2x32xf32>
    %500 = arith.mulf %499, %497 : vector<2x32xf32>
    %501 = arith.mulf %489, %466 : vector<2x32xf32>
    %502 = arith.addf %500, %501 : vector<2x32xf32>
    %c1_240 = arith.constant 1 : index
    %c0_241 = arith.constant 0 : index
    %c0_242 = arith.constant 0 : index
    %503 = vector.load %arg13[%c1_240, %c0_241, %c0_242] : memref<2x2x32xf32, #tpu.memory_space<vmem>>, vector<1x2x32xf32>
    %504 = vector.shape_cast %503 : vector<1x2x32xf32> to vector<2x32xf32>
    %505 = vector.shape_cast %502 : vector<2x32xf32> to vector<1x2x32xf32>
    tpu.vector_store %arg13[%c1_240, %c0_241, %c0_242], %505 {strides = array<i32>} : memref<2x2x32xf32, #tpu.memory_space<vmem>>, vector<1x2x32xf32>,
    %c6 = arith.constant 6 : index
    %c0_243 = arith.constant 0 : index
    %c0_244 = arith.constant 0 : index
    %506 = vector.load %arg1[%c6, %c0_243, %c0_244] : memref<8x2x32xf32, #tpu.memory_space<vmem>>, vector<1x2x32xf32>
    %507 = vector.shape_cast %506 : vector<1x2x32xf32> to vector<2x32xf32>
    %c0_245 = arith.constant 0 : index
    %c0_246 = arith.constant 0 : index
    %c0_247 = arith.constant 0 : index
    %508 = vector.load %arg13[%c0_245, %c0_246, %c0_247] : memref<2x2x32xf32, #tpu.memory_space<vmem>>, vector<1x2x32xf32>
    %509 = vector.shape_cast %508 : vector<1x2x32xf32> to vector<2x32xf32>
    %c0_248 = arith.constant 0 : index
    %c0_249 = arith.constant 0 : index
    %510 = vector.load %arg2[%c0_248, %c0_249] : memref<32x96xf32, #tpu.memory_space<vmem>>, vector<32x96xf32>
    %cst_250 = arith.constant dense<0.000000e+00> : vector<2x96xf32>
    %511 = tpu.matmul %507, %510, %cst_250 {dimension_numbers = #tpu.dot_dimension_numbers<[1], [0], [0], [1], [0, 0, 1, 1], [], []>} : vector<2x32xf32>, vector<32x96xf32>, vector<2x96xf32> -> vector<2x96xf32>
    %c0_251 = arith.constant 0 : index
    %c0_252 = arith.constant 0 : index
    %512 = vector.load %arg4[%c0_251, %c0_252] : memref<1x96xf32, #tpu.memory_space<vmem>>, vector<1x96xf32>
    %513 = vector.broadcast %512 : vector<1x96xf32> to vector<2x96xf32>
    %514 = arith.addf %511, %513 : vector<2x96xf32>
    %c0_253 = arith.constant 0 : index
    %c0_254 = arith.constant 0 : index
    %515 = vector.load %arg3[%c0_253, %c0_254] : memref<32x96xf32, #tpu.memory_space<vmem>>, vector<32x96xf32>
    %cst_255 = arith.constant dense<0.000000e+00> : vector<2x96xf32>
    %516 = tpu.matmul %509, %515, %cst_255 {dimension_numbers = #tpu.dot_dimension_numbers<[1], [0], [0], [1], [0, 0, 1, 1], [], []>} : vector<2x32xf32>, vector<32x96xf32>, vector<2x96xf32> -> vector<2x96xf32>
    %517 = vector.extract_strided_slice %514 {offsets = [0, 0], sizes = [2, 32], strides = [1, 1]} : vector<2x96xf32> to vector<2x32xf32>
    %518 = vector.extract_strided_slice %516 {offsets = [0, 0], sizes = [2, 32], strides = [1, 1]} : vector<2x96xf32> to vector<2x32xf32>
    %519 = arith.addf %517, %518 : vector<2x32xf32>
    %520 = arith.negf %519 : vector<2x32xf32>
    %521 = math.exp %520 : vector<2x32xf32>
    %cst_256 = arith.constant 1.000000e+00 : f32
    %522 = vector.broadcast %cst_256 : f32 to vector<2x32xf32>
    %523 = arith.addf %522, %521 : vector<2x32xf32>
    %524 = arith.divf %522, %523 : vector<2x32xf32>
    %525 = vector.extract_strided_slice %514 {offsets = [0, 32], sizes = [2, 32], strides = [1, 1]} : vector<2x96xf32> to vector<2x32xf32>
    %526 = vector.extract_strided_slice %516 {offsets = [0, 32], sizes = [2, 32], strides = [1, 1]} : vector<2x96xf32> to vector<2x32xf32>
    %527 = arith.addf %525, %526 : vector<2x32xf32>
    %528 = arith.negf %527 : vector<2x32xf32>
    %529 = math.exp %528 : vector<2x32xf32>
    %cst_257 = arith.constant 1.000000e+00 : f32
    %530 = vector.broadcast %cst_257 : f32 to vector<2x32xf32>
    %531 = arith.addf %530, %529 : vector<2x32xf32>
    %532 = arith.divf %530, %531 : vector<2x32xf32>
    %533 = vector.extract_strided_slice %514 {offsets = [0, 64], sizes = [2, 32], strides = [1, 1]} : vector<2x96xf32> to vector<2x32xf32>
    %534 = vector.extract_strided_slice %516 {offsets = [0, 64], sizes = [2, 32], strides = [1, 1]} : vector<2x96xf32> to vector<2x32xf32>
    %c0_258 = arith.constant 0 : index
    %c0_259 = arith.constant 0 : index
    %535 = vector.load %arg5[%c0_258, %c0_259] : memref<1x32xf32, #tpu.memory_space<vmem>>, vector<1x32xf32>
    %536 = vector.broadcast %535 : vector<1x32xf32> to vector<2x32xf32>
    %537 = arith.addf %534, %536 : vector<2x32xf32>
    %538 = arith.mulf %524, %537 : vector<2x32xf32>
    %539 = arith.addf %533, %538 : vector<2x32xf32>
    %540 = math.tanh %539 : vector<2x32xf32>
    %cst_260 = arith.constant 1.000000e+00 : f32
    %541 = vector.broadcast %cst_260 : f32 to vector<2x32xf32>
    %542 = arith.subf %541, %532 : vector<2x32xf32>
    %543 = arith.mulf %542, %540 : vector<2x32xf32>
    %544 = arith.mulf %532, %509 : vector<2x32xf32>
    %545 = arith.addf %543, %544 : vector<2x32xf32>
    %c0_261 = arith.constant 0 : index
    %c0_262 = arith.constant 0 : index
    %c0_263 = arith.constant 0 : index
    %546 = vector.load %arg13[%c0_261, %c0_262, %c0_263] : memref<2x2x32xf32, #tpu.memory_space<vmem>>, vector<1x2x32xf32>
    %547 = vector.shape_cast %546 : vector<1x2x32xf32> to vector<2x32xf32>
    %548 = vector.shape_cast %545 : vector<2x32xf32> to vector<1x2x32xf32>
    tpu.vector_store %arg13[%c0_261, %c0_262, %c0_263], %548 {strides = array<i32>} : memref<2x2x32xf32, #tpu.memory_space<vmem>>, vector<1x2x32xf32>,
    %c1_264 = arith.constant 1 : index
    %c0_265 = arith.constant 0 : index
    %c0_266 = arith.constant 0 : index
    %549 = vector.load %arg13[%c1_264, %c0_265, %c0_266] : memref<2x2x32xf32, #tpu.memory_space<vmem>>, vector<1x2x32xf32>
    %550 = vector.shape_cast %549 : vector<1x2x32xf32> to vector<2x32xf32>
    %c0_267 = arith.constant 0 : index
    %c0_268 = arith.constant 0 : index
    %551 = vector.load %arg6[%c0_267, %c0_268] : memref<32x96xf32, #tpu.memory_space<vmem>>, vector<32x96xf32>
    %cst_269 = arith.constant dense<0.000000e+00> : vector<2x96xf32>
    %552 = tpu.matmul %545, %551, %cst_269 {dimension_numbers = #tpu.dot_dimension_numbers<[1], [0], [0], [1], [0, 0, 1, 1], [], []>} : vector<2x32xf32>, vector<32x96xf32>, vector<2x96xf32> -> vector<2x96xf32>
    %c0_270 = arith.constant 0 : index
    %c0_271 = arith.constant 0 : index
    %553 = vector.load %arg8[%c0_270, %c0_271] : memref<1x96xf32, #tpu.memory_space<vmem>>, vector<1x96xf32>
    %554 = vector.broadcast %553 : vector<1x96xf32> to vector<2x96xf32>
    %555 = arith.addf %552, %554 : vector<2x96xf32>
    %c0_272 = arith.constant 0 : index
    %c0_273 = arith.constant 0 : index
    %556 = vector.load %arg7[%c0_272, %c0_273] : memref<32x96xf32, #tpu.memory_space<vmem>>, vector<32x96xf32>
    %cst_274 = arith.constant dense<0.000000e+00> : vector<2x96xf32>
    %557 = tpu.matmul %550, %556, %cst_274 {dimension_numbers = #tpu.dot_dimension_numbers<[1], [0], [0], [1], [0, 0, 1, 1], [], []>} : vector<2x32xf32>, vector<32x96xf32>, vector<2x96xf32> -> vector<2x96xf32>
    %558 = vector.extract_strided_slice %555 {offsets = [0, 0], sizes = [2, 32], strides = [1, 1]} : vector<2x96xf32> to vector<2x32xf32>
    %559 = vector.extract_strided_slice %557 {offsets = [0, 0], sizes = [2, 32], strides = [1, 1]} : vector<2x96xf32> to vector<2x32xf32>
    %560 = arith.addf %558, %559 : vector<2x32xf32>
    %561 = arith.negf %560 : vector<2x32xf32>
    %562 = math.exp %561 : vector<2x32xf32>
    %cst_275 = arith.constant 1.000000e+00 : f32
    %563 = vector.broadcast %cst_275 : f32 to vector<2x32xf32>
    %564 = arith.addf %563, %562 : vector<2x32xf32>
    %565 = arith.divf %563, %564 : vector<2x32xf32>
    %566 = vector.extract_strided_slice %555 {offsets = [0, 32], sizes = [2, 32], strides = [1, 1]} : vector<2x96xf32> to vector<2x32xf32>
    %567 = vector.extract_strided_slice %557 {offsets = [0, 32], sizes = [2, 32], strides = [1, 1]} : vector<2x96xf32> to vector<2x32xf32>
    %568 = arith.addf %566, %567 : vector<2x32xf32>
    %569 = arith.negf %568 : vector<2x32xf32>
    %570 = math.exp %569 : vector<2x32xf32>
    %cst_276 = arith.constant 1.000000e+00 : f32
    %571 = vector.broadcast %cst_276 : f32 to vector<2x32xf32>
    %572 = arith.addf %571, %570 : vector<2x32xf32>
    %573 = arith.divf %571, %572 : vector<2x32xf32>
    %574 = vector.extract_strided_slice %555 {offsets = [0, 64], sizes = [2, 32], strides = [1, 1]} : vector<2x96xf32> to vector<2x32xf32>
    %575 = vector.extract_strided_slice %557 {offsets = [0, 64], sizes = [2, 32], strides = [1, 1]} : vector<2x96xf32> to vector<2x32xf32>
    %c0_277 = arith.constant 0 : index
    %c0_278 = arith.constant 0 : index
    %576 = vector.load %arg9[%c0_277, %c0_278] : memref<1x32xf32, #tpu.memory_space<vmem>>, vector<1x32xf32>
    %577 = vector.broadcast %576 : vector<1x32xf32> to vector<2x32xf32>
    %578 = arith.addf %575, %577 : vector<2x32xf32>
    %579 = arith.mulf %565, %578 : vector<2x32xf32>
    %580 = arith.addf %574, %579 : vector<2x32xf32>
    %581 = math.tanh %580 : vector<2x32xf32>
    %cst_279 = arith.constant 1.000000e+00 : f32
    %582 = vector.broadcast %cst_279 : f32 to vector<2x32xf32>
    %583 = arith.subf %582, %573 : vector<2x32xf32>
    %584 = arith.mulf %583, %581 : vector<2x32xf32>
    %585 = arith.mulf %573, %550 : vector<2x32xf32>
    %586 = arith.addf %584, %585 : vector<2x32xf32>
    %c1_280 = arith.constant 1 : index
    %c0_281 = arith.constant 0 : index
    %c0_282 = arith.constant 0 : index
    %587 = vector.load %arg13[%c1_280, %c0_281, %c0_282] : memref<2x2x32xf32, #tpu.memory_space<vmem>>, vector<1x2x32xf32>
    %588 = vector.shape_cast %587 : vector<1x2x32xf32> to vector<2x32xf32>
    %589 = vector.shape_cast %586 : vector<2x32xf32> to vector<1x2x32xf32>
    tpu.vector_store %arg13[%c1_280, %c0_281, %c0_282], %589 {strides = array<i32>} : memref<2x2x32xf32, #tpu.memory_space<vmem>>, vector<1x2x32xf32>,
    %c7 = arith.constant 7 : index
    %c0_283 = arith.constant 0 : index
    %c0_284 = arith.constant 0 : index
    %590 = vector.load %arg1[%c7, %c0_283, %c0_284] : memref<8x2x32xf32, #tpu.memory_space<vmem>>, vector<1x2x32xf32>
    %591 = vector.shape_cast %590 : vector<1x2x32xf32> to vector<2x32xf32>
    %c0_285 = arith.constant 0 : index
    %c0_286 = arith.constant 0 : index
    %c0_287 = arith.constant 0 : index
    %592 = vector.load %arg13[%c0_285, %c0_286, %c0_287] : memref<2x2x32xf32, #tpu.memory_space<vmem>>, vector<1x2x32xf32>
    %593 = vector.shape_cast %592 : vector<1x2x32xf32> to vector<2x32xf32>
    %c0_288 = arith.constant 0 : index
    %c0_289 = arith.constant 0 : index
    %594 = vector.load %arg2[%c0_288, %c0_289] : memref<32x96xf32, #tpu.memory_space<vmem>>, vector<32x96xf32>
    %cst_290 = arith.constant dense<0.000000e+00> : vector<2x96xf32>
    %595 = tpu.matmul %591, %594, %cst_290 {dimension_numbers = #tpu.dot_dimension_numbers<[1], [0], [0], [1], [0, 0, 1, 1], [], []>} : vector<2x32xf32>, vector<32x96xf32>, vector<2x96xf32> -> vector<2x96xf32>
    %c0_291 = arith.constant 0 : index
    %c0_292 = arith.constant 0 : index
    %596 = vector.load %arg4[%c0_291, %c0_292] : memref<1x96xf32, #tpu.memory_space<vmem>>, vector<1x96xf32>
    %597 = vector.broadcast %596 : vector<1x96xf32> to vector<2x96xf32>
    %598 = arith.addf %595, %597 : vector<2x96xf32>
    %c0_293 = arith.constant 0 : index
    %c0_294 = arith.constant 0 : index
    %599 = vector.load %arg3[%c0_293, %c0_294] : memref<32x96xf32, #tpu.memory_space<vmem>>, vector<32x96xf32>
    %cst_295 = arith.constant dense<0.000000e+00> : vector<2x96xf32>
    %600 = tpu.matmul %593, %599, %cst_295 {dimension_numbers = #tpu.dot_dimension_numbers<[1], [0], [0], [1], [0, 0, 1, 1], [], []>} : vector<2x32xf32>, vector<32x96xf32>, vector<2x96xf32> -> vector<2x96xf32>
    %601 = vector.extract_strided_slice %598 {offsets = [0, 0], sizes = [2, 32], strides = [1, 1]} : vector<2x96xf32> to vector<2x32xf32>
    %602 = vector.extract_strided_slice %600 {offsets = [0, 0], sizes = [2, 32], strides = [1, 1]} : vector<2x96xf32> to vector<2x32xf32>
    %603 = arith.addf %601, %602 : vector<2x32xf32>
    %604 = arith.negf %603 : vector<2x32xf32>
    %605 = math.exp %604 : vector<2x32xf32>
    %cst_296 = arith.constant 1.000000e+00 : f32
    %606 = vector.broadcast %cst_296 : f32 to vector<2x32xf32>
    %607 = arith.addf %606, %605 : vector<2x32xf32>
    %608 = arith.divf %606, %607 : vector<2x32xf32>
    %609 = vector.extract_strided_slice %598 {offsets = [0, 32], sizes = [2, 32], strides = [1, 1]} : vector<2x96xf32> to vector<2x32xf32>
    %610 = vector.extract_strided_slice %600 {offsets = [0, 32], sizes = [2, 32], strides = [1, 1]} : vector<2x96xf32> to vector<2x32xf32>
    %611 = arith.addf %609, %610 : vector<2x32xf32>
    %612 = arith.negf %611 : vector<2x32xf32>
    %613 = math.exp %612 : vector<2x32xf32>
    %cst_297 = arith.constant 1.000000e+00 : f32
    %614 = vector.broadcast %cst_297 : f32 to vector<2x32xf32>
    %615 = arith.addf %614, %613 : vector<2x32xf32>
    %616 = arith.divf %614, %615 : vector<2x32xf32>
    %617 = vector.extract_strided_slice %598 {offsets = [0, 64], sizes = [2, 32], strides = [1, 1]} : vector<2x96xf32> to vector<2x32xf32>
    %618 = vector.extract_strided_slice %600 {offsets = [0, 64], sizes = [2, 32], strides = [1, 1]} : vector<2x96xf32> to vector<2x32xf32>
    %c0_298 = arith.constant 0 : index
    %c0_299 = arith.constant 0 : index
    %619 = vector.load %arg5[%c0_298, %c0_299] : memref<1x32xf32, #tpu.memory_space<vmem>>, vector<1x32xf32>
    %620 = vector.broadcast %619 : vector<1x32xf32> to vector<2x32xf32>
    %621 = arith.addf %618, %620 : vector<2x32xf32>
    %622 = arith.mulf %608, %621 : vector<2x32xf32>
    %623 = arith.addf %617, %622 : vector<2x32xf32>
    %624 = math.tanh %623 : vector<2x32xf32>
    %cst_300 = arith.constant 1.000000e+00 : f32
    %625 = vector.broadcast %cst_300 : f32 to vector<2x32xf32>
    %626 = arith.subf %625, %616 : vector<2x32xf32>
    %627 = arith.mulf %626, %624 : vector<2x32xf32>
    %628 = arith.mulf %616, %593 : vector<2x32xf32>
    %629 = arith.addf %627, %628 : vector<2x32xf32>
    %c0_301 = arith.constant 0 : index
    %c0_302 = arith.constant 0 : index
    %c0_303 = arith.constant 0 : index
    %630 = vector.load %arg13[%c0_301, %c0_302, %c0_303] : memref<2x2x32xf32, #tpu.memory_space<vmem>>, vector<1x2x32xf32>
    %631 = vector.shape_cast %630 : vector<1x2x32xf32> to vector<2x32xf32>
    %632 = vector.shape_cast %629 : vector<2x32xf32> to vector<1x2x32xf32>
    tpu.vector_store %arg13[%c0_301, %c0_302, %c0_303], %632 {strides = array<i32>} : memref<2x2x32xf32, #tpu.memory_space<vmem>>, vector<1x2x32xf32>,
    %c1_304 = arith.constant 1 : index
    %c0_305 = arith.constant 0 : index
    %c0_306 = arith.constant 0 : index
    %633 = vector.load %arg13[%c1_304, %c0_305, %c0_306] : memref<2x2x32xf32, #tpu.memory_space<vmem>>, vector<1x2x32xf32>
    %634 = vector.shape_cast %633 : vector<1x2x32xf32> to vector<2x32xf32>
    %c0_307 = arith.constant 0 : index
    %c0_308 = arith.constant 0 : index
    %635 = vector.load %arg6[%c0_307, %c0_308] : memref<32x96xf32, #tpu.memory_space<vmem>>, vector<32x96xf32>
    %cst_309 = arith.constant dense<0.000000e+00> : vector<2x96xf32>
    %636 = tpu.matmul %629, %635, %cst_309 {dimension_numbers = #tpu.dot_dimension_numbers<[1], [0], [0], [1], [0, 0, 1, 1], [], []>} : vector<2x32xf32>, vector<32x96xf32>, vector<2x96xf32> -> vector<2x96xf32>
    %c0_310 = arith.constant 0 : index
    %c0_311 = arith.constant 0 : index
    %637 = vector.load %arg8[%c0_310, %c0_311] : memref<1x96xf32, #tpu.memory_space<vmem>>, vector<1x96xf32>
    %638 = vector.broadcast %637 : vector<1x96xf32> to vector<2x96xf32>
    %639 = arith.addf %636, %638 : vector<2x96xf32>
    %c0_312 = arith.constant 0 : index
    %c0_313 = arith.constant 0 : index
    %640 = vector.load %arg7[%c0_312, %c0_313] : memref<32x96xf32, #tpu.memory_space<vmem>>, vector<32x96xf32>
    %cst_314 = arith.constant dense<0.000000e+00> : vector<2x96xf32>
    %641 = tpu.matmul %634, %640, %cst_314 {dimension_numbers = #tpu.dot_dimension_numbers<[1], [0], [0], [1], [0, 0, 1, 1], [], []>} : vector<2x32xf32>, vector<32x96xf32>, vector<2x96xf32> -> vector<2x96xf32>
    %642 = vector.extract_strided_slice %639 {offsets = [0, 0], sizes = [2, 32], strides = [1, 1]} : vector<2x96xf32> to vector<2x32xf32>
    %643 = vector.extract_strided_slice %641 {offsets = [0, 0], sizes = [2, 32], strides = [1, 1]} : vector<2x96xf32> to vector<2x32xf32>
    %644 = arith.addf %642, %643 : vector<2x32xf32>
    %645 = arith.negf %644 : vector<2x32xf32>
    %646 = math.exp %645 : vector<2x32xf32>
    %cst_315 = arith.constant 1.000000e+00 : f32
    %647 = vector.broadcast %cst_315 : f32 to vector<2x32xf32>
    %648 = arith.addf %647, %646 : vector<2x32xf32>
    %649 = arith.divf %647, %648 : vector<2x32xf32>
    %650 = vector.extract_strided_slice %639 {offsets = [0, 32], sizes = [2, 32], strides = [1, 1]} : vector<2x96xf32> to vector<2x32xf32>
    %651 = vector.extract_strided_slice %641 {offsets = [0, 32], sizes = [2, 32], strides = [1, 1]} : vector<2x96xf32> to vector<2x32xf32>
    %652 = arith.addf %650, %651 : vector<2x32xf32>
    %653 = arith.negf %652 : vector<2x32xf32>
    %654 = math.exp %653 : vector<2x32xf32>
    %cst_316 = arith.constant 1.000000e+00 : f32
    %655 = vector.broadcast %cst_316 : f32 to vector<2x32xf32>
    %656 = arith.addf %655, %654 : vector<2x32xf32>
    %657 = arith.divf %655, %656 : vector<2x32xf32>
    %658 = vector.extract_strided_slice %639 {offsets = [0, 64], sizes = [2, 32], strides = [1, 1]} : vector<2x96xf32> to vector<2x32xf32>
    %659 = vector.extract_strided_slice %641 {offsets = [0, 64], sizes = [2, 32], strides = [1, 1]} : vector<2x96xf32> to vector<2x32xf32>
    %c0_317 = arith.constant 0 : index
    %c0_318 = arith.constant 0 : index
    %660 = vector.load %arg9[%c0_317, %c0_318] : memref<1x32xf32, #tpu.memory_space<vmem>>, vector<1x32xf32>
    %661 = vector.broadcast %660 : vector<1x32xf32> to vector<2x32xf32>
    %662 = arith.addf %659, %661 : vector<2x32xf32>
    %663 = arith.mulf %649, %662 : vector<2x32xf32>
    %664 = arith.addf %658, %663 : vector<2x32xf32>
    %665 = math.tanh %664 : vector<2x32xf32>
    %cst_319 = arith.constant 1.000000e+00 : f32
    %666 = vector.broadcast %cst_319 : f32 to vector<2x32xf32>
    %667 = arith.subf %666, %657 : vector<2x32xf32>
    %668 = arith.mulf %667, %665 : vector<2x32xf32>
    %669 = arith.mulf %657, %634 : vector<2x32xf32>
    %670 = arith.addf %668, %669 : vector<2x32xf32>
    %c1_320 = arith.constant 1 : index
    %c0_321 = arith.constant 0 : index
    %c0_322 = arith.constant 0 : index
    %671 = vector.load %arg13[%c1_320, %c0_321, %c0_322] : memref<2x2x32xf32, #tpu.memory_space<vmem>>, vector<1x2x32xf32>
    %672 = vector.shape_cast %671 : vector<1x2x32xf32> to vector<2x32xf32>
    %673 = vector.shape_cast %670 : vector<2x32xf32> to vector<1x2x32xf32>
    tpu.vector_store %arg13[%c1_320, %c0_321, %c0_322], %673 {strides = array<i32>} : memref<2x2x32xf32, #tpu.memory_space<vmem>>, vector<1x2x32xf32>,
    %c1_323 = arith.constant 1 : index
    %c0_324 = arith.constant 0 : index
    %c0_325 = arith.constant 0 : index
    %674 = vector.load %arg13[%c1_323, %c0_324, %c0_325] : memref<2x2x32xf32, #tpu.memory_space<vmem>>, vector<1x2x32xf32>
    %675 = vector.shape_cast %674 : vector<1x2x32xf32> to vector<2x32xf32>
    %c0_326 = arith.constant 0 : index
    %c0_327 = arith.constant 0 : index
    %676 = vector.load %arg10[%c0_326, %c0_327] : memref<32x64xf32, #tpu.memory_space<vmem>>, vector<32x64xf32>
    %cst_328 = arith.constant dense<0.000000e+00> : vector<2x64xf32>
    %677 = tpu.matmul %675, %676, %cst_328 {dimension_numbers = #tpu.dot_dimension_numbers<[1], [0], [0], [1], [0, 0, 1, 1], [], []>} : vector<2x32xf32>, vector<32x64xf32>, vector<2x64xf32> -> vector<2x64xf32>
    %c0_329 = arith.constant 0 : index
    %c0_330 = arith.constant 0 : index
    %678 = vector.load %arg11[%c0_329, %c0_330] : memref<1x64xf32, #tpu.memory_space<vmem>>, vector<1x64xf32>
    %679 = vector.broadcast %678 : vector<1x64xf32> to vector<2x64xf32>
    %680 = arith.addf %677, %679 : vector<2x64xf32>
    %c0_331 = arith.constant 0 : index
    %c0_332 = arith.constant 0 : index
    %c0_333 = arith.constant 0 : index
    %681 = vector.load %arg12[%c0_331, %c0_332, %c0_333] : memref<180x2x64xf32, #tpu.memory_space<vmem>>, vector<1x2x64xf32>
    %682 = vector.shape_cast %681 : vector<1x2x64xf32> to vector<2x64xf32>
    %683 = vector.shape_cast %680 : vector<2x64xf32> to vector<1x2x64xf32>
    tpu.vector_store %arg12[%c0_331, %c0_332, %c0_333], %683 {strides = array<i32>} : memref<180x2x64xf32, #tpu.memory_space<vmem>>, vector<1x2x64xf32>,
    %cst_334 = arith.constant dense<0xFF800000> : vector<2xf32>
    %684 = vector.multi_reduction <maximumf>, %675, %cst_334 [1] : vector<2x32xf32> to vector<2xf32>
    %685 = vector.shape_cast %684 : vector<2xf32> to vector<2x1xf32>
    %686 = tpu.iota {dimensions = array<i32: 1>} : vector<2x32xi32>
    %687 = vector.broadcast %685 : vector<2x1xf32> to vector<2x32xf32>
    %688 = arith.cmpf oeq, %675, %687 : vector<2x32xf32>
    %c32_i32 = arith.constant 32 : i32
    %689 = vector.broadcast %c32_i32 : i32 to vector<2x32xi32>
    %690 = arith.select %688, %686, %689 : vector<2x32xi1>, vector<2x32xi32>
    %cst_335 = arith.constant dense<2147483647> : vector<2xi32>
    %691 = vector.multi_reduction <minsi>, %690, %cst_335 [1] : vector<2x32xi32> to vector<2xi32>
    %692 = vector.shape_cast %691 : vector<2xi32> to vector<2x1xi32>
    %c0_336 = arith.constant 0 : index
    %c0_337 = arith.constant 0 : index
    %693 = vector.load %arg0[%c0_336, %c0_337] : memref<64x32xf32, #tpu.memory_space<vmem>>, vector<64x32xf32>
    %694 = tpu.iota {dimensions = array<i32: 1>} : vector<2x64xi32>
    %695 = vector.broadcast %692 : vector<2x1xi32> to vector<2x64xi32>
    %696 = arith.cmpi eq, %694, %695 : vector<2x64xi32>
    %697 = arith.extui %696 : vector<2x64xi1> to vector<2x64xi32>
    %698 = arith.sitofp %697 : vector<2x64xi32> to vector<2x64xf32>
    %cst_338 = arith.constant dense<0.000000e+00> : vector<2x32xf32>
    %699 = tpu.matmul %698, %693, %cst_338 {dimension_numbers = #tpu.dot_dimension_numbers<[1], [0], [0], [1], [0, 0, 1, 1], [], []>} : vector<2x64xf32>, vector<64x32xf32>, vector<2x32xf32> -> vector<2x32xf32>
    %c0_339 = arith.constant 0 : index
    %c0_340 = arith.constant 0 : index
    %700 = vector.load %arg14[%c0_339, %c0_340] : memref<2x32xf32, #tpu.memory_space<vmem>>, vector<2x32xf32>
    tpu.vector_store %arg14[%c0_339, %c0_340], %699 {strides = array<i32>} : memref<2x32xf32, #tpu.memory_space<vmem>>, vector<2x32xf32>,
    %c0_i32 = arith.constant 0 : i32
    %c179_i32 = arith.constant 179 : i32
    %701 = arith.addi %c0_i32, %c179_i32 : i32
    %c1_i32 = arith.constant 1 : i32
    scf.for %arg15 = %c0_i32 to %701 step %c1_i32  : i32 {
      %c1_i32_342 = arith.constant 1 : i32
      %702 = arith.muli %arg15, %c1_i32_342 : i32
      %c1_i32_343 = arith.constant 1 : i32
      %703 = arith.addi %c1_i32_343, %702 : i32
      %c0_344 = arith.constant 0 : index
      %c0_345 = arith.constant 0 : index
      %704 = vector.load %arg14[%c0_344, %c0_345] : memref<2x32xf32, #tpu.memory_space<vmem>>, vector<2x32xf32>
      %c0_346 = arith.constant 0 : index
      %c0_347 = arith.constant 0 : index
      %c0_348 = arith.constant 0 : index
      %705 = vector.load %arg13[%c0_346, %c0_347, %c0_348] : memref<2x2x32xf32, #tpu.memory_space<vmem>>, vector<1x2x32xf32>
      %706 = vector.shape_cast %705 : vector<1x2x32xf32> to vector<2x32xf32>
      %c0_349 = arith.constant 0 : index
      %c0_350 = arith.constant 0 : index
      %707 = vector.load %arg2[%c0_349, %c0_350] : memref<32x96xf32, #tpu.memory_space<vmem>>, vector<32x96xf32>
      %cst_351 = arith.constant dense<0.000000e+00> : vector<2x96xf32>
      %708 = tpu.matmul %704, %707, %cst_351 {dimension_numbers = #tpu.dot_dimension_numbers<[1], [0], [0], [1], [0, 0, 1, 1], [], []>} : vector<2x32xf32>, vector<32x96xf32>, vector<2x96xf32> -> vector<2x96xf32>
      %c0_352 = arith.constant 0 : index
      %c0_353 = arith.constant 0 : index
      %709 = vector.load %arg4[%c0_352, %c0_353] : memref<1x96xf32, #tpu.memory_space<vmem>>, vector<1x96xf32>
      %710 = vector.broadcast %709 : vector<1x96xf32> to vector<2x96xf32>
      %711 = arith.addf %708, %710 : vector<2x96xf32>
      %c0_354 = arith.constant 0 : index
      %c0_355 = arith.constant 0 : index
      %712 = vector.load %arg3[%c0_354, %c0_355] : memref<32x96xf32, #tpu.memory_space<vmem>>, vector<32x96xf32>
      %cst_356 = arith.constant dense<0.000000e+00> : vector<2x96xf32>
      %713 = tpu.matmul %706, %712, %cst_356 {dimension_numbers = #tpu.dot_dimension_numbers<[1], [0], [0], [1], [0, 0, 1, 1], [], []>} : vector<2x32xf32>, vector<32x96xf32>, vector<2x96xf32> -> vector<2x96xf32>
      %714 = vector.extract_strided_slice %711 {offsets = [0, 0], sizes = [2, 32], strides = [1, 1]} : vector<2x96xf32> to vector<2x32xf32>
      %715 = vector.extract_strided_slice %713 {offsets = [0, 0], sizes = [2, 32], strides = [1, 1]} : vector<2x96xf32> to vector<2x32xf32>
      %716 = arith.addf %714, %715 : vector<2x32xf32>
      %717 = arith.negf %716 : vector<2x32xf32>
      %718 = math.exp %717 : vector<2x32xf32>
      %cst_357 = arith.constant 1.000000e+00 : f32
      %719 = vector.broadcast %cst_357 : f32 to vector<2x32xf32>
      %720 = arith.addf %719, %718 : vector<2x32xf32>
      %721 = arith.divf %719, %720 : vector<2x32xf32>
      %722 = vector.extract_strided_slice %711 {offsets = [0, 32], sizes = [2, 32], strides = [1, 1]} : vector<2x96xf32> to vector<2x32xf32>
      %723 = vector.extract_strided_slice %713 {offsets = [0, 32], sizes = [2, 32], strides = [1, 1]} : vector<2x96xf32> to vector<2x32xf32>
      %724 = arith.addf %722, %723 : vector<2x32xf32>
      %725 = arith.negf %724 : vector<2x32xf32>
      %726 = math.exp %725 : vector<2x32xf32>
      %cst_358 = arith.constant 1.000000e+00 : f32
      %727 = vector.broadcast %cst_358 : f32 to vector<2x32xf32>
      %728 = arith.addf %727, %726 : vector<2x32xf32>
      %729 = arith.divf %727, %728 : vector<2x32xf32>
      %730 = vector.extract_strided_slice %711 {offsets = [0, 64], sizes = [2, 32], strides = [1, 1]} : vector<2x96xf32> to vector<2x32xf32>
      %731 = vector.extract_strided_slice %713 {offsets = [0, 64], sizes = [2, 32], strides = [1, 1]} : vector<2x96xf32> to vector<2x32xf32>
      %c0_359 = arith.constant 0 : index
      %c0_360 = arith.constant 0 : index
      %732 = vector.load %arg5[%c0_359, %c0_360] : memref<1x32xf32, #tpu.memory_space<vmem>>, vector<1x32xf32>
      %733 = vector.broadcast %732 : vector<1x32xf32> to vector<2x32xf32>
      %734 = arith.addf %731, %733 : vector<2x32xf32>
      %735 = arith.mulf %721, %734 : vector<2x32xf32>
      %736 = arith.addf %730, %735 : vector<2x32xf32>
      %737 = math.tanh %736 : vector<2x32xf32>
      %cst_361 = arith.constant 1.000000e+00 : f32
      %738 = vector.broadcast %cst_361 : f32 to vector<2x32xf32>
      %739 = arith.subf %738, %729 : vector<2x32xf32>
      %740 = arith.mulf %739, %737 : vector<2x32xf32>
      %741 = arith.mulf %729, %706 : vector<2x32xf32>
      %742 = arith.addf %740, %741 : vector<2x32xf32>
      %c0_362 = arith.constant 0 : index
      %c0_363 = arith.constant 0 : index
      %c0_364 = arith.constant 0 : index
      %743 = vector.load %arg13[%c0_362, %c0_363, %c0_364] : memref<2x2x32xf32, #tpu.memory_space<vmem>>, vector<1x2x32xf32>
      %744 = vector.shape_cast %743 : vector<1x2x32xf32> to vector<2x32xf32>
      %745 = vector.shape_cast %742 : vector<2x32xf32> to vector<1x2x32xf32>
      tpu.vector_store %arg13[%c0_362, %c0_363, %c0_364], %745 {strides = array<i32>} : memref<2x2x32xf32, #tpu.memory_space<vmem>>, vector<1x2x32xf32>,
      %c1_365 = arith.constant 1 : index
      %c0_366 = arith.constant 0 : index
      %c0_367 = arith.constant 0 : index
      %746 = vector.load %arg13[%c1_365, %c0_366, %c0_367] : memref<2x2x32xf32, #tpu.memory_space<vmem>>, vector<1x2x32xf32>
      %747 = vector.shape_cast %746 : vector<1x2x32xf32> to vector<2x32xf32>
      %c0_368 = arith.constant 0 : index
      %c0_369 = arith.constant 0 : index
      %748 = vector.load %arg6[%c0_368, %c0_369] : memref<32x96xf32, #tpu.memory_space<vmem>>, vector<32x96xf32>
      %cst_370 = arith.constant dense<0.000000e+00> : vector<2x96xf32>
      %749 = tpu.matmul %742, %748, %cst_370 {dimension_numbers = #tpu.dot_dimension_numbers<[1], [0], [0], [1], [0, 0, 1, 1], [], []>} : vector<2x32xf32>, vector<32x96xf32>, vector<2x96xf32> -> vector<2x96xf32>
      %c0_371 = arith.constant 0 : index
      %c0_372 = arith.constant 0 : index
      %750 = vector.load %arg8[%c0_371, %c0_372] : memref<1x96xf32, #tpu.memory_space<vmem>>, vector<1x96xf32>
      %751 = vector.broadcast %750 : vector<1x96xf32> to vector<2x96xf32>
      %752 = arith.addf %749, %751 : vector<2x96xf32>
      %c0_373 = arith.constant 0 : index
      %c0_374 = arith.constant 0 : index
      %753 = vector.load %arg7[%c0_373, %c0_374] : memref<32x96xf32, #tpu.memory_space<vmem>>, vector<32x96xf32>
      %cst_375 = arith.constant dense<0.000000e+00> : vector<2x96xf32>
      %754 = tpu.matmul %747, %753, %cst_375 {dimension_numbers = #tpu.dot_dimension_numbers<[1], [0], [0], [1], [0, 0, 1, 1], [], []>} : vector<2x32xf32>, vector<32x96xf32>, vector<2x96xf32> -> vector<2x96xf32>
      %755 = vector.extract_strided_slice %752 {offsets = [0, 0], sizes = [2, 32], strides = [1, 1]} : vector<2x96xf32> to vector<2x32xf32>
      %756 = vector.extract_strided_slice %754 {offsets = [0, 0], sizes = [2, 32], strides = [1, 1]} : vector<2x96xf32> to vector<2x32xf32>
      %757 = arith.addf %755, %756 : vector<2x32xf32>
      %758 = arith.negf %757 : vector<2x32xf32>
      %759 = math.exp %758 : vector<2x32xf32>
      %cst_376 = arith.constant 1.000000e+00 : f32
      %760 = vector.broadcast %cst_376 : f32 to vector<2x32xf32>
      %761 = arith.addf %760, %759 : vector<2x32xf32>
      %762 = arith.divf %760, %761 : vector<2x32xf32>
      %763 = vector.extract_strided_slice %752 {offsets = [0, 32], sizes = [2, 32], strides = [1, 1]} : vector<2x96xf32> to vector<2x32xf32>
      %764 = vector.extract_strided_slice %754 {offsets = [0, 32], sizes = [2, 32], strides = [1, 1]} : vector<2x96xf32> to vector<2x32xf32>
      %765 = arith.addf %763, %764 : vector<2x32xf32>
      %766 = arith.negf %765 : vector<2x32xf32>
      %767 = math.exp %766 : vector<2x32xf32>
      %cst_377 = arith.constant 1.000000e+00 : f32
      %768 = vector.broadcast %cst_377 : f32 to vector<2x32xf32>
      %769 = arith.addf %768, %767 : vector<2x32xf32>
      %770 = arith.divf %768, %769 : vector<2x32xf32>
      %771 = vector.extract_strided_slice %752 {offsets = [0, 64], sizes = [2, 32], strides = [1, 1]} : vector<2x96xf32> to vector<2x32xf32>
      %772 = vector.extract_strided_slice %754 {offsets = [0, 64], sizes = [2, 32], strides = [1, 1]} : vector<2x96xf32> to vector<2x32xf32>
      %c0_378 = arith.constant 0 : index
      %c0_379 = arith.constant 0 : index
      %773 = vector.load %arg9[%c0_378, %c0_379] : memref<1x32xf32, #tpu.memory_space<vmem>>, vector<1x32xf32>
      %774 = vector.broadcast %773 : vector<1x32xf32> to vector<2x32xf32>
      %775 = arith.addf %772, %774 : vector<2x32xf32>
      %776 = arith.mulf %762, %775 : vector<2x32xf32>
      %777 = arith.addf %771, %776 : vector<2x32xf32>
      %778 = math.tanh %777 : vector<2x32xf32>
      %cst_380 = arith.constant 1.000000e+00 : f32
      %779 = vector.broadcast %cst_380 : f32 to vector<2x32xf32>
      %780 = arith.subf %779, %770 : vector<2x32xf32>
      %781 = arith.mulf %780, %778 : vector<2x32xf32>
      %782 = arith.mulf %770, %747 : vector<2x32xf32>
      %783 = arith.addf %781, %782 : vector<2x32xf32>
      %c1_381 = arith.constant 1 : index
      %c0_382 = arith.constant 0 : index
      %c0_383 = arith.constant 0 : index
      %784 = vector.load %arg13[%c1_381, %c0_382, %c0_383] : memref<2x2x32xf32, #tpu.memory_space<vmem>>, vector<1x2x32xf32>
      %785 = vector.shape_cast %784 : vector<1x2x32xf32> to vector<2x32xf32>
      %786 = vector.shape_cast %783 : vector<2x32xf32> to vector<1x2x32xf32>
      tpu.vector_store %arg13[%c1_381, %c0_382, %c0_383], %786 {strides = array<i32>} : memref<2x2x32xf32, #tpu.memory_space<vmem>>, vector<1x2x32xf32>,
      %c0_384 = arith.constant 0 : index
      %c0_385 = arith.constant 0 : index
      %787 = vector.load %arg10[%c0_384, %c0_385] : memref<32x64xf32, #tpu.memory_space<vmem>>, vector<32x64xf32>
      %cst_386 = arith.constant dense<0.000000e+00> : vector<2x64xf32>
      %788 = tpu.matmul %783, %787, %cst_386 {dimension_numbers = #tpu.dot_dimension_numbers<[1], [0], [0], [1], [0, 0, 1, 1], [], []>} : vector<2x32xf32>, vector<32x64xf32>, vector<2x64xf32> -> vector<2x64xf32>
      %c0_387 = arith.constant 0 : index
      %c0_388 = arith.constant 0 : index
      %789 = vector.load %arg11[%c0_387, %c0_388] : memref<1x64xf32, #tpu.memory_space<vmem>>, vector<1x64xf32>
      %790 = vector.broadcast %789 : vector<1x64xf32> to vector<2x64xf32>
      %791 = arith.addf %788, %790 : vector<2x64xf32>
      %792 = arith.index_cast %703 : i32 to index
      %c0_389 = arith.constant 0 : index
      %c0_390 = arith.constant 0 : index
      %793 = vector.load %arg12[%792, %c0_389, %c0_390] : memref<180x2x64xf32, #tpu.memory_space<vmem>>, vector<1x2x64xf32>
      %794 = vector.shape_cast %793 : vector<1x2x64xf32> to vector<2x64xf32>
      %795 = vector.shape_cast %791 : vector<2x64xf32> to vector<1x2x64xf32>
      tpu.vector_store %arg12[%792, %c0_389, %c0_390], %795 {strides = array<i32>} : memref<180x2x64xf32, #tpu.memory_space<vmem>>, vector<1x2x64xf32>,
      %cst_391 = arith.constant dense<0xFF800000> : vector<2xf32>
      %796 = vector.multi_reduction <maximumf>, %791, %cst_391 [1] : vector<2x64xf32> to vector<2xf32>
      %797 = vector.shape_cast %796 : vector<2xf32> to vector<2x1xf32>
      %798 = tpu.iota {dimensions = array<i32: 1>} : vector<2x64xi32>
      %799 = vector.broadcast %797 : vector<2x1xf32> to vector<2x64xf32>
      %800 = arith.cmpf oeq, %791, %799 : vector<2x64xf32>
      %c64_i32 = arith.constant 64 : i32
      %801 = vector.broadcast %c64_i32 : i32 to vector<2x64xi32>
      %802 = arith.select %800, %798, %801 : vector<2x64xi1>, vector<2x64xi32>
      %cst_392 = arith.constant dense<2147483647> : vector<2xi32>
      %803 = vector.multi_reduction <minsi>, %802, %cst_392 [1] : vector<2x64xi32> to vector<2xi32>
      %804 = vector.shape_cast %803 : vector<2xi32> to vector<2x1xi32>
      %c0_393 = arith.constant 0 : index
      %c0_394 = arith.constant 0 : index
      %805 = vector.load %arg0[%c0_393, %c0_394] : memref<64x32xf32, #tpu.memory_space<vmem>>, vector<64x32xf32>
      %806 = tpu.iota {dimensions = array<i32: 1>} : vector<2x64xi32>
      %807 = vector.broadcast %804 : vector<2x1xi32> to vector<2x64xi32>
      %808 = arith.cmpi eq, %806, %807 : vector<2x64xi32>
      %809 = arith.extui %808 : vector<2x64xi1> to vector<2x64xi32>
      %810 = arith.sitofp %809 : vector<2x64xi32> to vector<2x64xf32>
      %cst_395 = arith.constant dense<0.000000e+00> : vector<2x32xf32>
      %811 = tpu.matmul %810, %805, %cst_395 {dimension_numbers = #tpu.dot_dimension_numbers<[1], [0], [0], [1], [0, 0, 1, 1], [], []>} : vector<2x64xf32>, vector<64x32xf32>, vector<2x32xf32> -> vector<2x32xf32>
      %c0_396 = arith.constant 0 : index
      %c0_397 = arith.constant 0 : index
      %812 = vector.load %arg14[%c0_396, %c0_397] : memref<2x32xf32, #tpu.memory_space<vmem>>, vector<2x32xf32>
      tpu.vector_store %arg14[%c0_396, %c0_397], %811 {strides = array<i32>} : memref<2x32xf32, #tpu.memory_space<vmem>>, vector<2x32xf32>,
    }
    %c179_i32_341 = arith.constant 179 : i32
    return
  }
}

</mosaic_0001>

<bundles_post_ra>
// kernel: model_forward.1
= control target key start
LH: loop header
LB: loop body
LE: loop exit
PB: predicated region body
PF: predicated region fallthrough
CT: control target
= control target key end

     0   :  { %vm41_vm0 = vcmask 254976   ;;  %v2525_v3 = vmov 0.0   ;;  %vm54_vm1 = vcmask 261120   ;;  %s2526_s23 = smov 64   ;;  %s2527_s24 = smov 32   ;;  %s3324_s3 = inlined_call_operand.vmem [shape: f32[32,96], index: 3, kind: input, shape index: {}]   ;;  %s3325_s2 = inlined_call_operand.vmem [shape: f32[32,96], index: 2, kind: input, shape index: {}]   ;;  %s3326_s5 = inlined_call_operand.vmem [shape: f32[1,32], index: 5, kind: input, shape index: {}]   ;;  %s3327_s1 = inlined_call_operand.vmem [shape: f32[8,2,32], index: 1, kind: input, shape index: {}]   ;;  %s3328_s4 = inlined_call_operand.vmem [shape: f32[1,96], index: 4, kind: input, shape index: {}]   ;;  %s3329_s9 = inlined_call_operand.vmem [shape: f32[1,32], index: 9, kind: input, shape index: {}]   ;;  %s3330_s7 = inlined_call_operand.vmem [shape: f32[32,96], index: 7, kind: input, shape index: {}]   ;;  %s3331_s6 = inlined_call_operand.vmem [shape: f32[32,96], index: 6, kind: input, shape index: {}]   ;;  %s3332_s8 = inlined_call_operand.vmem [shape: f32[1,96], index: 8, kind: input, shape index: {}]   ;;  %s3333_s10 = inlined_call_operand.vmem [shape: f32[32,64], index: 10, kind: input, shape index: {}]   ;;  %s3334_s11 = inlined_call_operand.vmem [shape: f32[1,64], index: 11, kind: input, shape index: {}]   ;;  %s3335_s12 = inlined_call_operand.vmem [shape: f32[180,2,64], index: 12, kind: output, shape index: {}]   ;;  %s3336_s0 = inlined_call_operand.vmem [shape: f32[64,32], index: 0, kind: input, shape index: {}]  }
   0x1   :  { %v2601_v0 = vld [vmem:[%s3324_s3 + $0x18] sm:$0xff]  ;;  %v2606_v1 = vld [vmem:[%s3324_s3 + $0x10] sm:$0xff]  ;;  %42 = vst.msk [vmem:[#allocation2] sm:$0x3] %vm41_vm0, %v2525_v3  ;;  %v2620_v4 = vld [vmem:[%s3324_s3 + $0x8] sm:$0xff]  ;;  %s2528_s27 = smov 96  }
   0x2   :  { %v2611_v2 = vld [vmem:[%s3325_s2 + $0x18] sm:$0xff]  ;;  %97 = vmatpush.msra.mxu2 %v2601_v0  ;;  %v2625_v5 = vld [vmem:[%s3325_s2 + $0x10] sm:$0xff]  ;;  %43 = vst.msk [vmem:[#allocation2 + $0x2] sm:$0x3] %vm41_vm0, %v2525_v3  ;;  %v2632_v6 = vld [vmem:[%s3324_s3] sm:$0xff]  ;;  %325 = vmatpush.msra.mxu1 %v2601_v0  ;;  %s3187_s17 = smov 0  }
   0x3   :  { %70 = vmatpush.msra.mxu0 %v2611_v2  ;;  %v2637_v7 = vld [vmem:[%s3325_s2 + $0x8] sm:$0xff]  ;;  %v2642_v8 = vld [vmem:[%s3325_s2] sm:$0xff]  ;;  %v2685_v37 = vld [vmem:[%s3330_s7 + $0x18] sm:$0xff] }
   0x4   :  { %98 = vmatpush.msra.mxu2 %v2606_v1  ;;  %v2371_v9 = vld [vmem:[%s3326_s5] ss:$0 sm:$0xff]  ;;  %326 = vmatpush.msra.mxu1 %v2606_v1  ;;  %v2690_v38 = vld [vmem:[%s3330_s7 + $0x10] sm:$0xff]  ;;  %v2699_v40 = vld [vmem:[%s3330_s7 + $0x8] sm:$0xff] }
   0x5   :  { %71 = vmatpush.msra.mxu0 %v2625_v5  ;;  %v44_v10 = vld [vmem:[%s3327_s1] sm:$0x3]  ;;  %128 = vrot.lane.b32.xlu0 %v2371_v9, %s2526_s23  ;;  %v2704_v41 = vld [vmem:[%s3331_s6 + $0x18] sm:$0xff]  ;;  %v2711_v42 = vld [vmem:[%s3331_s6 + $0x10] sm:$0xff] }
   0x6   :  { %99 = vmatpush.msra.mxu2 %v2620_v4  ;;  %327 = vmatpush.msra.mxu1 %v2620_v4  ;;  %v2372_v15 = vld [vmem:[%s3328_s4] ss:$0 sm:$0xff]  ;;  %v2725_v45 = vld [vmem:[%s3331_s6 + $0x8] sm:$0xff]  ;;  %v2292_v53 = vld [vmem:[%s3327_s1 + $0x2] sm:$0x3] }
   0x7   :  { %72 = vmatpush.msra.mxu0 %v2637_v7  ;;  %210 = vmatpush.msra.mxu3 %v2685_v37  ;;  %v2373_v39 = vld [vmem:[%s3329_s9] ss:$0 sm:$0xff] }
   0x8   :  { %100 = vmatpush.msra.mxu2 %v2632_v6  ;;  %v45_v11 = vld [vmem:[#allocation2] sm:$0x3]  ;;  %328 = vmatpush.msra.mxu1 %v2632_v6 }
   0x9   :  { %73 = vmatpush.msra.mxu0 %v2642_v8  ;;  %2287 = vmatmul.msk.f32.vlgmr.msra.gmra.mxu2 %vm54_vm1, %v45_v11  ;;  %v2716_v43 = vld [vmem:[%s3330_s7] sm:$0xff] }
   0xa   :  { %2286 = vmatmul.msk.f32.vlgmr.msra.gmra.mxu0 %vm54_vm1, %v44_v10  ;;  %149 = vrot.lane.b32.xlu2 %v45_v11, %s2527_s24  ;;  %v2720_v44 = vld [vmem:[#allocation2 + $0x2] sm:$0x3]  ;;  %v2374_v54 = vld [vmem:[%s3326_s5] ss:$0 sm:$0xff] }
   0xb   :  { %298 = vmatpush.msrb.mxu0 %v2611_v2  ;;  %552 = vmatpush.msrb.mxu1 %v2601_v0  ;;  %v2732_v46 = vld [vmem:[%s3331_s6] sm:$0xff] }
   0xc   :  { %211 = vmatpush.msra.mxu3 %v2690_v38  ;;  %183 = vmatpush.msrb.mxu2 %v2704_v41  ;;  %v2375_v60 = vld [vmem:[%s3332_s8] ss:$0 sm:$0xff] }
   0xd   :  { %299 = vmatpush.msrb.mxu0 %v2625_v5  ;;  %553 = vmatpush.msrb.mxu1 %v2606_v1 }
   0xe   :  { %212 = vmatpush.msra.mxu3 %v2699_v40  ;;  %184 = vmatpush.msrb.mxu2 %v2711_v42 }
   0xf   :  { %300 = vmatpush.msrb.mxu0 %v2637_v7  ;;  %554 = vmatpush.msrb.mxu1 %v2620_v4 }
  0x10   :  { %213 = vmatpush.msra.mxu3 %v2716_v43  ;;  %185 = vmatpush.msrb.mxu2 %v2725_v45 }
  0x11   :  { %301 = vmatpush.msrb.mxu0 %v2642_v8  ;;  %555 = vmatpush.msrb.mxu1 %v2632_v6 }
  0x12   :  { %2290 = vmatmul.msk.f32.vlgmr.msra.gmra.mxu3 %vm54_vm1, %v2720_v44  ;;  %186 = vmatpush.msrb.mxu2 %v2732_v46 }
  0x13   :  { %525 = vmatpush.msra.mxu0 %v2611_v2  ;;  %437 = vmatpush.msrb.mxu3 %v2685_v37 }
  0x14   :  { %410 = vmatpush.msra.mxu2 %v2704_v41  ;;  %2293 = vmatmul.msk.f32.vlgmr.msrb.gmra.mxu0 %vm54_vm1, %v2292_v53 }
  0x15   :  { %526 = vmatpush.msra.mxu0 %v2625_v5  ;;  %438 = vmatpush.msrb.mxu3 %v2690_v38 }
  0x16   :  { %411 = vmatpush.msra.mxu2 %v2711_v42 }
  0x17   :  { %527 = vmatpush.msra.mxu0 %v2637_v7  ;;  %439 = vmatpush.msrb.mxu3 %v2699_v40 }
  0x18   :  { %412 = vmatpush.msra.mxu2 %v2725_v45 }
  0x19   :  { %528 = vmatpush.msra.mxu0 %v2642_v8  ;;  %440 = vmatpush.msrb.mxu3 %v2716_v43 }
  0x1a   :  { %413 = vmatpush.msra.mxu2 %v2732_v46 }
  0x1b   :  { %664 = vmatpush.msra.mxu3 %v2685_v37  ;;  %752 = vmatpush.msrb.mxu0 %v2611_v2 }
  0x1d   :  { %665 = vmatpush.msra.mxu3 %v2690_v38  ;;  %753 = vmatpush.msrb.mxu0 %v2625_v5 }
  0x1f   :  { %666 = vmatpush.msra.mxu3 %v2699_v40  ;;  %754 = vmatpush.msrb.mxu0 %v2637_v7 }
  0x21   :  { %667 = vmatpush.msra.mxu3 %v2716_v43  ;;  %755 = vmatpush.msrb.mxu0 %v2642_v8 }
  0x64   :  { %v150_v47 = vpop.permute.xlu2 %149 }
  0x77   :  { %v129_v12 = vpop.permute.xlu0 %128 }
  0x87   :  { %v75_v16 = vpop.f32.mrf.mxu0 }
  0x88   :  { %v76_v17 = vadd.f32 %v2372_v15, %v75_v16 }
  0x8c   :  { %v102_v13 = vpop.f32.mrf.mxu2 }
  0x8d   :  { %v131_v14 = vadd.f32 %v129_v12, %v102_v13  ;;  %v105_v18 = vadd.f32 %v102_v13, %v76_v17 }
  0x8f   :  { %133 = vrot.lane.b32.xlu0 %v131_v14, %s2526_s23  ;;  %v2288_v19 = vmul.f32 -1.442695, %v105_v18 }
  0x91   :  { %2404 = vpow2.f32 %v2288_v19 }
  0x95   :  { %v215_v58 = vpop.f32.mrf.mxu3 }
  0x97   :  { %v2405_v20 = vpop.eup %2404  ;;  %241 = vrot.lane.b32.xlu0 %v2373_v39, %s2526_s23 }
  0x98   :  { %v109_v21 = vadd.f32 1.0, %v2405_v20 }
  0x9a   :  { %2406 = vrcp.f32 %v109_v21  ;;  %v121_v27 = vand.u32 2147483648, %v109_v21  ;;  %vm115_vm3 = vweird.f32 %v109_v21  ;;  %v119_v28 = vand.u32 2147483647, %v109_v21 }
  0x9c   :  { %v122_v30 = vor.u32 1.1754944e-38, %v121_v27  ;;  %vm120_vm5 = vcmp.eq.f32.partialorder %v119_v28, 8.507059e+37  ;;  %v2376_v27 = vld [vmem:[%s3328_s4] ss:$0 sm:$0xff]  ;;  %v303_v28 = vpop.f32.mrf.mxu0 }
  0xa0   :  { %v2407_v22 = vpop.eup %2406 }
  0xa1   :  { %v111_v23 = vmul.f32 %v2407_v22, %v109_v21  ;;  %vm116_vm2 = vweird.f32 %v2407_v22 }
  0xa2   :  { %vm117_vm4 = vmor %vm115_vm3, %vm116_vm2 }
  0xa3   :  { %v112_v24 = vsub.f32 1.0, %v111_v23 }
  0xa5   :  { %v113_v25 = vmul.f32 %v2407_v22, %v112_v24 }
  0xa7   :  { %v114_v26 = vadd.f32 %v2407_v22, %v113_v25 }
  0xa9   :  { %v118_v29 = vsel %vm117_vm4, %v2407_v22, %v114_v26 }
  0xaa   :  { %v123_v31 = vsel %vm120_vm5, %v122_v30, %v118_v29  ;;  %v304_v29 = vadd.f32 %v2376_v27, %v303_v28 }
  0xab   :  { %v143_v48 = vsub.f32 1.0, %v123_v31  ;;  %v152_v50 = vmul.f32 %v150_v47, %v123_v31 }
 0x101   :  { %v134_v32 = vpop.permute.xlu0 %133 }
 0x102   :  { %v136_v33 = vmul.f32 %v134_v32, %v123_v31 }
 0x104   :  { %138 = vrot.lane.b32.xlu1 %v136_v33, %s2526_s23 }
 0x109   :  { %v242_v57 = vpop.permute.xlu0 %241 }
 0x10a   :  { %v244_v59 = vadd.f32 %v242_v57, %v215_v58 }
 0x176   :  { %v139_v34 = vpop.permute.xlu1 %138 }
 0x177   :  { %v141_v35 = vadd.f32 %v139_v34, %v76_v17 }
 0x179   :  { %2408 = vtanh.f32 %v141_v35 }
 0x17f   :  { %v2409_v36 = vpop.eup %2408 }
 0x180   :  { %145 = vrot.lane.b32.xlu1 %v2409_v36, %s2528_s27 }
 0x188   :  { %356 = vrot.lane.b32.xlu1 %v2374_v54, %s2526_s23 }
 0x1f2   :  { %v146_v49 = vpop.permute.xlu1 %145 }
 0x1f3   :  { %v148_v51 = vmul.f32 %v146_v49, %v143_v48 }
 0x1f5   :  { %v153_v52 = vadd.f32 %v152_v50, %v148_v51 }
 0x1f7   :  { %155 = vrot.lane.b32.xlu2 %v153_v52, %s2528_s27 }
 0x1fa   :  { %v357_v62 = vpop.permute.xlu1 %356 }
 0x1ff   :  { %246 = vrot.lane.b32.xlu2 %v244_v59, %s2526_s23 }
 0x251   :  { %v156_v55 = vpop.permute.xlu2 %155 }
 0x252   :  { %158 = vst.msk [vmem:[#allocation2] sm:$0x3] %vm41_vm0, %v156_v55  ;;  %2289 = vmatmul.msk.f32.vlgmr.msrb.gmra.mxu2 %vm54_vm1, %v156_v55 }
 0x253   :  { %637 = vmatpush.msrb.mxu2 %v2704_v41 }
 0x255   :  { %638 = vmatpush.msrb.mxu2 %v2711_v42 }
 0x257   :  { %639 = vmatpush.msrb.mxu2 %v2725_v45 }
 0x259   :  { %v2768_v56 = vld [vmem:[#allocation2] sm:$0x3]  ;;  %640 = vmatpush.msrb.mxu2 %v2732_v46  ;;  %v247_v23 = vpop.permute.xlu2 %246 }
 0x25a   :  { %2294 = vmatmul.msk.f32.vlgmr.msra.gmra.mxu1 %vm54_vm1, %v2768_v56 }
 0x25b   :  { %779 = vmatpush.msra.mxu1 %v2601_v0 }
 0x25d   :  { %780 = vmatpush.msra.mxu1 %v2606_v1 }
 0x25f   :  { %781 = vmatpush.msra.mxu1 %v2620_v4 }
 0x261   :  { %782 = vmatpush.msra.mxu1 %v2632_v6 }
 0x2d5   :  { %v188_v61 = vpop.f32.mrf.mxu2 }
 0x2d6   :  { %v189_v63 = vadd.f32 %v2375_v60, %v188_v61 }
 0x2d7   :  { %v330_v9 = vpop.f32.mrf.mxu1 }
 0x2d8   :  { %v218_v10 = vadd.f32 %v215_v58, %v189_v63  ;;  %v359_v11 = vadd.f32 %v357_v62, %v330_v9  ;;  %v333_v30 = vadd.f32 %v330_v9, %v304_v29 }
 0x2da   :  { %v2291_v12 = vmul.f32 -1.442695, %v218_v10  ;;  %361 = vrot.lane.b32.xlu0 %v359_v11, %s2526_s23  ;;  %v2295_v31 = vmul.f32 -1.442695, %v333_v30 }
 0x2dc   :  { %2410 = vpow2.f32 %v2291_v12 }
 0x2e2   :  { %v2411_v13 = vpop.eup %2410 }
 0x2e3   :  { %v222_v14 = vadd.f32 1.0, %v2411_v13 }
 0x2e5   :  { %2412 = vrcp.f32 %v222_v14  ;;  %v234_v18 = vand.u32 2147483648, %v222_v14  ;;  %v232_v20 = vand.u32 2147483647, %v222_v14  ;;  %vm228_vm7 = vweird.f32 %v222_v14 }
 0x2e6   :  { %2414 = vpow2.f32 %v2295_v31 }
 0x2e7   :  { %v235_v22 = vor.u32 1.1754944e-38, %v234_v18  ;;  %vm233_vm9 = vcmp.eq.f32.partialorder %v232_v20, 8.507059e+37  ;;  %v2377_v18 = vld [vmem:[%s3329_s9] ss:$0 sm:$0xff] }
 0x2eb   :  { %v2413_v15 = vpop.eup %2412 }
 0x2ec   :  { %v224_v16 = vmul.f32 %v2413_v15, %v222_v14  ;;  %vm229_vm6 = vweird.f32 %v2413_v15  ;;  %v2415_v32 = vpop.eup %2414 }
 0x2ed   :  { %vm230_vm8 = vmor %vm228_vm7, %vm229_vm6  ;;  %v337_v33 = vadd.f32 1.0, %v2415_v32 }
 0x2ee   :  { %v225_v17 = vsub.f32 1.0, %v224_v16 }
 0x2ef   :  { %2416 = vrcp.f32 %v337_v33  ;;  %v349_v48 = vand.u32 2147483648, %v337_v33  ;;  %vm343_vm11 = vweird.f32 %v337_v33 }
 0x2f0   :  { %v226_v19 = vmul.f32 %v2413_v15, %v225_v17  ;;  %v2299_v17 = vld [vmem:[%s3327_s1 + $0x4] sm:$0x3] }
 0x2f1   :  { %v350_v50 = vor.u32 1.1754944e-38, %v349_v48  ;;  %2300 = vmatmul.msk.f32.vlgmr.msra.gmra.mxu0 %vm54_vm1, %v2299_v17 }
 0x2f2   :  { %v227_v21 = vadd.f32 %v2413_v15, %v226_v19  ;;  %979 = vmatpush.msra.mxu0 %v2611_v2  ;;  %v2378_v19 = vld [vmem:[%s3326_s5] ss:$0 sm:$0xff] }
 0x2f4   :  { %v231_v24 = vsel %vm230_vm8, %v2413_v15, %v227_v21  ;;  %980 = vmatpush.msra.mxu0 %v2625_v5 }
 0x2f5   :  { %v236_v25 = vsel %vm233_vm9, %v235_v22, %v231_v24  ;;  %v2417_v34 = vpop.eup %2416 }
 0x2f6   :  { %v249_v26 = vmul.f32 %v247_v23, %v236_v25  ;;  %v339_v35 = vmul.f32 %v2417_v34, %v337_v33  ;;  %vm344_vm10 = vweird.f32 %v2417_v34  ;;  %v256_v62 = vsub.f32 1.0, %v236_v25  ;;  %981 = vmatpush.msra.mxu0 %v2637_v7 }
 0x2f7   :  { %vm345_vm12 = vmor %vm343_vm11, %vm344_vm10 }
 0x2f8   :  { %251 = vrot.lane.b32.xlu1 %v249_v26, %s2526_s23  ;;  %v340_v36 = vsub.f32 1.0, %v339_v35  ;;  %982 = vmatpush.msra.mxu0 %v2642_v8 }
 0x2fa   :  { %v341_v39 = vmul.f32 %v2417_v34, %v340_v36 }
 0x2fc   :  { %v342_v47 = vadd.f32 %v2417_v34, %v341_v39 }
 0x2fe   :  { %v346_v49 = vsel %vm345_vm12, %v2417_v34, %v342_v47 }
 0x300   :  { %262 = vrot.lane.b32.xlu1 %v2720_v44, %s2527_s24  ;;  %v347_v44 = vand.u32 2147483647, %v337_v33 }
 0x302   :  { %vm348_vm13 = vcmp.eq.f32.partialorder %v347_v44, 8.507059e+37 }
 0x303   :  { %v351_v51 = vsel %vm348_vm13, %v350_v50, %v346_v49 }
 0x304   :  { %v371_v13 = vsub.f32 1.0, %v351_v51 }
 0x34c   :  { %v362_v52 = vpop.permute.xlu0 %361 }
 0x34d   :  { %v364_v53 = vmul.f32 %v362_v52, %v351_v51 }
 0x34f   :  { %366 = vrot.lane.b32.xlu2 %v364_v53, %s2526_s23 }
 0x36a   :  { %v252_v54 = vpop.permute.xlu1 %251 }
 0x36b   :  { %v254_v55 = vadd.f32 %v252_v54, %v189_v63 }
 0x36d   :  { %2418 = vtanh.f32 %v254_v55 }
 0x36e   :  { %v530_v26 = vpop.f32.mrf.mxu0 }
 0x372   :  { %v263_v61 = vpop.permute.xlu1 %262 }
 0x373   :  { %v2419_v57 = vpop.eup %2418  ;;  %v265_v10 = vmul.f32 %v263_v61, %v236_v25  ;;  %v2380_v25 = vld [vmem:[%s3328_s4] ss:$0 sm:$0xff] }
 0x374   :  { %258 = vrot.lane.b32.xlu0 %v2419_v57, %s2528_s27  ;;  %v531_v28 = vadd.f32 %v2380_v25, %v530_v26  ;;  %v2384_v25 = vld [vmem:[%s3328_s4] ss:$0 sm:$0xff] }
 0x37c   :  { %377 = vrot.lane.b32.xlu0 %v2768_v56, %s2527_s24 }
 0x384   :  { %468 = vrot.lane.b32.xlu0 %v2377_v18, %s2526_s23 }
 0x3a9   :  { %v367_v58 = vpop.permute.xlu2 %366 }
 0x3aa   :  { %v369_v59 = vadd.f32 %v367_v58, %v304_v29 }
 0x3ac   :  { %2420 = vtanh.f32 %v369_v59 }
 0x3b2   :  { %v2421_v60 = vpop.eup %2420 }
 0x3b3   :  { %373 = vrot.lane.b32.xlu2 %v2421_v60, %s2528_s27 }
 0x3e6   :  { %v259_v9 = vpop.permute.xlu0 %258 }
 0x3e7   :  { %v261_v11 = vmul.f32 %v259_v9, %v256_v62 }
 0x3e9   :  { %v266_v12 = vadd.f32 %v265_v10, %v261_v11 }
 0x3eb   :  { %268 = vrot.lane.b32.xlu1 %v266_v12, %s2528_s27 }
 0x3ee   :  { %v378_v63 = vpop.permute.xlu0 %377 }
 0x3ef   :  { %v380_v15 = vmul.f32 %v378_v63, %v351_v51 }
 0x3f3   :  { %583 = vrot.lane.b32.xlu1 %v2378_v19, %s2526_s23 }
 0x3f6   :  { %v469_v8 = vpop.permute.xlu0 %468 }
 0x40d   :  { %v374_v14 = vpop.permute.xlu2 %373 }
 0x40e   :  { %v376_v16 = vmul.f32 %v374_v14, %v371_v13 }
 0x410   :  { %v381_v56 = vadd.f32 %v380_v15, %v376_v16 }
 0x412   :  { %383 = vrot.lane.b32.xlu2 %v381_v56, %s2528_s27 }
 0x45d   :  { %v269_v20 = vpop.permute.xlu1 %268 }
 0x45e   :  { %271 = vst.msk [vmem:[#allocation2 + $0x2] sm:$0x3] %vm41_vm0, %v269_v20 }
 0x465   :  { %v387_v2 = vld [vmem:[#allocation2 + $0x2] sm:$0x3] }
 0x466   :  { %2297 = vmatmul.msk.f32.vlgmr.msrb.gmra.mxu3 %vm54_vm1, %v387_v2 }
 0x467   :  { %891 = vmatpush.msrb.mxu3 %v2685_v37 }
 0x469   :  { %892 = vmatpush.msrb.mxu3 %v2690_v38 }
 0x46b   :  { %893 = vmatpush.msrb.mxu3 %v2699_v40  ;;  %v584_v40 = vpop.permute.xlu1 %583 }
 0x46c   :  { %v384_v5 = vpop.permute.xlu2 %383 }
 0x46d   :  { %386 = vst.msk [vmem:[#allocation2] sm:$0x3] %vm41_vm0, %v384_v5  ;;  %2296 = vmatmul.msk.f32.vlgmr.msra.gmra.mxu2 %vm54_vm1, %v384_v5  ;;  %894 = vmatpush.msrb.mxu3 %v2716_v43 }
 0x46e   :  { %864 = vmatpush.msra.mxu2 %v2704_v41 }
 0x470   :  { %865 = vmatpush.msra.mxu2 %v2711_v42 }
 0x472   :  { %866 = vmatpush.msra.mxu2 %v2725_v45 }
 0x474   :  { %v2822_v7 = vld [vmem:[#allocation2] sm:$0x3]  ;;  %867 = vmatpush.msra.mxu2 %v2732_v46 }
 0x475   :  { %2301 = vmatmul.msk.f32.vlgmr.msrb.gmra.mxu1 %vm54_vm1, %v2822_v7 }
 0x476   :  { %1006 = vmatpush.msrb.mxu1 %v2601_v0  ;;  %v2379_v0 = vld [vmem:[%s3332_s8] ss:$0 sm:$0xff] }
 0x478   :  { %1007 = vmatpush.msrb.mxu1 %v2606_v1 }
 0x47a   :  { %1008 = vmatpush.msrb.mxu1 %v2620_v4 }
 0x47c   :  { %1009 = vmatpush.msrb.mxu1 %v2632_v6 }
 0x4e9   :  { %v442_v37 = vpop.f32.mrf.mxu3 }
 0x4ea   :  { %v471_v38 = vadd.f32 %v469_v8, %v442_v37 }
 0x4ec   :  { %473 = vrot.lane.b32.xlu2 %v471_v38, %s2526_s23 }
 0x4f0   :  { %v415_v22 = vpop.f32.mrf.mxu2 }
 0x4f1   :  { %v416_v1 = vadd.f32 %v2379_v0, %v415_v22 }
 0x4f2   :  { %v557_v43 = vpop.f32.mrf.mxu1 }
 0x4f3   :  { %v586_v21 = vadd.f32 %v584_v40, %v557_v43  ;;  %v445_v23 = vadd.f32 %v442_v37, %v416_v1  ;;  %v560_v30 = vadd.f32 %v557_v43, %v531_v28  ;;  %v2381_v43 = vld [vmem:[%s3326_s5] ss:$0 sm:$0xff] }
 0x4f5   :  { %588 = vrot.lane.b32.xlu0 %v586_v21, %s2526_s23  ;;  %v2298_v4 = vmul.f32 -1.442695, %v445_v23  ;;  %v2302_v32 = vmul.f32 -1.442695, %v560_v30  ;;  %v2382_v21 = vld [vmem:[%s3329_s9] ss:$0 sm:$0xff] }
 0x4f7   :  { %2422 = vpow2.f32 %v2298_v4 }
 0x4fd   :  { %v2423_v6 = vpop.eup %2422 }
 0x4fe   :  { %v449_v24 = vadd.f32 1.0, %v2423_v6 }
 0x500   :  { %2424 = vrcp.f32 %v449_v24  ;;  %v461_v35 = vand.u32 2147483648, %v449_v24  ;;  %vm455_vm15 = vweird.f32 %v449_v24  ;;  %v459_v36 = vand.u32 2147483647, %v449_v24 }
 0x501   :  { %2426 = vpow2.f32 %v2302_v32 }
 0x502   :  { %v462_v48 = vor.u32 1.1754944e-38, %v461_v35  ;;  %vm460_vm3 = vcmp.eq.f32.partialorder %v459_v36, 8.507059e+37 }
 0x506   :  { %v2425_v27 = vpop.eup %2424 }
 0x507   :  { %v451_v29 = vmul.f32 %v2425_v27, %v449_v24  ;;  %vm456_vm14 = vweird.f32 %v2425_v27  ;;  %v2427_v47 = vpop.eup %2426 }
 0x508   :  { %vm457_vm2 = vmor %vm455_vm15, %vm456_vm14  ;;  %v564_v50 = vadd.f32 1.0, %v2427_v47 }
 0x509   :  { %v452_v31 = vsub.f32 1.0, %v451_v29 }
 0x50a   :  { %2428 = vrcp.f32 %v564_v50  ;;  %v576_v58 = vand.u32 2147483648, %v564_v50  ;;  %vm570_vm5 = vweird.f32 %v564_v50  ;;  %v574_v59 = vand.u32 2147483647, %v564_v50 }
 0x50b   :  { %v453_v33 = vmul.f32 %v2425_v27, %v452_v31 }
 0x50c   :  { %v577_v61 = vor.u32 1.1754944e-38, %v576_v58  ;;  %vm575_vm7 = vcmp.eq.f32.partialorder %v574_v59, 8.507059e+37 }
 0x50d   :  { %v454_v34 = vadd.f32 %v2425_v27, %v453_v33 }
 0x50f   :  { %v458_v39 = vsel %vm457_vm2, %v2425_v27, %v454_v34 }
 0x510   :  { %v463_v49 = vsel %vm460_vm3, %v462_v48, %v458_v39  ;;  %v2429_v52 = vpop.eup %2428 }
 0x511   :  { %v566_v53 = vmul.f32 %v2429_v52, %v564_v50  ;;  %vm571_vm4 = vweird.f32 %v2429_v52  ;;  %v483_v56 = vsub.f32 1.0, %v463_v49 }
 0x512   :  { %vm572_vm6 = vmor %vm570_vm5, %vm571_vm4 }
 0x513   :  { %v567_v54 = vsub.f32 1.0, %v566_v53 }
 0x515   :  { %v568_v55 = vmul.f32 %v2429_v52, %v567_v54 }
 0x517   :  { %v569_v57 = vadd.f32 %v2429_v52, %v568_v55 }
 0x519   :  { %v573_v60 = vsel %vm572_vm6, %v2429_v52, %v569_v57 }
 0x51a   :  { %v578_v62 = vsel %vm575_vm7, %v577_v61, %v573_v60 }
 0x51b   :  { %v598_v5 = vsub.f32 1.0, %v578_v62 }
 0x546   :  { %v474_v44 = vpop.permute.xlu2 %473 }
 0x547   :  { %v476_v51 = vmul.f32 %v474_v44, %v463_v49 }
 0x549   :  { %478 = vrot.lane.b32.xlu1 %v476_v51, %s2526_s23 }
 0x551   :  { %489 = vrot.lane.b32.xlu1 %v387_v2, %s2527_s24 }
 0x567   :  { %v589_v9 = vpop.permute.xlu0 %588 }
 0x568   :  { %v591_v10 = vmul.f32 %v589_v9, %v578_v62 }
 0x56a   :  { %593 = vrot.lane.b32.xlu2 %v591_v10, %s2526_s23 }
 0x5bb   :  { %v479_v11 = vpop.permute.xlu1 %478 }
 0x5bc   :  { %v481_v12 = vadd.f32 %v479_v11, %v416_v1 }
 0x5be   :  { %2430 = vtanh.f32 %v481_v12 }
 0x5c3   :  { %v490_v16 = vpop.permute.xlu1 %489 }
 0x5c4   :  { %v2431_v63 = vpop.eup %2430  ;;  %v594_v13 = vpop.permute.xlu2 %593  ;;  %v492_v18 = vmul.f32 %v490_v16, %v463_v49 }
 0x5c5   :  { %v596_v14 = vadd.f32 %v594_v13, %v531_v28  ;;  %485 = vrot.lane.b32.xlu0 %v2431_v63, %s2528_s27 }
 0x5c7   :  { %2432 = vtanh.f32 %v596_v14 }
 0x5cd   :  { %v2433_v15 = vpop.eup %2432  ;;  %604 = vrot.lane.b32.xlu0 %v2822_v7, %s2527_s24  ;;  %v2306_v7 = vld [vmem:[%s3327_s1 + $0x6] sm:$0x3] }
 0x5ce   :  { %600 = vrot.lane.b32.xlu2 %v2433_v15, %s2528_s27  ;;  %2307 = vmatmul.msk.f32.vlgmr.msrb.gmra.mxu0 %vm54_vm1, %v2306_v7 }
 0x5d5   :  { %695 = vrot.lane.b32.xlu0 %v2382_v21, %s2526_s23 }
 0x628   :  { %v601_v2 = vpop.permute.xlu2 %600 }
 0x629   :  { %v603_v37 = vmul.f32 %v601_v2, %v598_v5 }
 0x637   :  { %v486_v17 = vpop.permute.xlu0 %485 }
 0x638   :  { %v488_v19 = vmul.f32 %v486_v17, %v483_v56 }
 0x63a   :  { %v493_v20 = vadd.f32 %v492_v18, %v488_v19 }
 0x63c   :  { %495 = vrot.lane.b32.xlu1 %v493_v20, %s2528_s27 }
 0x63f   :  { %v605_v8 = vpop.permute.xlu0 %604 }
 0x640   :  { %v607_v38 = vmul.f32 %v605_v8, %v578_v62 }
 0x642   :  { %v608_v40 = vadd.f32 %v607_v38, %v603_v37 }
 0x644   :  { %610 = vrot.lane.b32.xlu2 %v608_v40, %s2528_s27  ;;  %810 = vrot.lane.b32.xlu1 %v2381_v43, %s2526_s23 }
 0x64b   :  { %v757_v27 = vpop.f32.mrf.mxu0 }
 0x64c   :  { %v758_v29 = vadd.f32 %v2384_v25, %v757_v27 }
 0x69e   :  { %v611_v0 = vpop.permute.xlu2 %610 }
 0x69f   :  { %613 = vst.msk [vmem:[#allocation2] sm:$0x3] %vm41_vm0, %v611_v0  ;;  %2303 = vmatmul.msk.f32.vlgmr.msrb.gmra.mxu2 %vm54_vm1, %v611_v0 }
 0x6a0   :  { %1091 = vmatpush.msrb.mxu2 %v2704_v41 }
 0x6a2   :  { %1092 = vmatpush.msrb.mxu2 %v2711_v42  ;;  %v696_v42 = vpop.permute.xlu0 %695 }
 0x6a4   :  { %1093 = vmatpush.msrb.mxu2 %v2725_v45 }
 0x6a6   :  { %v2865_v22 = vld [vmem:[#allocation2] sm:$0x3]  ;;  %1094 = vmatpush.msrb.mxu2 %v2732_v46 }
 0x6a7   :  { %2308 = vmatmul.msk.f32.vlgmr.msra.gmra.mxu1 %vm54_vm1, %v2865_v22  ;;  %v2383_v46 = vld [vmem:[%s3332_s8] ss:$0 sm:$0xff] }
 0x6ae   :  { %v496_v1 = vpop.permute.xlu1 %495 }
 0x6af   :  { %498 = vst.msk [vmem:[#allocation2 + $0x2] sm:$0x3] %vm41_vm0, %v496_v1 }
 0x6b6   :  { %v614_v23 = vld [vmem:[#allocation2 + $0x2] sm:$0x3]  ;;  %v811_v4 = vpop.permute.xlu1 %810 }
 0x6b7   :  { %2304 = vmatmul.msk.f32.vlgmr.msra.gmra.mxu3 %vm54_vm1, %v614_v23 }
 0x722   :  { %v642_v26 = vpop.f32.mrf.mxu2 }
 0x723   :  { %v643_v28 = vadd.f32 %v2383_v46, %v642_v26 }
 0x724   :  { %v784_v6 = vpop.f32.mrf.mxu1 }
 0x725   :  { %v813_v41 = vadd.f32 %v811_v4, %v784_v6  ;;  %v787_v31 = vadd.f32 %v784_v6, %v758_v29  ;;  %v2385_v4 = vld [vmem:[%s3326_s5] ss:$0 sm:$0xff] }
 0x726   :  { %v2386_v6 = vld [vmem:[%s3329_s9] ss:$0 sm:$0xff] }
 0x727   :  { %815 = vrot.lane.b32.xlu0 %v813_v41, %s2526_s23  ;;  %v2309_v33 = vmul.f32 -1.442695, %v787_v31  ;;  %v2388_v31 = vld [vmem:[%s3328_s4] ss:$0 sm:$0xff] }
 0x73a   :  { %v669_v45 = vpop.f32.mrf.mxu3 }
 0x73b   :  { %v698_v24 = vadd.f32 %v696_v42, %v669_v45  ;;  %v672_v30 = vadd.f32 %v669_v45, %v643_v28 }
 0x73d   :  { %700 = vrot.lane.b32.xlu2 %v698_v24, %s2526_s23  ;;  %v2305_v32 = vmul.f32 -1.442695, %v672_v30  ;;  %v2387_v30 = vld [vmem:[%s3332_s8] ss:$0 sm:$0xff] }
 0x73f   :  { %2434 = vpow2.f32 %v2305_v32 }
 0x740   :  { %2436 = vpow2.f32 %v2309_v33 }
 0x745   :  { %v2435_v34 = vpop.eup %2434 }
 0x746   :  { %v2437_v35 = vpop.eup %2436  ;;  %v676_v36 = vadd.f32 1.0, %v2435_v34 }
 0x747   :  { %v791_v39 = vadd.f32 1.0, %v2437_v35 }
 0x748   :  { %2438 = vrcp.f32 %v676_v36  ;;  %v688_v55 = vand.u32 2147483648, %v676_v36  ;;  %vm682_vm9 = vweird.f32 %v676_v36  ;;  %v686_v57 = vand.u32 2147483647, %v676_v36 }
 0x749   :  { %2440 = vrcp.f32 %v791_v39  ;;  %v803_v59 = vand.u32 2147483648, %v791_v39  ;;  %vm797_vm12 = vweird.f32 %v791_v39  ;;  %v801_v61 = vand.u32 2147483647, %v791_v39 }
 0x74a   :  { %v689_v62 = vor.u32 1.1754944e-38, %v688_v55  ;;  %vm687_vm14 = vcmp.eq.f32.partialorder %v686_v57, 8.507059e+37 }
 0x74b   :  { %v804_v12 = vor.u32 1.1754944e-38, %v803_v59  ;;  %vm802_vm15 = vcmp.eq.f32.partialorder %v801_v61, 8.507059e+37 }
 0x74e   :  { %v2439_v47 = vpop.eup %2438 }
 0x74f   :  { %v2441_v48 = vpop.eup %2440  ;;  %v678_v44 = vmul.f32 %v2439_v47, %v676_v36  ;;  %vm683_vm8 = vweird.f32 %v2439_v47 }
 0x750   :  { %v793_v49 = vmul.f32 %v2441_v48, %v791_v39  ;;  %vm798_vm10 = vweird.f32 %v2441_v48  ;;  %vm684_vm11 = vmor %vm682_vm9, %vm683_vm8 }
 0x751   :  { %v679_v50 = vsub.f32 1.0, %v678_v44  ;;  %vm799_vm13 = vmor %vm797_vm12, %vm798_vm10 }
 0x752   :  { %v794_v51 = vsub.f32 1.0, %v793_v49 }
 0x753   :  { %v680_v52 = vmul.f32 %v2439_v47, %v679_v50 }
 0x754   :  { %v795_v53 = vmul.f32 %v2441_v48, %v794_v51 }
 0x755   :  { %v681_v54 = vadd.f32 %v2439_v47, %v680_v52 }
 0x756   :  { %v796_v58 = vadd.f32 %v2441_v48, %v795_v53 }
 0x757   :  { %v685_v60 = vsel %vm684_vm11, %v2439_v47, %v681_v54 }
 0x758   :  { %v800_v9 = vsel %vm799_vm13, %v2441_v48, %v796_v58  ;;  %v690_v11 = vsel %vm687_vm14, %v689_v62, %v685_v60 }
 0x759   :  { %v805_v13 = vsel %vm802_vm15, %v804_v12, %v800_v9  ;;  %v710_v5 = vsub.f32 1.0, %v690_v11 }
 0x75a   :  { %v825_v43 = vsub.f32 1.0, %v805_v13 }
 0x797   :  { %v701_v10 = vpop.permute.xlu2 %700 }
 0x798   :  { %v703_v63 = vmul.f32 %v701_v10, %v690_v11 }
 0x799   :  { %v816_v14 = vpop.permute.xlu0 %815 }
 0x79a   :  { %v818_v15 = vmul.f32 %v816_v14, %v805_v13  ;;  %705 = vrot.lane.b32.xlu1 %v703_v63, %s2526_s23 }
 0x79c   :  { %820 = vrot.lane.b32.xlu2 %v818_v15, %s2526_s23 }
 0x7a2   :  { %716 = vrot.lane.b32.xlu1 %v614_v23, %s2527_s24 }
 0x7f6   :  { %v821_v16 = vpop.permute.xlu2 %820 }
 0x7f7   :  { %v823_v56 = vadd.f32 %v821_v16, %v758_v29 }
 0x7f9   :  { %2442 = vtanh.f32 %v823_v56 }
 0x7ff   :  { %v2443_v17 = vpop.eup %2442 }
 0x800   :  { %827 = vrot.lane.b32.xlu2 %v2443_v17, %s2528_s27 }
 0x80c   :  { %v706_v18 = vpop.permute.xlu1 %705 }
 0x80d   :  { %v708_v19 = vadd.f32 %v706_v18, %v643_v28 }
 0x80f   :  { %2444 = vtanh.f32 %v708_v19 }
 0x814   :  { %v717_v2 = vpop.permute.xlu1 %716 }
 0x815   :  { %v2445_v20 = vpop.eup %2444  ;;  %v719_v37 = vmul.f32 %v717_v2, %v690_v11 }
 0x816   :  { %712 = vrot.lane.b32.xlu0 %v2445_v20, %s2528_s27 }
 0x81e   :  { %831 = vrot.lane.b32.xlu0 %v2865_v22, %s2527_s24  ;;  %v2313_v22 = vld [vmem:[%s3327_s1 + $0x8] sm:$0x3] }
 0x81f   :  { %2314 = vmatmul.msk.f32.vlgmr.msra.gmra.mxu0 %vm54_vm1, %v2313_v22 }
 0x826   :  { %922 = vrot.lane.b32.xlu0 %v2386_v6, %s2526_s23 }
 0x85a   :  { %v828_v7 = vpop.permute.xlu2 %827 }
 0x85b   :  { %v830_v0 = vmul.f32 %v828_v7, %v825_v43  ;;  %v1186_v7 = vld [vmem:[%s3325_s2 + $0x18] sm:$0xff] }
 0x85c   :  { %1206 = vmatpush.msrb.mxu0 %v1186_v7 }
 0x888   :  { %v713_v8 = vpop.permute.xlu0 %712 }
 0x889   :  { %v715_v38 = vmul.f32 %v713_v8, %v710_v5 }
 0x88b   :  { %v720_v40 = vadd.f32 %v719_v37, %v715_v38 }
 0x88d   :  { %722 = vrot.lane.b32.xlu1 %v720_v40, %s2528_s27 }
 0x890   :  { %v832_v21 = vpop.permute.xlu0 %831 }
 0x891   :  { %v834_v1 = vmul.f32 %v832_v21, %v805_v13 }
 0x893   :  { %v835_v23 = vadd.f32 %v834_v1, %v830_v0 }
 0x895   :  { %837 = vrot.lane.b32.xlu2 %v835_v23, %s2528_s27  ;;  %1037 = vrot.lane.b32.xlu1 %v2385_v4, %s2526_s23 }
 0x898   :  { %v923_v27 = vpop.permute.xlu0 %922 }
 0x89c   :  { %v984_v33 = vpop.f32.mrf.mxu0 }
 0x89d   :  { %v985_v35 = vadd.f32 %v2388_v31, %v984_v33  ;;  %v1214_v31 = vld [vmem:[%s3324_s3] sm:$0xff]  ;;  %v2962_v33 = vld [vmem:[%s3330_s7 + $0x10] sm:$0xff] }
 0x8ef   :  { %v838_v41 = vpop.permute.xlu2 %837 }
 0x8f0   :  { %840 = vst.msk [vmem:[#allocation2] sm:$0x3] %vm41_vm0, %v838_v41  ;;  %2310 = vmatmul.msk.f32.vlgmr.msra.gmra.mxu2 %vm54_vm1, %v838_v41 }
 0x8f7   :  { %v2903_v42 = vld [vmem:[#allocation2] sm:$0x3] }
 0x8f8   :  { %2315 = vmatmul.msk.f32.vlgmr.msrb.gmra.mxu1 %vm54_vm1, %v2903_v42 }
 0x8ff   :  { %v723_v45 = vpop.permute.xlu1 %722 }
 0x900   :  { %725 = vst.msk [vmem:[#allocation2 + $0x2] sm:$0x3] %vm41_vm0, %v723_v45 }
 0x907   :  { %v841_v24 = vld [vmem:[#allocation2 + $0x2] sm:$0x3]  ;;  %v1038_v46 = vpop.permute.xlu1 %1037 }
 0x908   :  { %2311 = vmatmul.msk.f32.vlgmr.msrb.gmra.mxu3 %vm54_vm1, %v841_v24 }
 0x973   :  { %v869_v32 = vpop.f32.mrf.mxu2 }
 0x974   :  { %v870_v34 = vadd.f32 %v2387_v30, %v869_v32  ;;  %v2320_v30 = vld [vmem:[%s3327_s1 + $0xa] sm:$0x3]  ;;  %v2957_v32 = vld [vmem:[%s3330_s7 + $0x18] sm:$0xff] }
 0x975   :  { %v1011_v25 = vpop.f32.mrf.mxu1  ;;  %1118 = vmatpush.msra.mxu3 %v2957_v32 }
 0x976   :  { %v1040_v26 = vadd.f32 %v1038_v46, %v1011_v25  ;;  %v1014_v39 = vadd.f32 %v1011_v25, %v985_v35  ;;  %v1217_v25 = vld [vmem:[%s3324_s3 + $0x18] sm:$0xff] }
 0x977   :  { %1233 = vmatpush.msra.mxu1 %v1217_v25  ;;  %1119 = vmatpush.msra.mxu3 %v2962_v33 }
 0x978   :  { %1042 = vrot.lane.b32.xlu0 %v1040_v26, %s2526_s23  ;;  %v2316_v48 = vmul.f32 -1.442695, %v1014_v39  ;;  %v1184_v26 = vld [vmem:[%s3325_s2 + $0x8] sm:$0xff]  ;;  %v2390_v39 = vld [vmem:[%s3329_s9] ss:$0 sm:$0xff] }
 0x98b   :  { %v896_v28 = vpop.f32.mrf.mxu3 }
 0x98c   :  { %v925_v29 = vadd.f32 %v923_v27, %v896_v28  ;;  %v899_v36 = vadd.f32 %v896_v28, %v870_v34  ;;  %v1216_v27 = vld [vmem:[%s3324_s3 + $0x10] sm:$0xff]  ;;  %v1183_v28 = vld [vmem:[%s3325_s2] sm:$0xff] }
 0x98d   :  { %1234 = vmatpush.msra.mxu1 %v1216_v27 }
 0x98e   :  { %927 = vrot.lane.b32.xlu2 %v925_v29, %s2526_s23  ;;  %v2312_v47 = vmul.f32 -1.442695, %v899_v36  ;;  %v1215_v29 = vld [vmem:[%s3324_s3 + $0x8] sm:$0xff]  ;;  %v2978_v36 = vld [vmem:[%s3330_s7] sm:$0xff] }
 0x98f   :  { %1235 = vmatpush.msra.mxu1 %v1215_v29 }
 0x990   :  { %2446 = vpow2.f32 %v2312_v47 }
 0x991   :  { %2448 = vpow2.f32 %v2316_v48  ;;  %1236 = vmatpush.msra.mxu1 %v1214_v31 }
 0x993   :  { %1460 = vmatpush.msrb.mxu1 %v1217_v25 }
 0x995   :  { %1461 = vmatpush.msrb.mxu1 %v1216_v27 }
 0x996   :  { %v2447_v44 = vpop.eup %2446 }
 0x997   :  { %v2449_v49 = vpop.eup %2448  ;;  %v903_v50 = vadd.f32 1.0, %v2447_v44  ;;  %1462 = vmatpush.msrb.mxu1 %v1215_v29 }
 0x998   :  { %v1018_v51 = vadd.f32 1.0, %v2449_v49 }
 0x999   :  { %2450 = vrcp.f32 %v903_v50  ;;  %v915_v62 = vand.u32 2147483648, %v903_v50  ;;  %vm909_vm3 = vweird.f32 %v903_v50  ;;  %v913_v9 = vand.u32 2147483647, %v903_v50  ;;  %1463 = vmatpush.msrb.mxu1 %v1214_v31 }
 0x99a   :  { %2452 = vrcp.f32 %v1018_v51  ;;  %v1030_v11 = vand.u32 2147483648, %v1018_v51  ;;  %vm1024_vm6 = vweird.f32 %v1018_v51  ;;  %v1028_v63 = vand.u32 2147483647, %v1018_v51 }
 0x99b   :  { %v916_v13 = vor.u32 1.1754944e-38, %v915_v62  ;;  %vm914_vm8 = vcmp.eq.f32.partialorder %v913_v9, 8.507059e+37 }
 0x99c   :  { %v1031_v56 = vor.u32 1.1754944e-38, %v1030_v11  ;;  %vm1029_vm9 = vcmp.eq.f32.partialorder %v1028_v63, 8.507059e+37 }
 0x99f   :  { %v2451_v52 = vpop.eup %2450 }
 0x9a0   :  { %v2453_v53 = vpop.eup %2452  ;;  %v905_v54 = vmul.f32 %v2451_v52, %v903_v50  ;;  %vm910_vm2 = vweird.f32 %v2451_v52 }
 0x9a1   :  { %v1020_v55 = vmul.f32 %v2453_v53, %v1018_v51  ;;  %vm1025_vm4 = vweird.f32 %v2453_v53  ;;  %vm911_vm5 = vmor %vm909_vm3, %vm910_vm2 }
 0x9a2   :  { %v906_v57 = vsub.f32 1.0, %v905_v54  ;;  %vm1026_vm7 = vmor %vm1024_vm6, %vm1025_vm4 }
 0x9a3   :  { %v1021_v58 = vsub.f32 1.0, %v1020_v55 }
 0x9a4   :  { %v907_v59 = vmul.f32 %v2451_v52, %v906_v57  ;;  %v2391_v57 = vld [vmem:[%s3332_s8] ss:$0 sm:$0xff] }
 0x9a5   :  { %v1022_v60 = vmul.f32 %v2453_v53, %v1021_v58  ;;  %v2392_v58 = vld [vmem:[%s3328_s4] ss:$0 sm:$0xff] }
 0x9a6   :  { %v908_v61 = vadd.f32 %v2451_v52, %v907_v59 }
 0x9a7   :  { %v1023_v10 = vadd.f32 %v2453_v53, %v1022_v60 }
 0x9a8   :  { %v912_v12 = vsel %vm911_vm5, %v2451_v52, %v908_v61 }
 0x9a9   :  { %v1027_v14 = vsel %vm1026_vm7, %v2453_v53, %v1023_v10  ;;  %v917_v16 = vsel %vm914_vm8, %v916_v13, %v912_v12 }
 0x9aa   :  { %v1032_v18 = vsel %vm1029_vm9, %v1031_v56, %v1027_v14  ;;  %v937_v21 = vsub.f32 1.0, %v917_v16 }
 0x9ab   :  { %v1052_v6 = vsub.f32 1.0, %v1032_v18 }
 0x9e8   :  { %v928_v15 = vpop.permute.xlu2 %927 }
 0x9e9   :  { %v930_v17 = vmul.f32 %v928_v15, %v917_v16 }
 0x9ea   :  { %v1043_v19 = vpop.permute.xlu0 %1042 }
 0x9eb   :  { %v1045_v20 = vmul.f32 %v1043_v19, %v1032_v18  ;;  %932 = vrot.lane.b32.xlu1 %v930_v17, %s2526_s23 }
 0x9ed   :  { %1047 = vrot.lane.b32.xlu2 %v1045_v20, %s2526_s23 }
 0x9f3   :  { %943 = vrot.lane.b32.xlu1 %v841_v24, %s2527_s24 }
 0xa47   :  { %v1048_v2 = vpop.permute.xlu2 %1047 }
 0xa48   :  { %v1050_v5 = vadd.f32 %v1048_v2, %v985_v35  ;;  %v2972_v35 = vld [vmem:[%s3330_s7 + $0x8] sm:$0xff] }
 0xa49   :  { %1120 = vmatpush.msra.mxu3 %v2972_v35 }
 0xa4a   :  { %2454 = vtanh.f32 %v1050_v5 }
 0xa4b   :  { %1121 = vmatpush.msra.mxu3 %v2978_v36 }
 0xa4d   :  { %1345 = vmatpush.msrb.mxu3 %v2957_v32 }
 0xa4f   :  { %1346 = vmatpush.msrb.mxu3 %v2962_v33 }
 0xa50   :  { %v2455_v8 = vpop.eup %2454 }
 0xa51   :  { %1054 = vrot.lane.b32.xlu2 %v2455_v8, %s2528_s27  ;;  %1347 = vmatpush.msrb.mxu3 %v2972_v35 }
 0xa53   :  { %1348 = vmatpush.msrb.mxu3 %v2978_v36 }
 0xa5d   :  { %v933_v37 = vpop.permute.xlu1 %932 }
 0xa5e   :  { %v935_v38 = vadd.f32 %v933_v37, %v870_v34  ;;  %v2389_v34 = vld [vmem:[%s3326_s5] ss:$0 sm:$0xff] }
 0xa60   :  { %2456 = vtanh.f32 %v935_v38 }
 0xa65   :  { %v944_v43 = vpop.permute.xlu1 %943 }
 0xa66   :  { %v2457_v40 = vpop.eup %2456  ;;  %v946_v1 = vmul.f32 %v944_v43, %v917_v16 }
 0xa67   :  { %939 = vrot.lane.b32.xlu0 %v2457_v40, %s2528_s27 }
 0xa6f   :  { %1058 = vrot.lane.b32.xlu0 %v2903_v42, %s2527_s24  ;;  %v1185_v42 = vld [vmem:[%s3325_s2 + $0x10] sm:$0xff] }
 0xa70   :  { %1207 = vmatpush.msrb.mxu0 %v1185_v42 }
 0xa72   :  { %1208 = vmatpush.msrb.mxu0 %v1184_v26 }
 0xa74   :  { %1209 = vmatpush.msrb.mxu0 %v1183_v28 }
 0xa75   :  { %2321 = vmatmul.msk.f32.vlgmr.msrb.gmra.mxu0 %vm54_vm1, %v2320_v30  ;;  %v1298_v30 = vld [vmem:[%s3331_s6 + $0x10] sm:$0xff] }
 0xa76   :  { %1433 = vmatpush.msra.mxu0 %v1186_v7 }
 0xa77   :  { %1149 = vrot.lane.b32.xlu0 %v2390_v39, %s2526_s23 }
 0xa78   :  { %1434 = vmatpush.msra.mxu0 %v1185_v42 }
 0xa7a   :  { %1435 = vmatpush.msra.mxu0 %v1184_v26 }
 0xa7c   :  { %1436 = vmatpush.msra.mxu0 %v1183_v28 }
 0xa7e   :  { %1660 = vmatpush.msrb.mxu0 %v1186_v7 }
 0xa80   :  { %1661 = vmatpush.msrb.mxu0 %v1185_v42 }
 0xa82   :  { %1662 = vmatpush.msrb.mxu0 %v1184_v26 }
 0xa84   :  { %1663 = vmatpush.msrb.mxu0 %v1183_v28 }
 0xaab   :  { %v1055_v4 = vpop.permute.xlu2 %1054 }
 0xaac   :  { %v1057_v45 = vmul.f32 %v1055_v4, %v1052_v6 }
 0xad9   :  { %v940_v0 = vpop.permute.xlu0 %939 }
 0xada   :  { %v942_v23 = vmul.f32 %v940_v0, %v937_v21 }
 0xadc   :  { %v947_v22 = vadd.f32 %v946_v1, %v942_v23 }
 0xade   :  { %949 = vrot.lane.b32.xlu1 %v947_v22, %s2528_s27 }
 0xae1   :  { %v1059_v41 = vpop.permute.xlu0 %1058 }
 0xae2   :  { %v1061_v24 = vmul.f32 %v1059_v41, %v1032_v18 }
 0xae4   :  { %v1062_v46 = vadd.f32 %v1061_v24, %v1057_v45 }
 0xae6   :  { %1064 = vrot.lane.b32.xlu2 %v1062_v46, %s2528_s27  ;;  %1264 = vrot.lane.b32.xlu1 %v2389_v34, %s2526_s23  ;;  %v1296_v34 = vld [vmem:[%s3331_s6] sm:$0xff] }
 0xae9   :  { %v1150_v53 = vpop.permute.xlu0 %1149 }
 0xaf2   :  { %v1211_v60 = vpop.f32.mrf.mxu0 }
 0xaf3   :  { %v1212_v62 = vadd.f32 %v2392_v58, %v1211_v60  ;;  %v2327_v58 = vld [vmem:[%s3327_s1 + $0xc] sm:$0x3]  ;;  %v2394_v60 = vld [vmem:[%s3329_s9] ss:$0 sm:$0xff] }
 0xaf4   :  { %2328 = vmatmul.msk.f32.vlgmr.msra.gmra.mxu0 %vm54_vm1, %v2327_v58 }
 0xb40   :  { %v1065_v47 = vpop.permute.xlu2 %1064 }
 0xb41   :  { %1067 = vst.msk [vmem:[#allocation2] sm:$0x3] %vm41_vm0, %v1065_v47  ;;  %2317 = vmatmul.msk.f32.vlgmr.msrb.gmra.mxu2 %vm54_vm1, %v1065_v47 }
 0xb48   :  { %v2992_v48 = vld [vmem:[#allocation2] sm:$0x3] }
 0xb49   :  { %2322 = vmatmul.msk.f32.vlgmr.msra.gmra.mxu1 %vm54_vm1, %v2992_v48 }
 0xb4a   :  { %1687 = vmatpush.msra.mxu1 %v1217_v25 }
 0xb4c   :  { %1688 = vmatpush.msra.mxu1 %v1216_v27 }
 0xb4e   :  { %1689 = vmatpush.msra.mxu1 %v1215_v29  ;;  %v1299_v29 = vld [vmem:[%s3331_s6 + $0x18] sm:$0xff] }
 0xb4f   :  { %1318 = vmatpush.msra.mxu2 %v1299_v29 }
 0xb50   :  { %v950_v44 = vpop.permute.xlu1 %949  ;;  %1690 = vmatpush.msra.mxu1 %v1214_v31  ;;  %v1297_v31 = vld [vmem:[%s3331_s6 + $0x8] sm:$0xff] }
 0xb51   :  { %952 = vst.msk [vmem:[#allocation2 + $0x2] sm:$0x3] %vm41_vm0, %v950_v44  ;;  %1319 = vmatpush.msra.mxu2 %v1298_v30 }
 0xb53   :  { %1320 = vmatpush.msra.mxu2 %v1297_v31 }
 0xb55   :  { %1321 = vmatpush.msra.mxu2 %v1296_v34 }
 0xb57   :  { %1545 = vmatpush.msrb.mxu2 %v1299_v29 }
 0xb58   :  { %v2997_v49 = vld [vmem:[#allocation2 + $0x2] sm:$0x3]  ;;  %v1265_v50 = vpop.permute.xlu1 %1264 }
 0xb59   :  { %2318 = vmatmul.msk.f32.vlgmr.msra.gmra.mxu3 %vm54_vm1, %v2997_v49  ;;  %1546 = vmatpush.msrb.mxu2 %v1298_v30 }
 0xb5a   :  { %1572 = vmatpush.msra.mxu3 %v2957_v32 }
 0xb5b   :  { %1547 = vmatpush.msrb.mxu2 %v1297_v31 }
 0xb5c   :  { %1573 = vmatpush.msra.mxu3 %v2962_v33 }
 0xb5d   :  { %1548 = vmatpush.msrb.mxu2 %v1296_v34 }
 0xb5e   :  { %1574 = vmatpush.msra.mxu3 %v2972_v35 }
 0xb60   :  { %1575 = vmatpush.msra.mxu3 %v2978_v36 }
 0xbc4   :  { %v1096_v59 = vpop.f32.mrf.mxu2 }
 0xbc5   :  { %v1097_v61 = vadd.f32 %v2391_v57, %v1096_v59  ;;  %v2393_v59 = vld [vmem:[%s3326_s5] ss:$0 sm:$0xff] }
 0xbc6   :  { %v1238_v51 = vpop.f32.mrf.mxu1 }
 0xbc7   :  { %v1267_v52 = vadd.f32 %v1265_v50, %v1238_v51  ;;  %v1241_v10 = vadd.f32 %v1238_v51, %v1212_v62 }
 0xbc9   :  { %1269 = vrot.lane.b32.xlu0 %v1267_v52, %s2526_s23  ;;  %v2323_v12 = vmul.f32 -1.442695, %v1241_v10 }
 0xbdc   :  { %v1123_v54 = vpop.f32.mrf.mxu3 }
 0xbdd   :  { %v1152_v55 = vadd.f32 %v1150_v53, %v1123_v54  ;;  %v1126_v9 = vadd.f32 %v1123_v54, %v1097_v61 }
 0xbdf   :  { %1154 = vrot.lane.b32.xlu2 %v1152_v55, %s2526_s23  ;;  %v2319_v11 = vmul.f32 -1.442695, %v1126_v9 }
 0xbe1   :  { %2458 = vpow2.f32 %v2319_v11 }
 0xbe2   :  { %2460 = vpow2.f32 %v2323_v12 }
 0xbe7   :  { %v2459_v63 = vpop.eup %2458 }
 0xbe8   :  { %v2461_v13 = vpop.eup %2460  ;;  %v1130_v14 = vadd.f32 1.0, %v2459_v63 }
 0xbe9   :  { %v1245_v15 = vadd.f32 1.0, %v2461_v13 }
 0xbea   :  { %2462 = vrcp.f32 %v1130_v14  ;;  %v1142_v37 = vand.u32 2147483648, %v1130_v14  ;;  %vm1136_vm11 = vweird.f32 %v1130_v14  ;;  %v1140_v38 = vand.u32 2147483647, %v1130_v14 }
 0xbeb   :  { %2464 = vrcp.f32 %v1245_v15  ;;  %v1257_v7 = vand.u32 2147483648, %v1245_v15  ;;  %vm1251_vm14 = vweird.f32 %v1245_v15  ;;  %v1255_v21 = vand.u32 2147483647, %v1245_v15 }
 0xbec   :  { %v1143_v0 = vor.u32 1.1754944e-38, %v1142_v37  ;;  %vm1141_vm2 = vcmp.eq.f32.partialorder %v1140_v38, 8.507059e+37 }
 0xbed   :  { %v1258_v4 = vor.u32 1.1754944e-38, %v1257_v7  ;;  %vm1256_vm3 = vcmp.eq.f32.partialorder %v1255_v21, 8.507059e+37 }
 0xbf0   :  { %v2463_v16 = vpop.eup %2462 }
 0xbf1   :  { %v2465_v56 = vpop.eup %2464  ;;  %v1132_v17 = vmul.f32 %v2463_v16, %v1130_v14  ;;  %vm1137_vm10 = vweird.f32 %v2463_v16 }
 0xbf2   :  { %v1247_v18 = vmul.f32 %v2465_v56, %v1245_v15  ;;  %vm1252_vm12 = vweird.f32 %v2465_v56  ;;  %vm1138_vm13 = vmor %vm1136_vm11, %vm1137_vm10 }
 0xbf3   :  { %v1133_v19 = vsub.f32 1.0, %v1132_v17  ;;  %vm1253_vm15 = vmor %vm1251_vm14, %vm1252_vm12 }
 0xbf4   :  { %v1248_v20 = vsub.f32 1.0, %v1247_v18 }
 0xbf5   :  { %v1134_v2 = vmul.f32 %v2463_v16, %v1133_v19 }
 0xbf6   :  { %v1249_v5 = vmul.f32 %v2465_v56, %v1248_v20 }
 0xbf7   :  { %v1135_v8 = vadd.f32 %v2463_v16, %v1134_v2 }
 0xbf8   :  { %v1250_v40 = vadd.f32 %v2465_v56, %v1249_v5 }
 0xbf9   :  { %v1139_v43 = vsel %vm1138_vm13, %v2463_v16, %v1135_v8 }
 0xbfa   :  { %v1254_v1 = vsel %vm1253_vm15, %v2465_v56, %v1250_v40  ;;  %v1144_v22 = vsel %vm1141_vm2, %v1143_v0, %v1139_v43 }
 0xbfb   :  { %v1259_v41 = vsel %vm1256_vm3, %v1258_v4, %v1254_v1  ;;  %v1164_v47 = vsub.f32 1.0, %v1144_v22 }
 0xbfc   :  { %v1279_v52 = vsub.f32 1.0, %v1259_v41 }
 0xc39   :  { %v1155_v23 = vpop.permute.xlu2 %1154 }
 0xc3a   :  { %v1157_v6 = vmul.f32 %v1155_v23, %v1144_v22 }
 0xc3b   :  { %v1270_v45 = vpop.permute.xlu0 %1269 }
 0xc3c   :  { %v1272_v24 = vmul.f32 %v1270_v45, %v1259_v41  ;;  %1159 = vrot.lane.b32.xlu1 %v1157_v6, %s2526_s23 }
 0xc3e   :  { %1274 = vrot.lane.b32.xlu2 %v1272_v24, %s2526_s23 }
 0xc44   :  { %1170 = vrot.lane.b32.xlu1 %v2997_v49, %s2527_s24 }
 0xc98   :  { %v1275_v46 = vpop.permute.xlu2 %1274 }
 0xc99   :  { %v1277_v42 = vadd.f32 %v1275_v46, %v1212_v62 }
 0xc9b   :  { %2466 = vtanh.f32 %v1277_v42 }
 0xca1   :  { %v2467_v25 = vpop.eup %2466 }
 0xca2   :  { %1281 = vrot.lane.b32.xlu2 %v2467_v25, %s2528_s27 }
 0xcae   :  { %v1160_v26 = vpop.permute.xlu1 %1159 }
 0xcaf   :  { %v1162_v27 = vadd.f32 %v1160_v26, %v1097_v61 }
 0xcb1   :  { %2468 = vtanh.f32 %v1162_v27 }
 0xcb6   :  { %v1171_v39 = vpop.permute.xlu1 %1170 }
 0xcb7   :  { %v2469_v28 = vpop.eup %2468  ;;  %v1173_v44 = vmul.f32 %v1171_v39, %v1144_v22 }
 0xcb8   :  { %1166 = vrot.lane.b32.xlu0 %v2469_v28, %s2528_s27 }
 0xcc0   :  { %1285 = vrot.lane.b32.xlu0 %v2992_v48, %s2527_s24 }
 0xcc8   :  { %1376 = vrot.lane.b32.xlu0 %v2394_v60, %s2526_s23 }
 0xcfc   :  { %v1282_v51 = vpop.permute.xlu2 %1281 }
 0xcfd   :  { %v1284_v54 = vmul.f32 %v1282_v51, %v1279_v52 }
 0xd2a   :  { %v1167_v48 = vpop.permute.xlu0 %1166 }
 0xd2b   :  { %v1169_v49 = vmul.f32 %v1167_v48, %v1164_v47 }
 0xd2d   :  { %v1174_v50 = vadd.f32 %v1173_v44, %v1169_v49 }
 0xd2f   :  { %1176 = vrot.lane.b32.xlu1 %v1174_v50, %s2528_s27 }
 0xd32   :  { %v1286_v53 = vpop.permute.xlu0 %1285 }
 0xd33   :  { %v1288_v55 = vmul.f32 %v1286_v53, %v1259_v41 }
 0xd35   :  { %v1289_v57 = vadd.f32 %v1288_v55, %v1284_v54 }
 0xd37   :  { %1291 = vrot.lane.b32.xlu2 %v1289_v57, %s2528_s27  ;;  %1491 = vrot.lane.b32.xlu1 %v2393_v59, %s2526_s23 }
 0xd3a   :  { %v1377_v13 = vpop.permute.xlu0 %1376 }
 0xd91   :  { %v1292_v61 = vpop.permute.xlu2 %1291 }
 0xd92   :  { %1294 = vst.msk [vmem:[#allocation2] sm:$0x3] %vm41_vm0, %v1292_v61  ;;  %2324 = vmatmul.msk.f32.vlgmr.msra.gmra.mxu2 %vm54_vm1, %v1292_v61 }
 0xd93   :  { %1772 = vmatpush.msra.mxu2 %v1299_v29 }
 0xd95   :  { %1773 = vmatpush.msra.mxu2 %v1298_v30 }
 0xd97   :  { %1774 = vmatpush.msra.mxu2 %v1297_v31 }
 0xd99   :  { %v3049_v62 = vld [vmem:[#allocation2] sm:$0x3]  ;;  %1775 = vmatpush.msra.mxu2 %v1296_v34 }
 0xd9a   :  { %2329 = vmatmul.msk.f32.vlgmr.msrb.gmra.mxu1 %vm54_vm1, %v3049_v62 }
 0xda1   :  { %v1177_v9 = vpop.permute.xlu1 %1176 }
 0xda2   :  { %1179 = vst.msk [vmem:[#allocation2 + $0x2] sm:$0x3] %vm41_vm0, %v1177_v9 }
 0xda9   :  { %v3054_v10 = vld [vmem:[#allocation2 + $0x2] sm:$0x3]  ;;  %v1492_v11 = vpop.permute.xlu1 %1491 }
 0xdaa   :  { %2325 = vmatmul.msk.f32.vlgmr.msrb.gmra.mxu3 %vm54_vm1, %v3054_v10 }
 0xdab   :  { %1799 = vmatpush.msrb.mxu3 %v2957_v32  ;;  %v2395_v32 = vld [vmem:[%s3332_s8] ss:$0 sm:$0xff] }
 0xdad   :  { %1800 = vmatpush.msrb.mxu3 %v2962_v33  ;;  %v2396_v33 = vld [vmem:[%s3328_s4] ss:$0 sm:$0xff] }
 0xdaf   :  { %1801 = vmatpush.msrb.mxu3 %v2972_v35 }
 0xdb1   :  { %1802 = vmatpush.msrb.mxu3 %v2978_v36  ;;  %v1438_v36 = vpop.f32.mrf.mxu0 }
 0xdb2   :  { %v1439_v56 = vadd.f32 %v2396_v33, %v1438_v36 }
 0xe15   :  { %v1323_v35 = vpop.f32.mrf.mxu2 }
 0xe16   :  { %v1324_v16 = vadd.f32 %v2395_v32, %v1323_v35 }
 0xe17   :  { %v1465_v12 = vpop.f32.mrf.mxu1 }
 0xe18   :  { %v1494_v63 = vadd.f32 %v1492_v11, %v1465_v12  ;;  %v1468_v18 = vadd.f32 %v1465_v12, %v1439_v56  ;;  %v2397_v11 = vld [vmem:[%s3326_s5] ss:$0 sm:$0xff] }
 0xe19   :  { %v2398_v12 = vld [vmem:[%s3329_s9] ss:$0 sm:$0xff] }
 0xe1a   :  { %1496 = vrot.lane.b32.xlu0 %v1494_v63, %s2526_s23  ;;  %v2330_v20 = vmul.f32 -1.442695, %v1468_v18  ;;  %v2400_v18 = vld [vmem:[%s3328_s4] ss:$0 sm:$0xff] }
 0xe2d   :  { %v1350_v14 = vpop.f32.mrf.mxu3 }
 0xe2e   :  { %v1379_v15 = vadd.f32 %v1377_v13, %v1350_v14  ;;  %v1353_v17 = vadd.f32 %v1350_v14, %v1324_v16 }
 0xe30   :  { %1381 = vrot.lane.b32.xlu2 %v1379_v15, %s2526_s23  ;;  %v2326_v19 = vmul.f32 -1.442695, %v1353_v17  ;;  %v2399_v17 = vld [vmem:[%s3332_s8] ss:$0 sm:$0xff] }
 0xe32   :  { %2470 = vpow2.f32 %v2326_v19 }
 0xe33   :  { %2472 = vpow2.f32 %v2330_v20 }
 0xe38   :  { %v2471_v2 = vpop.eup %2470 }
 0xe39   :  { %v2473_v5 = vpop.eup %2472  ;;  %v1357_v8 = vadd.f32 1.0, %v2471_v2 }
 0xe3a   :  { %v1472_v37 = vadd.f32 1.0, %v2473_v5 }
 0xe3b   :  { %2474 = vrcp.f32 %v1357_v8  ;;  %v1369_v4 = vand.u32 2147483648, %v1357_v8  ;;  %vm1363_vm5 = vweird.f32 %v1357_v8  ;;  %v1367_v6 = vand.u32 2147483647, %v1357_v8 }
 0xe3c   :  { %2476 = vrcp.f32 %v1472_v37  ;;  %v1484_v45 = vand.u32 2147483648, %v1472_v37  ;;  %vm1478_vm8 = vweird.f32 %v1472_v37  ;;  %v1482_v46 = vand.u32 2147483647, %v1472_v37 }
 0xe3d   :  { %v1370_v42 = vor.u32 1.1754944e-38, %v1369_v4  ;;  %vm1368_vm10 = vcmp.eq.f32.partialorder %v1367_v6, 8.507059e+37 }
 0xe3e   :  { %v1485_v28 = vor.u32 1.1754944e-38, %v1484_v45  ;;  %vm1483_vm11 = vcmp.eq.f32.partialorder %v1482_v46, 8.507059e+37 }
 0xe41   :  { %v2475_v38 = vpop.eup %2474 }
 0xe42   :  { %v2477_v40 = vpop.eup %2476  ;;  %v1359_v7 = vmul.f32 %v2475_v38, %v1357_v8  ;;  %vm1364_vm4 = vweird.f32 %v2475_v38 }
 0xe43   :  { %v1474_v43 = vmul.f32 %v2477_v40, %v1472_v37  ;;  %vm1479_vm6 = vweird.f32 %v2477_v40  ;;  %vm1365_vm7 = vmor %vm1363_vm5, %vm1364_vm4 }
 0xe44   :  { %v1360_v21 = vsub.f32 1.0, %v1359_v7  ;;  %vm1480_vm9 = vmor %vm1478_vm8, %vm1479_vm6 }
 0xe45   :  { %v1475_v0 = vsub.f32 1.0, %v1474_v43 }
 0xe46   :  { %v1361_v1 = vmul.f32 %v2475_v38, %v1360_v21 }
 0xe47   :  { %v1476_v23 = vmul.f32 %v2477_v40, %v1475_v0 }
 0xe48   :  { %v1362_v22 = vadd.f32 %v2475_v38, %v1361_v1 }
 0xe49   :  { %v1477_v41 = vadd.f32 %v2477_v40, %v1476_v23 }
 0xe4a   :  { %v1366_v24 = vsel %vm1365_vm7, %v2475_v38, %v1362_v22 }
 0xe4b   :  { %v1481_v25 = vsel %vm1480_vm9, %v2477_v40, %v1477_v41  ;;  %v1371_v27 = vsel %vm1368_vm10, %v1370_v42, %v1366_v24 }
 0xe4c   :  { %v1486_v30 = vsel %vm1483_vm11, %v1485_v28, %v1481_v25  ;;  %v1391_v52 = vsub.f32 1.0, %v1371_v27  ;;  %vm1893_vm11 = vcmask 517120  }
 0xe4d   :  { %v1506_v59 = vsub.f32 1.0, %v1486_v30 }
 0xe8a   :  { %v1382_v26 = vpop.permute.xlu2 %1381 }
 0xe8b   :  { %v1384_v29 = vmul.f32 %v1382_v26, %v1371_v27 }
 0xe8c   :  { %v1497_v31 = vpop.permute.xlu0 %1496 }
 0xe8d   :  { %v1499_v34 = vmul.f32 %v1497_v31, %v1486_v30  ;;  %1386 = vrot.lane.b32.xlu1 %v1384_v29, %s2526_s23 }
 0xe8f   :  { %1501 = vrot.lane.b32.xlu2 %v1499_v34, %s2526_s23 }
 0xe95   :  { %1397 = vrot.lane.b32.xlu1 %v3054_v10, %s2527_s24 }
 0xee9   :  { %v1502_v39 = vpop.permute.xlu2 %1501 }
 0xeea   :  { %v1504_v47 = vadd.f32 %v1502_v39, %v1439_v56 }
 0xeec   :  { %2478 = vtanh.f32 %v1504_v47 }
 0xef2   :  { %v2479_v48 = vpop.eup %2478 }
 0xef3   :  { %1508 = vrot.lane.b32.xlu2 %v2479_v48, %s2528_s27 }
 0xeff   :  { %v1387_v44 = vpop.permute.xlu1 %1386 }
 0xf00   :  { %v1389_v49 = vadd.f32 %v1387_v44, %v1324_v16 }
 0xf02   :  { %2480 = vtanh.f32 %v1389_v49 }
 0xf07   :  { %v1398_v51 = vpop.permute.xlu1 %1397 }
 0xf08   :  { %v2481_v50 = vpop.eup %2480  ;;  %v1400_v54 = vmul.f32 %v1398_v51, %v1371_v27 }
 0xf09   :  { %1393 = vrot.lane.b32.xlu0 %v2481_v50, %s2528_s27 }
 0xf11   :  { %1512 = vrot.lane.b32.xlu0 %v3049_v62, %s2527_s24  ;;  %v2334_v62 = vld [vmem:[%s3327_s1 + $0xe] sm:$0x3] }
 0xf12   :  { %2335 = vmatmul.msk.f32.vlgmr.msrb.gmra.mxu0 %vm54_vm1, %v2334_v62 }
 0xf19   :  { %1603 = vrot.lane.b32.xlu0 %v2398_v12, %s2526_s23 }
 0xf4d   :  { %v1509_v58 = vpop.permute.xlu2 %1508 }
 0xf4e   :  { %v1511_v61 = vmul.f32 %v1509_v58, %v1506_v59 }
 0xf7b   :  { %v1394_v53 = vpop.permute.xlu0 %1393 }
 0xf7c   :  { %v1396_v55 = vmul.f32 %v1394_v53, %v1391_v52 }
 0xf7e   :  { %v1401_v57 = vadd.f32 %v1400_v54, %v1396_v55 }
 0xf80   :  { %1403 = vrot.lane.b32.xlu1 %v1401_v57, %s2528_s27 }
 0xf83   :  { %v1513_v60 = vpop.permute.xlu0 %1512 }
 0xf84   :  { %v1515_v9 = vmul.f32 %v1513_v60, %v1486_v30 }
 0xf86   :  { %v1516_v10 = vadd.f32 %v1515_v9, %v1511_v61 }
 0xf88   :  { %1518 = vrot.lane.b32.xlu2 %v1516_v10, %s2528_s27  ;;  %1718 = vrot.lane.b32.xlu1 %v2397_v11, %s2526_s23 }
 0xf8b   :  { %v1604_v36 = vpop.permute.xlu0 %1603 }
 0xf8f   :  { %v1665_v20 = vpop.f32.mrf.mxu0 }
 0xf90   :  { %v1666_v5 = vadd.f32 %v2400_v18, %v1665_v20 }
 0xfe2   :  { %v1519_v63 = vpop.permute.xlu2 %1518 }
 0xfe3   :  { %1521 = vst.msk [vmem:[#allocation2] sm:$0x3] %vm41_vm0, %v1519_v63  ;;  %2331 = vmatmul.msk.f32.vlgmr.msrb.gmra.mxu2 %vm54_vm1, %v1519_v63 }
 0xfea   :  { %v3094_v13 = vld [vmem:[#allocation2] sm:$0x3] }
 0xfeb   :  { %2336 = vmatmul.msk.f32.vlgmr.msra.gmra.mxu1 %vm54_vm1, %v3094_v13 }
 0xff2   :  { %v1404_v14 = vpop.permute.xlu1 %1403 }
 0xff3   :  { %1406 = vst.msk [vmem:[#allocation2 + $0x2] sm:$0x3] %vm41_vm0, %v1404_v14 }
 0xffa   :  { %v1522_v15 = vld [vmem:[#allocation2 + $0x2] sm:$0x3]  ;;  %v1719_v32 = vpop.permute.xlu1 %1718 }
 0xffb   :  { %2332 = vmatmul.msk.f32.vlgmr.msra.gmra.mxu3 %vm54_vm1, %v1522_v15 }
0x1066   :  { %v1550_v19 = vpop.f32.mrf.mxu2 }
0x1067   :  { %v1551_v2 = vadd.f32 %v2399_v17, %v1550_v19  ;;  %v2402_v17 = vld [vmem:[%s3332_s8] ss:$0 sm:$0xff] }
0x1068   :  { %v1692_v33 = vpop.f32.mrf.mxu1 }
0x1069   :  { %v1721_v35 = vadd.f32 %v1719_v32, %v1692_v33  ;;  %v1695_v37 = vadd.f32 %v1692_v33, %v1666_v5 }
0x106b   :  { %1723 = vrot.lane.b32.xlu0 %v1721_v35, %s2526_s23  ;;  %v2337_v40 = vmul.f32 -1.442695, %v1695_v37 }
0x107e   :  { %v1577_v16 = vpop.f32.mrf.mxu3 }
0x107f   :  { %v1606_v56 = vadd.f32 %v1604_v36, %v1577_v16  ;;  %v1580_v8 = vadd.f32 %v1577_v16, %v1551_v2 }
0x1081   :  { %1608 = vrot.lane.b32.xlu2 %v1606_v56, %s2526_s23  ;;  %v2333_v38 = vmul.f32 -1.442695, %v1580_v8 }
0x1083   :  { %2482 = vpow2.f32 %v2333_v38 }
0x1084   :  { %2484 = vpow2.f32 %v2337_v40 }
0x1089   :  { %v2483_v7 = vpop.eup %2482 }
0x108a   :  { %v2485_v43 = vpop.eup %2484  ;;  %v1584_v21 = vadd.f32 1.0, %v2483_v7 }
0x108b   :  { %v1699_v0 = vadd.f32 1.0, %v2485_v43 }
0x108c   :  { %2486 = vrcp.f32 %v1584_v21  ;;  %v1596_v42 = vand.u32 2147483648, %v1584_v21  ;;  %vm1590_vm13 = vweird.f32 %v1584_v21  ;;  %v1594_v25 = vand.u32 2147483647, %v1584_v21 }
0x108d   :  { %2488 = vrcp.f32 %v1699_v0  ;;  %v1711_v27 = vand.u32 2147483648, %v1699_v0  ;;  %vm1705_vm2 = vweird.f32 %v1699_v0  ;;  %v1709_v29 = vand.u32 2147483647, %v1699_v0 }
0x108e   :  { %v1597_v30 = vor.u32 1.1754944e-38, %v1596_v42  ;;  %vm1595_vm4 = vcmp.eq.f32.partialorder %v1594_v25, 8.507059e+37 }
0x108f   :  { %v1712_v47 = vor.u32 1.1754944e-38, %v1711_v27  ;;  %vm1710_vm5 = vcmp.eq.f32.partialorder %v1709_v29, 8.507059e+37  ;;  %v1865_v29 = vld [vmem:[%s3333_s10 + $0x18] sm:$0xff] }
0x1090   :  { %1885 = vmatpush.msra.mxu0 %v1865_v29 }
0x1092   :  { %v2487_v1 = vpop.eup %2486 }
0x1093   :  { %v2489_v23 = vpop.eup %2488  ;;  %v1586_v22 = vmul.f32 %v2487_v1, %v1584_v21  ;;  %vm1591_vm12 = vweird.f32 %v2487_v1 }
0x1094   :  { %v1701_v4 = vmul.f32 %v2489_v23, %v1699_v0  ;;  %vm1706_vm14 = vweird.f32 %v2489_v23  ;;  %vm1592_vm15 = vmor %vm1590_vm13, %vm1591_vm12  ;;  %vm1928_vm13 = vcmask 523264  }
0x1095   :  { %v1587_v6 = vsub.f32 1.0, %v1586_v22  ;;  %vm1707_vm3 = vmor %vm1705_vm2, %vm1706_vm14 }
0x1096   :  { %v1702_v41 = vsub.f32 1.0, %v1701_v4 }
0x1097   :  { %v1588_v45 = vmul.f32 %v2487_v1, %v1587_v6 }
0x1098   :  { %v1703_v24 = vmul.f32 %v2489_v23, %v1702_v41 }
0x1099   :  { %v1589_v46 = vadd.f32 %v2487_v1, %v1588_v45 }
0x109a   :  { %v1704_v26 = vadd.f32 %v2489_v23, %v1703_v24 }
0x109b   :  { %v1593_v28 = vsel %vm1592_vm15, %v2487_v1, %v1589_v46 }
0x109c   :  { %v1708_v31 = vsel %vm1707_vm3, %v2489_v23, %v1704_v26  ;;  %v1598_v39 = vsel %vm1595_vm4, %v1597_v30, %v1593_v28  ;;  %v1864_v30 = vld [vmem:[%s3333_s10 + $0x10] sm:$0xff] }
0x109d   :  { %v1713_v44 = vsel %vm1710_vm5, %v1712_v47, %v1708_v31  ;;  %v1618_v59 = vsub.f32 1.0, %v1598_v39  ;;  %v1863_v31 = vld [vmem:[%s3333_s10 + $0x8] sm:$0xff]  ;;  %1886 = vmatpush.msra.mxu0 %v1864_v30 }
0x109e   :  { %v1733_v11 = vsub.f32 1.0, %v1713_v44 }
0x109f   :  { %1887 = vmatpush.msra.mxu0 %v1863_v31 }
0x10db   :  { %v1609_v34 = vpop.permute.xlu2 %1608 }
0x10dc   :  { %v1611_v48 = vmul.f32 %v1609_v34, %v1598_v39  ;;  %v1862_v34 = vld [vmem:[%s3333_s10] sm:$0xff] }
0x10dd   :  { %v1724_v49 = vpop.permute.xlu0 %1723  ;;  %1888 = vmatpush.msra.mxu0 %v1862_v34 }
0x10de   :  { %v1726_v50 = vmul.f32 %v1724_v49, %v1713_v44  ;;  %1613 = vrot.lane.b32.xlu1 %v1611_v48, %s2526_s23 }
0x10e0   :  { %1728 = vrot.lane.b32.xlu2 %v1726_v50, %s2526_s23 }
0x10e6   :  { %1624 = vrot.lane.b32.xlu1 %v1522_v15, %s2527_s24 }
0x113a   :  { %v1729_v51 = vpop.permute.xlu2 %1728 }
0x113b   :  { %v1731_v52 = vadd.f32 %v1729_v51, %v1666_v5 }
0x113d   :  { %2490 = vtanh.f32 %v1731_v52 }
0x1143   :  { %v2491_v53 = vpop.eup %2490 }
0x1144   :  { %1735 = vrot.lane.b32.xlu2 %v2491_v53, %s2528_s27 }
0x1150   :  { %v1614_v54 = vpop.permute.xlu1 %1613 }
0x1151   :  { %v1616_v55 = vadd.f32 %v1614_v54, %v1551_v2 }
0x1153   :  { %2492 = vtanh.f32 %v1616_v55  ;;  %v2403_v55 = vld [vmem:[%s3334_s11] ss:$0 sm:$0xff] }
0x1158   :  { %v1625_v58 = vpop.permute.xlu1 %1624 }
0x1159   :  { %v2493_v57 = vpop.eup %2492  ;;  %v1627_v61 = vmul.f32 %v1625_v58, %v1598_v39 }
0x115a   :  { %1620 = vrot.lane.b32.xlu0 %v2493_v57, %s2528_s27 }
0x1162   :  { %1739 = vrot.lane.b32.xlu0 %v3094_v13, %s2527_s24  ;;  %v2401_v13 = vld [vmem:[%s3329_s9] ss:$0 sm:$0xff] }
0x116a   :  { %1830 = vrot.lane.b32.xlu0 %v2401_v13, %s2526_s23  ;;  %v1917_v13 = vld [vmem:[%s3336_s0] sm:$0xff] }
0x119e   :  { %v1736_v62 = vpop.permute.xlu2 %1735 }
0x119f   :  { %v1738_v63 = vmul.f32 %v1736_v62, %v1733_v11 }
0x11cc   :  { %v1621_v60 = vpop.permute.xlu0 %1620 }
0x11cd   :  { %v1623_v9 = vmul.f32 %v1621_v60, %v1618_v59  ;;  %v1924_v59 = vld [vmem:[%s3336_s0 + $0x38] sm:$0xff]  ;;  %v1923_v60 = vld [vmem:[%s3336_s0 + $0x30] sm:$0xff] }
0x11ce   :  { %1940 = vmatpush.msrb.mxu1 %v1924_v59 }
0x11cf   :  { %v1628_v10 = vadd.f32 %v1627_v61, %v1623_v9  ;;  %v1922_v61 = vld [vmem:[%s3336_s0 + $0x28] sm:$0xff]  ;;  %v1921_v9 = vld [vmem:[%s3336_s0 + $0x20] sm:$0xff] }
0x11d0   :  { %1941 = vmatpush.msrb.mxu1 %v1923_v60 }
0x11d1   :  { %1630 = vrot.lane.b32.xlu1 %v1628_v10, %s2528_s27 }
0x11d2   :  { %1942 = vmatpush.msrb.mxu1 %v1922_v61 }
0x11d4   :  { %v1740_v12 = vpop.permute.xlu0 %1739  ;;  %1943 = vmatpush.msrb.mxu1 %v1921_v9 }
0x11d5   :  { %v1742_v14 = vmul.f32 %v1740_v12, %v1713_v44  ;;  %v1898_v44 = vlaneseq }
0x11d7   :  { %v1743_v15 = vadd.f32 %v1742_v14, %v1738_v63  ;;  %v3148_v49 = vand.u32 127, %v1898_v44  ;;  %v1920_v63 = vld [vmem:[%s3336_s0 + $0x18] sm:$0xff]  ;;  %v1919_v14 = vld [vmem:[%s3336_s0 + $0x10] sm:$0xff] }
0x11d8   :  { %1944 = vmatpush.msrb.mxu1 %v1920_v63 }
0x11d9   :  { %1745 = vrot.lane.b32.xlu2 %v1743_v15, %s2528_s27  ;;  %v1918_v15 = vld [vmem:[%s3336_s0 + $0x8] sm:$0xff] }
0x11da   :  { %1945 = vmatpush.msrb.mxu1 %v1919_v14 }
0x11dc   :  { %v1831_v36 = vpop.permute.xlu0 %1830  ;;  %1946 = vmatpush.msrb.mxu1 %v1918_v15 }
0x11de   :  { %1947 = vmatpush.msrb.mxu1 %v1917_v13 }
0x1233   :  { %v1746_v32 = vpop.permute.xlu2 %1745 }
0x1234   :  { %1748 = vst.msk [vmem:[#allocation2] sm:$0x3] %vm41_vm0, %v1746_v32  ;;  %2338 = vmatmul.msk.f32.vlgmr.msra.gmra.mxu2 %vm54_vm1, %v1746_v32 }
0x1243   :  { %v1631_v33 = vpop.permute.xlu1 %1630 }
0x1244   :  { %1633 = vst.msk [vmem:[#allocation2 + $0x2] sm:$0x3] %vm41_vm0, %v1631_v33 }
0x124b   :  { %v1749_v35 = vld [vmem:[#allocation2 + $0x2] sm:$0x3] }
0x124c   :  { %2339 = vmatmul.msk.f32.vlgmr.msrb.gmra.mxu3 %vm54_vm1, %v1749_v35 }
0x12b7   :  { %v1777_v18 = vpop.f32.mrf.mxu2 }
0x12b8   :  { %v1778_v19 = vadd.f32 %v2402_v17, %v1777_v18 }
0x12cf   :  { %v1804_v16 = vpop.f32.mrf.mxu3 }
0x12d0   :  { %v1833_v56 = vadd.f32 %v1831_v36, %v1804_v16  ;;  %v1807_v20 = vadd.f32 %v1804_v16, %v1778_v19 }
0x12d2   :  { %1835 = vrot.lane.b32.xlu1 %v1833_v56, %s2526_s23  ;;  %v2340_v2 = vmul.f32 -1.442695, %v1807_v20 }
0x12d4   :  { %2494 = vpow2.f32 %v2340_v2 }
0x12da   :  { %1851 = vrot.lane.b32.xlu1 %v1749_v35, %s2527_s24  ;;  %v2495_v5 = vpop.eup %2494 }
0x12db   :  { %v1811_v8 = vadd.f32 1.0, %v2495_v5 }
0x12dd   :  { %2496 = vrcp.f32 %v1811_v8  ;;  %v1823_v21 = vand.u32 2147483648, %v1811_v8  ;;  %vm1817_vm7 = vweird.f32 %v1811_v8  ;;  %v1821_v0 = vand.u32 2147483647, %v1811_v8 }
0x12df   :  { %v1824_v23 = vor.u32 1.1754944e-38, %v1823_v21  ;;  %vm1822_vm9 = vcmp.eq.f32.partialorder %v1821_v0, 8.507059e+37 }
0x12e3   :  { %v2497_v37 = vpop.eup %2496 }
0x12e4   :  { %v1813_v38 = vmul.f32 %v2497_v37, %v1811_v8  ;;  %vm1818_vm6 = vweird.f32 %v2497_v37 }
0x12e5   :  { %vm1819_vm8 = vmor %vm1817_vm7, %vm1818_vm6 }
0x12e6   :  { %v1814_v40 = vsub.f32 1.0, %v1813_v38 }
0x12e8   :  { %v1815_v7 = vmul.f32 %v2497_v37, %v1814_v40 }
0x12ea   :  { %v1816_v43 = vadd.f32 %v2497_v37, %v1815_v7 }
0x12ec   :  { %v1820_v1 = vsel %vm1819_vm8, %v2497_v37, %v1816_v43 }
0x12ed   :  { %v1825_v4 = vsel %vm1822_vm9, %v1824_v23, %v1820_v1 }
0x12ee   :  { %v1845_v42 = vsub.f32 1.0, %v1825_v4 }
0x1344   :  { %v1836_v22 = vpop.permute.xlu1 %1835 }
0x1345   :  { %v1838_v6 = vmul.f32 %v1836_v22, %v1825_v4 }
0x1347   :  { %1840 = vrot.lane.b32.xlu2 %v1838_v6, %s2526_s23 }
0x134c   :  { %v1852_v46 = vpop.permute.xlu1 %1851 }
0x134d   :  { %v1854_v26 = vmul.f32 %v1852_v46, %v1825_v4 }
0x13a1   :  { %v1841_v41 = vpop.permute.xlu2 %1840 }
0x13a2   :  { %v1843_v45 = vadd.f32 %v1841_v41, %v1778_v19 }
0x13a4   :  { %2498 = vtanh.f32 %v1843_v45 }
0x13aa   :  { %v2499_v24 = vpop.eup %2498 }
0x13ab   :  { %1847 = vrot.lane.b32.xlu0 %v2499_v24, %s2528_s27 }
0x141d   :  { %v1848_v25 = vpop.permute.xlu0 %1847 }
0x141e   :  { %v1850_v27 = vmul.f32 %v1848_v25, %v1845_v42 }
0x1420   :  { %v1855_v28 = vadd.f32 %v1854_v26, %v1850_v27 }
0x1422   :  { %1857 = vrot.lane.b32.xlu2 %v1855_v28, %s2528_s27 }
0x147c   :  { %v1858_v39 = vpop.permute.xlu2 %1857 }
0x147d   :  { %1860 = vst.msk [vmem:[#allocation2 + $0x2] sm:$0x3] %vm41_vm0, %v1858_v39 }
0x1484   :  { %v1861_v47 = vld [vmem:[#allocation2 + $0x2] sm:$0x3] }
0x1485   :  { %2341 = vmatmul.msk.f32.vlgmr.msra.gmra.mxu0 %vm54_vm1, %v1861_v47  ;;  %v1895_v48 = vsel %vm41_vm0, %v1861_v47, -inf }
0x1486   :  { %1896 = vmax.xlane.f32.xlu0 %v1895_v48 }
0x14f9   :  { %v1897_v50 = vpop.xlane.xlu0 %1896 }
0x14fa   :  { %vm1900_vm10 = vcmp.eq.f32.partialorder %v1861_v47, %v1897_v50 }
0x14fb   :  { %v1901_v51 = vsel %vm1900_vm10, %v3148_v49, 32 }
0x14fc   :  { %v1902_v52 = vsel %vm41_vm0, %v1901_v51, 2147483647 }
0x14fd   :  { %v1904_v53 = vshra.s32 %v1902_v52, 16  ;;  %v1903_v10 = vand.u32 65535, %v1902_v52 }
0x14ff   :  { %v1906_v54 = vcvt.s32.f32 %v1904_v53  ;;  %v1905_v11 = vcvt.s32.f32 %v1903_v10 }
0x1501   :  { %1907 = vmin.xlane.f32.xlu1 %v1906_v54 }
0x1502   :  { %v1890_v57 = vpop.f32.mrf.mxu0 }
0x1503   :  { %v1891_v58 = vadd.f32 %v2403_v55, %v1890_v57 }
0x1505   :  { %1894 = vst.msk [vmem:[%s3335_s12] sm:$0x3] %vm1893_vm11, %v1891_v58 }
0x1574   :  { %v1908_v62 = vpop.xlane.xlu1 %1907 }
0x1575   :  { %vm1909_vm12 = vcmp.eq.f32.partialorder %v1906_v54, %v1908_v62  ;;  %v1914_v32 = vcvt.f32.s32 %v1908_v62 }
0x1576   :  { %v1910_v12 = vsel %vm1909_vm12, %v1905_v11, inf }
0x1577   :  { %1911 = vmin.xlane.f32.xlu2 %v1910_v12  ;;  %v1915_v35 = vshll.u32 %v1914_v32, 16 }
0x15ea   :  { %v1912_v33 = vpop.xlane.xlu2 %1911 }
0x15eb   :  { %v1913_v36 = vcvt.f32.s32 %v1912_v33 }
0x15ed   :  { %v1916_v16 = vadd.s32 %v1915_v35, %v1913_v36 }
0x15ef   :  { %vm1925_vm14 = vcmp.eq.s32.totalorder %v3148_v49, %v1916_v16 }
0x15f0   :  { %v2342_v56 = vsel %vm1925_vm14, 1.0, %v2525_v3 }
0x15f1   :  { %2343 = vmatmul.msk.f32.vlgmr.msrb.gmra.mxu1 %vm1928_vm13, %v2342_v56 }
0x166e   :  { %v1949_v17 = vpop.f32.mrf.mxu1 }
0x166f   :  { %1952 = vst.msk [vmem:[#allocation3] sm:$0x3] %vm41_vm0, %v1949_v17 }
0x1670 LB: > { %v1996_v18 = vld [vmem:[%s3324_s3 + $0x18] sm:$0xff]  ;;  %v1995_v3 = vld [vmem:[%s3324_s3 + $0x10] sm:$0xff]  ;;  %v1994_v2 = vld [vmem:[%s3324_s3 + $0x8] sm:$0xff]  ;;  %s2529_s18 = smov 32   ;;  %s2530_s1 = smov 64   ;;  %s2523_s17 = sphi %s3187_s17, %s1958_s17  }
0x1671   : > { %v1965_v19 = vld [vmem:[%s3325_s2 + $0x18] sm:$0xff]  ;;  %2012 = vmatpush.msra.mxu2 %v1996_v18  ;;  %v1964_v20 = vld [vmem:[%s3325_s2 + $0x10] sm:$0xff]  ;;  %v1993_v5 = vld [vmem:[%s3324_s3] sm:$0xff]  ;;  %s2531_s29 = smov 96   ;;  %s2351_s19 = sshll.u32 %s2523_s17, 1 }
0x1672   : > { %1985 = vmatpush.msra.mxu0 %v1965_v19  ;;  %v1963_v8 = vld [vmem:[%s3325_s2 + $0x8] sm:$0xff]  ;;  %v1961_v37 = vld [vmem:[#allocation2] sm:$0x3]  ;;  %v2108_v47 = vld [vmem:[%s3330_s7 + $0x18] sm:$0xff]  ;;  %s2279_s22 = scalar_lea.vmem %s3335_s12, %s2351_s19  ;;  %s1958_s17 = sadd.s32 1, %s2523_s17  }
0x1673   : > { %2013 = vmatpush.msra.mxu2 %v1995_v3  ;;  %v2500_v38 = vld [vmem:[%s3326_s5] ss:$0 sm:$0xff]  ;;  %2064 = vrot.lane.b32.xlu2 %v1961_v37, %s2529_s18  ;;  %v2107_v48 = vld [vmem:[%s3330_s7 + $0x10] sm:$0xff]  ;;  %v2106_v44 = vld [vmem:[%s3330_s7 + $0x8] sm:$0xff]  ;;  %p1955_p0 = scmp.ge.s32.totalorder %s1958_s17, 179  }
0x1674   : > { %1986 = vmatpush.msra.mxu0 %v1964_v20  ;;  %v1962_v40 = vld [vmem:[%s3325_s2] sm:$0xff]  ;;  %2043 = vrot.lane.b32.xlu0 %v2500_v38, %s2530_s1  ;;  %v2078_v57 = vld [vmem:[%s3331_s6 + $0x18] sm:$0xff]  ;;  %v2077_v58 = vld [vmem:[%s3331_s6 + $0x10] sm:$0xff] }
0x1675   : > { %2014 = vmatpush.msra.mxu2 %v1994_v2  ;;  %v2501_v1 = vld [vmem:[%s3328_s4] ss:$0 sm:$0xff]  ;;  %2124 = vmatpush.msra.mxu3 %v2108_v47  ;;  %v2074_v54 = vld [vmem:[#allocation2 + $0x2] sm:$0x3]  ;;  %v2076_v59 = vld [vmem:[%s3331_s6 + $0x8] sm:$0xff] }
0x1676   : > { %1987 = vmatpush.msra.mxu0 %v1963_v8  ;;  %v1960_v7 = vld [vmem:[#allocation3] sm:$0x3]  ;;  %v2502_v55 = vld [vmem:[%s3329_s9] ss:$0 sm:$0xff] }
0x1677   : > { %2015 = vmatpush.msra.mxu2 %v1993_v5  ;;  %2125 = vmatpush.msra.mxu3 %v2107_v48  ;;  %v2105_v53 = vld [vmem:[%s3330_s7] sm:$0xff] }
0x1678   : > { %1988 = vmatpush.msra.mxu0 %v1962_v40  ;;  %2345 = vmatmul.msk.f32.vlgmr.msra.gmra.mxu2 %vm54_vm1, %v1961_v37  ;;  %v2075_v60 = vld [vmem:[%s3331_s6] sm:$0xff] }
0x1679   : > { %2344 = vmatmul.msk.f32.vlgmr.msra.gmra.mxu0 %vm54_vm1, %v1960_v7  ;;  %2126 = vmatpush.msra.mxu3 %v2106_v44  ;;  %v2503_v32 = vld [vmem:[%s3332_s8] ss:$0 sm:$0xff]  ;;  %v2246_v44 = vld [vmem:[%s3336_s0 + $0x38] sm:$0xff] }
0x167a   : > { %2097 = vmatpush.msrb.mxu2 %v2078_v57  ;;  %2261 = vmatpush.msra.mxu1 %v2246_v44 }
0x167b   : > { %2127 = vmatpush.msra.mxu3 %v2105_v53  ;;  %v2242_v53 = vld [vmem:[%s3336_s0 + $0x18] sm:$0xff] }
0x167c   : > { %2348 = vmatmul.msk.f32.vlgmr.msra.gmra.mxu3 %vm54_vm1, %v2074_v54  ;;  %2098 = vmatpush.msrb.mxu2 %v2077_v58 }
0x167e   : > { %2099 = vmatpush.msrb.mxu2 %v2076_v59  ;;  %v2241_v59 = vld [vmem:[%s3336_s0 + $0x10] sm:$0xff] }
0x1680   : > { %2100 = vmatpush.msrb.mxu2 %v2075_v60  ;;  %v2240_v60 = vld [vmem:[%s3336_s0 + $0x8] sm:$0xff] }
0x16cd   : > { %v2065_v61 = vpop.permute.xlu2 %2064 }
0x16e6   : > { %v2044_v43 = vpop.permute.xlu0 %2043 }
0x16f6   : > { %v1990_v23 = vpop.f32.mrf.mxu0 }
0x16f7   : > { %v1991_v22 = vadd.f32 %v2501_v1, %v1990_v23  ;;  %v2189_v23 = vld [vmem:[%s3333_s10 + $0x18] sm:$0xff] }
0x16f8   : > { %2208 = vmatpush.msrb.mxu0 %v2189_v23 }
0x16fb   : > { %v2017_v21 = vpop.f32.mrf.mxu2 }
0x16fc   : > { %v2046_v0 = vadd.f32 %v2044_v43, %v2017_v21  ;;  %v2020_v4 = vadd.f32 %v2017_v21, %v1991_v22 }
0x16fe   : > { %2048 = vrot.lane.b32.xlu0 %v2046_v0, %s2530_s1  ;;  %v2346_v6 = vmul.f32 -1.442695, %v2020_v4  ;;  %v2187_v4 = vld [vmem:[%s3333_s10 + $0x8] sm:$0xff] }
0x16ff   : > { %v2129_v15 = vpop.f32.mrf.mxu3 }
0x1700   : > { %2505 = vpow2.f32 %v2346_v6  ;;  %v2186_v6 = vld [vmem:[%s3333_s10] sm:$0xff] }
0x1706   : > { %v2506_v41 = vpop.eup %2505  ;;  %2155 = vrot.lane.b32.xlu0 %v2502_v55, %s2530_s1 }
0x1707   : > { %v2024_v45 = vadd.f32 1.0, %v2506_v41 }
0x1709   : > { %2507 = vrcp.f32 %v2024_v45  ;;  %v2036_v27 = vand.u32 2147483648, %v2024_v45  ;;  %vm2030_vm2 = vweird.f32 %v2024_v45  ;;  %v2034_v28 = vand.u32 2147483647, %v2024_v45 }
0x170b   : > { %v2037_v30 = vor.u32 1.1754944e-38, %v2036_v27  ;;  %vm2035_vm4 = vcmp.eq.f32.partialorder %v2034_v28, 8.507059e+37  ;;  %v2504_v27 = vld [vmem:[%s3334_s11] ss:$0 sm:$0xff] }
0x170f   : > { %v2508_v24 = vpop.eup %2507 }
0x1710   : > { %v2026_v46 = vmul.f32 %v2508_v24, %v2024_v45  ;;  %vm2031_vm15 = vweird.f32 %v2508_v24 }
0x1711   : > { %vm2032_vm3 = vmor %vm2030_vm2, %vm2031_vm15 }
0x1712   : > { %v2027_v42 = vsub.f32 1.0, %v2026_v46 }
0x1714   : > { %v2028_v25 = vmul.f32 %v2508_v24, %v2027_v42 }
0x1716   : > { %v2029_v26 = vadd.f32 %v2508_v24, %v2028_v25 }
0x1718   : > { %v2033_v29 = vsel %vm2032_vm3, %v2508_v24, %v2029_v26 }
0x1719   : > { %v2038_v31 = vsel %vm2035_vm4, %v2037_v30, %v2033_v29 }
0x171a   : > { %v2058_v9 = vsub.f32 1.0, %v2038_v31  ;;  %v2067_v62 = vmul.f32 %v2065_v61, %v2038_v31  ;;  %v2239_v61 = vld [vmem:[%s3336_s0] sm:$0xff] }
0x1770   : > { %v2049_v34 = vpop.permute.xlu0 %2048 }
0x1771   : > { %v2051_v39 = vmul.f32 %v2049_v34, %v2038_v31 }
0x1773   : > { %2053 = vrot.lane.b32.xlu1 %v2051_v39, %s2530_s1 }
0x1778   : > { %v2156_v14 = vpop.permute.xlu0 %2155 }
0x1779   : > { %v2158_v13 = vadd.f32 %v2156_v14, %v2129_v15 }
0x17e5   : > { %v2054_v50 = vpop.permute.xlu1 %2053 }
0x17e6   : > { %v2056_v51 = vadd.f32 %v2054_v50, %v1991_v22  ;;  %v2188_v22 = vld [vmem:[%s3333_s10 + $0x10] sm:$0xff] }
0x17e7   : > { %2209 = vmatpush.msrb.mxu0 %v2188_v22  ;;  %v2245_v50 = vld [vmem:[%s3336_s0 + $0x30] sm:$0xff] }
0x17e8   : > { %2509 = vtanh.f32 %v2056_v51  ;;  %v2244_v51 = vld [vmem:[%s3336_s0 + $0x28] sm:$0xff]  ;;  %2262 = vmatpush.msra.mxu1 %v2245_v50 }
0x17e9   : > { %2210 = vmatpush.msrb.mxu0 %v2187_v4 }
0x17ea   : > { %2263 = vmatpush.msra.mxu1 %v2244_v51 }
0x17eb   : > { %2211 = vmatpush.msrb.mxu0 %v2186_v6 }
0x17ee   : > { %v2510_v52 = vpop.eup %2509 }
0x17ef   : > { %2060 = vrot.lane.b32.xlu1 %v2510_v52, %s2531_s29  ;;  %v2243_v52 = vld [vmem:[%s3336_s0 + $0x20] sm:$0xff] }
0x17f0   : > { %2264 = vmatpush.msra.mxu1 %v2243_v52 }
0x17f2   : > { %2265 = vmatpush.msra.mxu1 %v2242_v53 }
0x17f4   : > { %2266 = vmatpush.msra.mxu1 %v2241_v59 }
0x17f6   : > { %2267 = vmatpush.msra.mxu1 %v2240_v60 }
0x17f7   : > { %2160 = vrot.lane.b32.xlu1 %v2158_v13, %s2530_s1 }
0x17f8   : > { %2268 = vmatpush.msra.mxu1 %v2239_v61 }
0x17ff   : > { %2176 = vrot.lane.b32.xlu1 %v2074_v54, %s2529_s18 }
0x1861   : > { %v2061_v10 = vpop.permute.xlu1 %2060 }
0x1862   : > { %v2063_v11 = vmul.f32 %v2061_v10, %v2058_v9 }
0x1864   : > { %v2068_v12 = vadd.f32 %v2067_v62, %v2063_v11 }
0x1866   : > { %2070 = vrot.lane.b32.xlu2 %v2068_v12, %s2531_s29 }
0x1869   : > { %v2161_v7 = vpop.permute.xlu1 %2160 }
0x1871   : > { %v2177_v41 = vpop.permute.xlu1 %2176 }
0x18c0   : > { %v2071_v63 = vpop.permute.xlu2 %2070 }
0x18c1   : > { %2073 = vst.msk [vmem:[#allocation2] sm:$0x3] %vm41_vm0, %v2071_v63  ;;  %2347 = vmatmul.msk.f32.vlgmr.msrb.gmra.mxu2 %vm54_vm1, %v2071_v63  ;;  %v2532_v63 = vmov 0.0  }
0x1944   : > { %v2102_v33 = vpop.f32.mrf.mxu2 }
0x1945   : > { %v2103_v35 = vadd.f32 %v2503_v32, %v2102_v33 }
0x1947   : > { %v2132_v36 = vadd.f32 %v2129_v15, %v2103_v35 }
0x1949   : > { %v2349_v16 = vmul.f32 -1.442695, %v2132_v36 }
0x194b   : > { %2511 = vpow2.f32 %v2349_v16 }
0x1951   : > { %v2512_v56 = vpop.eup %2511 }
0x1952   : > { %v2136_v17 = vadd.f32 1.0, %v2512_v56 }
0x1954   : > { %2513 = vrcp.f32 %v2136_v17  ;;  %v2148_v20 = vand.u32 2147483648, %v2136_v17  ;;  %v2146_v5 = vand.u32 2147483647, %v2136_v17  ;;  %vm2142_vm6 = vweird.f32 %v2136_v17 }
0x1956   : > { %v2149_v37 = vor.u32 1.1754944e-38, %v2148_v20  ;;  %vm2147_vm8 = vcmp.eq.f32.partialorder %v2146_v5, 8.507059e+37 }
0x195a   : > { %v2514_v18 = vpop.eup %2513 }
0x195b   : > { %v2138_v3 = vmul.f32 %v2514_v18, %v2136_v17  ;;  %vm2143_vm5 = vweird.f32 %v2514_v18 }
0x195c   : > { %vm2144_vm7 = vmor %vm2142_vm6, %vm2143_vm5 }
0x195d   : > { %v2139_v19 = vsub.f32 1.0, %v2138_v3 }
0x195f   : > { %v2140_v2 = vmul.f32 %v2514_v18, %v2139_v19 }
0x1961   : > { %v2141_v8 = vadd.f32 %v2514_v18, %v2140_v2 }
0x1963   : > { %v2145_v38 = vsel %vm2144_vm7, %v2514_v18, %v2141_v8 }
0x1964   : > { %v2150_v40 = vsel %vm2147_vm8, %v2149_v37, %v2145_v38 }
0x1965   : > { %v2163_v43 = vmul.f32 %v2161_v7, %v2150_v40  ;;  %v2170_v45 = vsub.f32 1.0, %v2150_v40  ;;  %v2179_v46 = vmul.f32 %v2177_v41, %v2150_v40 }
0x1967   : > { %2165 = vrot.lane.b32.xlu2 %v2163_v43, %s2530_s1 }
0x19c1   : > { %v2166_v21 = vpop.permute.xlu2 %2165 }
0x19c2   : > { %v2168_v0 = vadd.f32 %v2166_v21, %v2103_v35 }
0x19c4   : > { %2515 = vtanh.f32 %v2168_v0 }
0x19ca   : > { %v2516_v1 = vpop.eup %2515 }
0x19cb   : > { %2172 = vrot.lane.b32.xlu0 %v2516_v1, %s2531_s29 }
0x1a3d   : > { %v2173_v24 = vpop.permute.xlu0 %2172 }
0x1a3e   : > { %v2175_v42 = vmul.f32 %v2173_v24, %v2170_v45 }
0x1a40   : > { %v2180_v25 = vadd.f32 %v2179_v46, %v2175_v42 }
0x1a42   : > { %2182 = vrot.lane.b32.xlu2 %v2180_v25, %s2531_s29 }
0x1a9c   : > { %v2183_v26 = vpop.permute.xlu2 %2182 }
0x1a9d   : > { %2185 = vst.msk [vmem:[#allocation2 + $0x2] sm:$0x3] %vm41_vm0, %v2183_v26  ;;  %2350 = vmatmul.msk.f32.vlgmr.msrb.gmra.mxu0 %vm54_vm1, %v2183_v26 }
0x1b1a   : > { %v2213_v28 = vpop.f32.mrf.mxu0 }
0x1b1b   : > { %v2214_v29 = vadd.f32 %v2504_v27, %v2213_v28 }
0x1b1d   : > { %2352 = vst.msk [vmem:[%s2279_s22 + $0x2] sm:$0x3] %vm1893_vm11, %v2214_v29  ;;  %v2219_v30 = vsel %vm1893_vm11, %v2214_v29, -inf }
0x1b1e   : > { %2220 = vmax.xlane.f32.xlu0 %v2219_v30 }
0x1b91   : > { %v2221_v31 = vpop.xlane.xlu0 %2220 }
0x1b92   : > { %vm2222_vm9 = vcmp.eq.f32.partialorder %v2214_v29, %v2221_v31 }
0x1b93   : > { %v2223_v34 = vsel %vm2222_vm9, %v3148_v49, 64 }
0x1b94   : > { %v2224_v39 = vsel %vm1893_vm11, %v2223_v34, 2147483647 }
0x1b95   : > { %v2226_v47 = vshra.s32 %v2224_v39, 16  ;;  %v2225_v54 = vand.u32 65535, %v2224_v39 }
0x1b97   : > { %v2228_v48 = vcvt.s32.f32 %v2226_v47  ;;  %v2227_v57 = vcvt.s32.f32 %v2225_v54 }
0x1b99   : > { %2229 = vmin.xlane.f32.xlu1 %v2228_v48 }
0x1c0c   : > { %v2230_v55 = vpop.xlane.xlu1 %2229 }
0x1c0d   : > { %vm2231_vm10 = vcmp.eq.f32.partialorder %v2228_v48, %v2230_v55  ;;  %v2236_v9 = vcvt.f32.s32 %v2230_v55 }
0x1c0e   : > { %v2232_v58 = vsel %vm2231_vm10, %v2227_v57, inf }
0x1c0f   : > { %2233 = vmin.xlane.f32.xlu2 %v2232_v58  ;;  %v2237_v62 = vshll.u32 %v2236_v9, 16 }
0x1c82   : > { %v2234_v10 = vpop.xlane.xlu2 %2233 }
0x1c83   : > { %v2235_v11 = vcvt.f32.s32 %v2234_v10 }
0x1c85   : > { %v2238_v12 = vadd.s32 %v2237_v62, %v2235_v11 }
0x1c87   : > { %vm2247_vm12 = vcmp.eq.s32.totalorder %v3148_v49, %v2238_v12 }
0x1c88   : > { %v2353_v14 = vsel %vm2247_vm12, 1.0, %v2532_v63 }
0x1c89   : > { %2354 = vmatmul.msk.f32.vlgmr.msra.gmra.mxu1 %vm1928_vm13, %v2353_v14 }
0x1d03   :  { %1957 = sbr.rel (!%p1955_p0) target bundleno = 5744 (0x1670), region = 84 }
0x1d06   : > { %v2270_v15 = vpop.f32.mrf.mxu1 }
0x1d07   : > { %2273 = vst.msk [vmem:[#allocation3] sm:$0x3] %vm41_vm0, %v2270_v15 }

</bundles_post_ra>
